<compile_context>
chip_gen: v7x
topology: tpu7x:2x2x1
jax: 0.10.0
libtpu: 0.0.40
codegen_flags: <defaults>
</compile_context>

<pallas_src>
import math
from functools import partial

import jax
import jax.numpy as jnp
from jax import lax
from jax.experimental import pallas as pl
from jax.experimental.pallas import tpu as pltpu


# ---------------------------------------------------------------------------
# Kernel 1: fused QKV projection -> head-block-major Q/K/V.
#   x block (1, tp, H) @ Wqkv (H, 3H) + bqkv, then G lane-dense (tp, W)
#   stores per output into (B, G, S_pad, W) arrays.
# ---------------------------------------------------------------------------
def _qkv_proj_kernel(num_blocks, block_width, x_ref, w_ref, b_ref,
                     q_ref, k_ref, v_ref):
    G, W = num_blocks, block_width
    H = G * W
    x = x_ref[0]                                                   # (tp, H)
    qkv = jnp.dot(x, w_ref[...], preferred_element_type=jnp.float32)
    qkv = qkv + b_ref[...]                                         # (tp, 3H) f32
    for g in range(G):                       # static, small (G = H / W)
        lo = g * W
        q_ref[0, g] = qkv[:, lo:lo + W].astype(q_ref.dtype)
        k_ref[0, g] = qkv[:, H + lo:H + lo + W].astype(k_ref.dtype)
        v_ref[0, g] = qkv[:, 2 * H + lo:2 * H + lo + W].astype(v_ref.dtype)


# ---------------------------------------------------------------------------
# Kernel 2: attention for one (batch, head-block, q-tile) grid point.
#   q block (1, 1, tq, W), k/v blocks (1, 1, S_pad, W) (contiguous,
#   head-block-major), additive mask row (1, 1, S_pad).
#   W = heads_per_blk * head_size (lane-dense, e.g. 2 heads of 64 -> 128).
# ---------------------------------------------------------------------------
def _attn_kernel(heads_per_blk, head_size, mask_ref, q_ref, k_ref, v_ref, o_ref):
    q = q_ref[0, 0]         # (tq, W)     compute dtype (bf16 by default)
    k = k_ref[0, 0]         # (S_pad, W)
    v = v_ref[0, 0]         # (S_pad, W)
    madd = mask_ref[0]      # (1, S_pad)  f32 additive mask (0 / -10000)

    outs = []
    for h in range(heads_per_blk):           # tiny static loop (<= 128 // hd)
        lo = h * head_size
        qh = q[:, lo:lo + head_size]         # (tq, hd)
        kh = k[:, lo:lo + head_size]         # (S_pad, hd)
        vh = v[:, lo:lo + head_size]         # (S_pad, hd)

        # scores = (Q * scale) @ K^T -- the 1/sqrt(hd) scale is folded into
        # the Q weights at prep time, so no per-element multiply here.
        s = lax.dot_general(qh, kh, (((1,), (1,)), ((), ())),
                            preferred_element_type=jnp.float32)
        s = s + madd                         # broadcast add of hoisted mask
        s = s - jnp.max(s, axis=-1, keepdims=True)
        # exp in the compute dtype (bf16 EUP path on v6e/v7x, halves the prob
        # tile), softmax stats stay f32.
        p = jnp.exp(s.astype(vh.dtype))
        l = jnp.sum(p.astype(jnp.float32), axis=-1, keepdims=True)
        inv_l = pl.reciprocal(l, approx=True)        # EUP slot, nearly free
        oh = jnp.dot(p, vh, preferred_element_type=jnp.float32) * inv_l
        outs.append(oh)

    blk = outs[0] if len(outs) == 1 else jnp.concatenate(outs, axis=-1)
    o_ref[0] = blk.astype(o_ref.dtype)       # one lane-dense (tq, W) store


# ---------------------------------------------------------------------------
# One-time weight preparation (hoisted out of the per-call hot path).
# ---------------------------------------------------------------------------
def prepare_qkv_params(params, num_heads, compute_dtype=jnp.bfloat16):
    """Fused (H, 3H) QKV weight / (1, 3H) bias, PyTorch Linear semantics
    (y = x @ W.T + b), with the 1/sqrt(head_size) scale folded into Q."""
    H = params["wq"].shape[0]
    head_size = H // num_heads
    scale = 1.0 / math.sqrt(head_size)
    wqkv = jnp.concatenate(
        [params["wq"].T * scale, params["wk"].T, params["wv"].T],
        axis=1).astype(compute_dtype)                                # (H, 3H)
    bqkv = jnp.concatenate(
        [params["bq"] * scale, params["bk"], params["bv"]]
    ).reshape(1, 3 * H).astype(jnp.float32)                          # (1, 3H)
    return {"wqkv": wqkv, "bqkv": bqkv}


def bert_self_attention(hidden_states, attention_mask, prepared, *, num_heads):
    B, S, H = hidden_states.shape
    assert H % num_heads == 0
    # The module's mask[..., :512] slice (and PyTorch broadcasting) only
    # supports S <= 512; mirror that constraint explicitly.
    assert S <= 512, "BertSelfAttention mask slicing only supports S <= 512"
    head_size = H // num_heads
    out_dtype = hidden_states.dtype
    wqkv, bqkv = prepared["wqkv"], prepared["bqkv"]
    cdt = wqkv.dtype

    # Replicate the module's hard slice (no-op for S <= 512).
    attention_mask = attention_mask[:, :, :, :512]

    # ---- head-block / tile geometry --------------------------------------
    if head_size >= 128:
        heads_per_blk = 1
    else:
        heads_per_blk = math.gcd(max(1, 128 // head_size), num_heads)
    W = heads_per_blk * head_size     # lanes per head block (128 at BERT sizes)
    G = num_heads // heads_per_blk    # number of head blocks

    # Pad S up to a multiple of 128 so the score working set stays (128, S_pad)
    # instead of blowing up to an (S, S) tile for odd sequence lengths.
    S_pad = ((S + 127) // 128) * 128
    tq = 128                                      # attention q-row tile
    tp = 256 if S_pad % 256 == 0 else 128         # projection row tile (MXU-wide)

    x = hidden_states.astype(cdt)
    if S_pad != S:
        x = jnp.pad(x, ((0, 0), (0, S_pad - S), (0, 0)))

    # Hoisted mask work: additive f32 row (0 valid / -10000 masked); padded
    # key positions are masked out so they contribute exp(...) == 0.
    madd = jnp.where(attention_mask[:, 0, 0, :] < 0, -10000.0, 0.0)
    madd = madd.astype(jnp.float32)
    if S_pad != S:
        madd = jnp.pad(madd, ((0, 0), (0, S_pad - S)), constant_values=-10000.0)
    madd = madd.reshape(B, 1, S_pad)

    # ---- kernel 1: fused QKV projection, head-block-major outputs --------
    # TODO(synk): pipeline_mode=pl.Buffered(1) on the constant-index wqkv/bqkv
    # specs would reclaim the second weight buffer if VMEM ever gets tight
    # (bf16 weights already keep BERT-base well under v5e's scoped default).
    qkv_shape = jax.ShapeDtypeStruct((B, G, S_pad, W), cdt)
    q, k, v = pl.pallas_call(
        partial(_qkv_proj_kernel, G, W),
        out_shape=(qkv_shape, qkv_shape, qkv_shape),
        grid_spec=pltpu.PrefetchScalarGridSpec(
            num_scalar_prefetch=0,
            grid=(B, S_pad // tp),
            in_specs=[
                pl.BlockSpec((1, tp, H), lambda b, t: (b, t, 0)),     # x tile
                pl.BlockSpec((H, 3 * H), lambda b, t: (0, 0)),        # Wqkv
                pl.BlockSpec((1, 3 * H), lambda b, t: (0, 0)),        # bqkv
            ],
            out_specs=[pl.BlockSpec((1, G, tp, W), lambda b, t: (b, 0, t, 0))
                       for _ in range(3)],
        ),
        compiler_params=pltpu.CompilerParams(
            dimension_semantics=("parallel", "parallel")),
    )(x, wqkv, bqkv)

    # ---- kernel 2: attention over (batch, head-block, q-tile) ------------
    # K/V have a constant block index across the q-tile axis (stay resident
    # in VMEM for all q-tiles of a (b, g) pair) and each fetch is one
    # contiguous (S_pad, W) DMA thanks to the head-block-major layout.
    # TODO(synk): pipeline_mode=pl.Buffered(3) on K/V could start the next
    # head block's fetch earlier if profiling shows exposed DMA.
    out = pl.pallas_call(
        partial(_attn_kernel, heads_per_blk, head_size),
        out_shape=jax.ShapeDtypeStruct((B, S_pad, H), out_dtype),
        grid_spec=pltpu.PrefetchScalarGridSpec(
            num_scalar_prefetch=0,
            grid=(B, G, S_pad // tq),
            in_specs=[
                pl.BlockSpec((1, 1, S_pad), lambda b, g, t: (b, 0, 0)),        # mask
                pl.BlockSpec((1, 1, tq, W), lambda b, g, t: (b, g, t, 0)),     # Q
                pl.BlockSpec((1, 1, S_pad, W), lambda b, g, t: (b, g, 0, 0)),  # K
                pl.BlockSpec((1, 1, S_pad, W), lambda b, g, t: (b, g, 0, 0)),  # V
            ],
            out_specs=pl.BlockSpec((1, tq, W), lambda b, g, t: (b, t, g)),
        ),
        compiler_params=pltpu.CompilerParams(
            dimension_semantics=("parallel", "parallel", "arbitrary")),
    )(madd, q, k, v)

    if S_pad != S:
        out = out[:, :S, :]
    return out


def _reference(hidden_states, attention_mask, params, num_heads):
    """Pure-JAX replica of the PyTorch module for correctness checking."""
    B, S, H = hidden_states.shape
    hd = H // num_heads

    def lin(x, w, b):  # PyTorch Linear semantics
        return x @ w.T + b

    def split_heads(p):
        return p.reshape(B, S, num_heads, hd).transpose(0, 2, 1, 3)

    q = split_heads(lin(hidden_states, params["wq"], params["bq"]))
    k = split_heads(lin(hidden_states, params["wk"], params["bk"]))
    v = split_heads(lin(hidden_states, params["wv"], params["bv"]))

    mask = attention_mask[:, :, :, :512]
    scores = jnp.einsum("bhqd,bhkd->bhqk", q, k) / math.sqrt(hd)
    scores = jnp.where(mask < 0, -10000.0, scores)      # masked_fill semantics
    probs = jax.nn.softmax(scores, axis=-1)
    per_head = jnp.einsum("bhqk,bhkd->bhqd", probs, v)
    return jnp.concatenate([per_head[:, i] for i in range(num_heads)], axis=-1)


if __name__ == "__main__":
    B, S, H = 2, 8, 32
    NUM_HEADS = 4

    key = jax.random.PRNGKey(0)
    k_x, k_wq, k_bq, k_wk, k_bk, k_wv, k_bv = jax.random.split(key, 7)

    hidden_states = jax.random.normal(k_x, (B, S, H), dtype=jnp.float32)

    bound = 1.0 / math.sqrt(H)  # nn.Linear default init range
    params = {
        "wq": jax.random.uniform(k_wq, (H, H), jnp.float32, -bound, bound),
        "bq": jax.random.uniform(k_bq, (H,), jnp.float32, -bound, bound),
        "wk": jax.random.uniform(k_wk, (H, H), jnp.float32, -bound, bound),
        "bk": jax.random.uniform(k_bk, (H,), jnp.float32, -bound, bound),
        "wv": jax.random.uniform(k_wv, (H, H), jnp.float32, -bound, bound),
        "bv": jax.random.uniform(k_bv, (H,), jnp.float32, -bound, bound),
    }

    # Standard extended attention mask: 0 for valid, -10000 for padded positions.
    attention_mask = jnp.zeros((B, 1, 1, S), dtype=jnp.float32)
    attention_mask = attention_mask.at[1, 0, 0, 6:].set(-10000.0)

    # TODO(synk): nn.Dropout is defined in __init__ but never applied in this
    # module's forward, so it is intentionally omitted.

    # One-time weight prep (bf16 compute path), then jit the forward.
    prepared = prepare_qkv_params(params, NUM_HEADS, compute_dtype=jnp.bfloat16)
    fwd = jax.jit(partial(bert_self_attention, num_heads=NUM_HEADS))

    out = fwd(hidden_states, attention_mask, prepared)
    out = jax.block_until_ready(out)

    ref = _reference(hidden_states, attention_mask, params, NUM_HEADS)
    assert out.shape == (B, S, H)
    # Tolerance covers the bf16 compute path (Q/K/V intermediates, bf16 exp)
    # plus pl.reciprocal(approx=True); accumulation is f32 throughout.
    assert jnp.allclose(out, ref, rtol=2e-2, atol=2e-2), "mismatch vs reference"

    print("KERNEL_OK")
</pallas_src>

<mosaic_0001>
module attributes {stable_mosaic.version = 11 : i64} {
  func.func @_qkv_proj_kernel(%arg0: i32, %arg1: i32, %arg2: memref<1x128x32xbf16, #tpu.memory_space<vmem>>, %arg3: memref<32x96xbf16, #tpu.memory_space<vmem>>, %arg4: memref<1x96xf32, #tpu.memory_space<vmem>>, %arg5: memref<1x1x128x32xbf16, #tpu.memory_space<vmem>>, %arg6: memref<1x1x128x32xbf16, #tpu.memory_space<vmem>>, %arg7: memref<1x1x128x32xbf16, #tpu.memory_space<vmem>>) attributes {dimension_semantics = [#tpu.dimension_semantics<parallel>, #tpu.dimension_semantics<parallel>], iteration_bounds = array<i64: 2, 1>, scalar_prefetch = 0 : i64, scratch_operands = 0 : i64, tpu.core_type = #tpu.core_type<tc>, window_params = [{transform_indices = @transform_0, window_bounds = array<i64: 1, 128, 32>}, {pipeline_mode = #tpu.pipeline_mode<synchronous>, transform_indices = @transform_1, window_bounds = array<i64: 32, 96>}, {pipeline_mode = #tpu.pipeline_mode<synchronous>, transform_indices = @transform_2, window_bounds = array<i64: 1, 96>}, {transform_indices = @transform_3, window_bounds = array<i64: 1, 1, 128, 32>}, {transform_indices = @transform_4, window_bounds = array<i64: 1, 1, 128, 32>}, {transform_indices = @transform_5, window_bounds = array<i64: 1, 1, 128, 32>}]} {
    %c0 = arith.constant 0 : index
    %c0_0 = arith.constant 0 : index
    %c0_1 = arith.constant 0 : index
    %0 = vector.load %arg2[%c0, %c0_0, %c0_1] : memref<1x128x32xbf16, #tpu.memory_space<vmem>>, vector<1x128x32xbf16>
    %1 = vector.shape_cast %0 : vector<1x128x32xbf16> to vector<128x32xbf16>
    %c0_2 = arith.constant 0 : index
    %c0_3 = arith.constant 0 : index
    %2 = vector.load %arg3[%c0_2, %c0_3] : memref<32x96xbf16, #tpu.memory_space<vmem>>, vector<32x96xbf16>
    %cst = arith.constant dense<0.000000e+00> : vector<128x96xf32>
    %3 = tpu.matmul %1, %2, %cst {dimension_numbers = #tpu.dot_dimension_numbers<[1], [0], [0], [1], [0, 0, 1, 1], [], []>} : vector<128x32xbf16>, vector<32x96xbf16>, vector<128x96xf32> -> vector<128x96xf32>
    %c0_4 = arith.constant 0 : index
    %c0_5 = arith.constant 0 : index
    %4 = vector.load %arg4[%c0_4, %c0_5] : memref<1x96xf32, #tpu.memory_space<vmem>>, vector<1x96xf32>
    %5 = vector.broadcast %4 : vector<1x96xf32> to vector<128x96xf32>
    %6 = arith.addf %3, %5 : vector<128x96xf32>
    %7 = vector.extract_strided_slice %6 {offsets = [0, 0], sizes = [128, 32], strides = [1, 1]} : vector<128x96xf32> to vector<128x32xf32>
    %8 = arith.truncf %7 : vector<128x32xf32> to vector<128x32xbf16>
    %c0_6 = arith.constant 0 : index
    %c0_7 = arith.constant 0 : index
    %c0_8 = arith.constant 0 : index
    %c0_9 = arith.constant 0 : index
    %9 = vector.load %arg5[%c0_6, %c0_7, %c0_8, %c0_9] : memref<1x1x128x32xbf16, #tpu.memory_space<vmem>>, vector<1x1x128x32xbf16>
    %10 = vector.shape_cast %9 : vector<1x1x128x32xbf16> to vector<128x32xbf16>
    %11 = vector.shape_cast %8 : vector<128x32xbf16> to vector<1x1x128x32xbf16>
    tpu.vector_store %arg5[%c0_6, %c0_7, %c0_8, %c0_9], %11 {strides = array<i32>} : memref<1x1x128x32xbf16, #tpu.memory_space<vmem>>, vector<1x1x128x32xbf16>,
    %12 = vector.extract_strided_slice %6 {offsets = [0, 32], sizes = [128, 32], strides = [1, 1]} : vector<128x96xf32> to vector<128x32xf32>
    %13 = arith.truncf %12 : vector<128x32xf32> to vector<128x32xbf16>
    %c0_10 = arith.constant 0 : index
    %c0_11 = arith.constant 0 : index
    %c0_12 = arith.constant 0 : index
    %c0_13 = arith.constant 0 : index
    %14 = vector.load %arg6[%c0_10, %c0_11, %c0_12, %c0_13] : memref<1x1x128x32xbf16, #tpu.memory_space<vmem>>, vector<1x1x128x32xbf16>
    %15 = vector.shape_cast %14 : vector<1x1x128x32xbf16> to vector<128x32xbf16>
    %16 = vector.shape_cast %13 : vector<128x32xbf16> to vector<1x1x128x32xbf16>
    tpu.vector_store %arg6[%c0_10, %c0_11, %c0_12, %c0_13], %16 {strides = array<i32>} : memref<1x1x128x32xbf16, #tpu.memory_space<vmem>>, vector<1x1x128x32xbf16>,
    %17 = vector.extract_strided_slice %6 {offsets = [0, 64], sizes = [128, 32], strides = [1, 1]} : vector<128x96xf32> to vector<128x32xf32>
    %18 = arith.truncf %17 : vector<128x32xf32> to vector<128x32xbf16>
    %c0_14 = arith.constant 0 : index
    %c0_15 = arith.constant 0 : index
    %c0_16 = arith.constant 0 : index
    %c0_17 = arith.constant 0 : index
    %19 = vector.load %arg7[%c0_14, %c0_15, %c0_16, %c0_17] : memref<1x1x128x32xbf16, #tpu.memory_space<vmem>>, vector<1x1x128x32xbf16>
    %20 = vector.shape_cast %19 : vector<1x1x128x32xbf16> to vector<128x32xbf16>
    %21 = vector.shape_cast %18 : vector<128x32xbf16> to vector<1x1x128x32xbf16>
    tpu.vector_store %arg7[%c0_14, %c0_15, %c0_16, %c0_17], %21 {strides = array<i32>} : memref<1x1x128x32xbf16, #tpu.memory_space<vmem>>, vector<1x1x128x32xbf16>,
    return
  }
  func.func @transform_0(%arg0: i32, %arg1: i32) -> (i32, i32, i32) {
    %c0_i32 = arith.constant 0 : i32
    %c0_i32_0 = arith.constant 0 : i32
    return %arg0, %arg1, %c0_i32 : i32, i32, i32
  }
  func.func @transform_1(%arg0: i32, %arg1: i32) -> (i32, i32) {
    %c0_i32 = arith.constant 0 : i32
    %c0_i32_0 = arith.constant 0 : i32
    %c0_i32_1 = arith.constant 0 : i32
    return %c0_i32, %c0_i32_0 : i32, i32
  }
  func.func @transform_2(%arg0: i32, %arg1: i32) -> (i32, i32) {
    %c0_i32 = arith.constant 0 : i32
    %c0_i32_0 = arith.constant 0 : i32
    %c0_i32_1 = arith.constant 0 : i32
    return %c0_i32, %c0_i32_0 : i32, i32
  }
  func.func @transform_3(%arg0: i32, %arg1: i32) -> (i32, i32, i32, i32) {
    %c0_i32 = arith.constant 0 : i32
    %c0_i32_0 = arith.constant 0 : i32
    %c0_i32_1 = arith.constant 0 : i32
    return %arg0, %c0_i32, %arg1, %c0_i32_0 : i32, i32, i32, i32
  }
  func.func @transform_4(%arg0: i32, %arg1: i32) -> (i32, i32, i32, i32) {
    %c0_i32 = arith.constant 0 : i32
    %c0_i32_0 = arith.constant 0 : i32
    %c0_i32_1 = arith.constant 0 : i32
    return %arg0, %c0_i32, %arg1, %c0_i32_0 : i32, i32, i32, i32
  }
  func.func @transform_5(%arg0: i32, %arg1: i32) -> (i32, i32, i32, i32) {
    %c0_i32 = arith.constant 0 : i32
    %c0_i32_0 = arith.constant 0 : i32
    %c0_i32_1 = arith.constant 0 : i32
    return %arg0, %c0_i32, %arg1, %c0_i32_0 : i32, i32, i32, i32
  }
}

module attributes {stable_mosaic.version = 11 : i64} {
  func.func @_attn_kernel(%arg0: i32, %arg1: i32, %arg2: i32, %arg3: memref<1x1x128xf32, #tpu.memory_space<vmem>>, %arg4: memref<1x1x128x32xbf16, #tpu.memory_space<vmem>>, %arg5: memref<1x1x128x32xbf16, #tpu.memory_space<vmem>>, %arg6: memref<1x1x128x32xbf16, #tpu.memory_space<vmem>>, %arg7: memref<1x128x32xf32, #tpu.memory_space<vmem>>) attributes {dimension_semantics = [#tpu.dimension_semantics<parallel>, #tpu.dimension_semantics<parallel>, #tpu.dimension_semantics<arbitrary>], iteration_bounds = array<i64: 2, 1, 1>, scalar_prefetch = 0 : i64, scratch_operands = 0 : i64, tpu.core_type = #tpu.core_type<tc>, window_params = [{transform_indices = @transform_0, window_bounds = array<i64: 1, 1, 128>}, {transform_indices = @transform_1, window_bounds = array<i64: 1, 1, 128, 32>}, {transform_indices = @transform_2, window_bounds = array<i64: 1, 1, 128, 32>}, {transform_indices = @transform_3, window_bounds = array<i64: 1, 1, 128, 32>}, {transform_indices = @transform_4, window_bounds = array<i64: 1, 128, 32>}]} {
    %c0 = arith.constant 0 : index
    %c0_0 = arith.constant 0 : index
    %c0_1 = arith.constant 0 : index
    %c0_2 = arith.constant 0 : index
    %0 = vector.load %arg4[%c0, %c0_0, %c0_1, %c0_2] : memref<1x1x128x32xbf16, #tpu.memory_space<vmem>>, vector<1x1x128x32xbf16>
    %1 = vector.shape_cast %0 : vector<1x1x128x32xbf16> to vector<128x32xbf16>
    %c0_3 = arith.constant 0 : index
    %c0_4 = arith.constant 0 : index
    %c0_5 = arith.constant 0 : index
    %c0_6 = arith.constant 0 : index
    %2 = vector.load %arg5[%c0_3, %c0_4, %c0_5, %c0_6] : memref<1x1x128x32xbf16, #tpu.memory_space<vmem>>, vector<1x1x128x32xbf16>
    %3 = vector.shape_cast %2 : vector<1x1x128x32xbf16> to vector<128x32xbf16>
    %c0_7 = arith.constant 0 : index
    %c0_8 = arith.constant 0 : index
    %c0_9 = arith.constant 0 : index
    %c0_10 = arith.constant 0 : index
    %4 = vector.load %arg6[%c0_7, %c0_8, %c0_9, %c0_10] : memref<1x1x128x32xbf16, #tpu.memory_space<vmem>>, vector<1x1x128x32xbf16>
    %5 = vector.shape_cast %4 : vector<1x1x128x32xbf16> to vector<128x32xbf16>
    %c0_11 = arith.constant 0 : index
    %c0_12 = arith.constant 0 : index
    %c0_13 = arith.constant 0 : index
    %6 = vector.load %arg3[%c0_11, %c0_12, %c0_13] : memref<1x1x128xf32, #tpu.memory_space<vmem>>, vector<1x1x128xf32>
    %7 = vector.shape_cast %6 : vector<1x1x128xf32> to vector<1x128xf32>
    %8 = vector.extract_strided_slice %1 {offsets = [0, 0], sizes = [128, 8], strides = [1, 1]} : vector<128x32xbf16> to vector<128x8xbf16>
    %9 = vector.extract_strided_slice %3 {offsets = [0, 0], sizes = [128, 8], strides = [1, 1]} : vector<128x32xbf16> to vector<128x8xbf16>
    %10 = vector.extract_strided_slice %5 {offsets = [0, 0], sizes = [128, 8], strides = [1, 1]} : vector<128x32xbf16> to vector<128x8xbf16>
    %cst = arith.constant dense<0.000000e+00> : vector<128x128xf32>
    %11 = tpu.matmul %8, %9, %cst {dimension_numbers = #tpu.dot_dimension_numbers<[1], [1], [0], [0], [0, 0, 1, 0], [], []>} : vector<128x8xbf16>, vector<128x8xbf16>, vector<128x128xf32> -> vector<128x128xf32>
    %12 = vector.broadcast %7 : vector<1x128xf32> to vector<128x128xf32>
    %13 = arith.addf %11, %12 : vector<128x128xf32>
    %cst_14 = arith.constant dense<0xFF800000> : vector<128xf32>
    %14 = vector.multi_reduction <maximumf>, %13, %cst_14 [1] : vector<128x128xf32> to vector<128xf32>
    %15 = vector.shape_cast %14 : vector<128xf32> to vector<128x1xf32>
    %16 = vector.broadcast %15 : vector<128x1xf32> to vector<128x128xf32>
    %17 = arith.subf %13, %16 : vector<128x128xf32>
    %18 = arith.truncf %17 : vector<128x128xf32> to vector<128x128xbf16>
    %19 = math.exp %18 : vector<128x128xbf16>
    %20 = arith.extf %19 : vector<128x128xbf16> to vector<128x128xf32>
    %cst_15 = arith.constant dense<0.000000e+00> : vector<128xf32>
    %21 = vector.multi_reduction <add>, %20, %cst_15 [1] : vector<128x128xf32> to vector<128xf32>
    %22 = vector.shape_cast %21 : vector<128xf32> to vector<128x1xf32>
    %23 = tpu.reciprocal %22 {approx = true} : vector<128x1xf32> -> vector<128x1xf32>
    %cst_16 = arith.constant dense<0.000000e+00> : vector<128x8xf32>
    %24 = tpu.matmul %19, %10, %cst_16 {dimension_numbers = #tpu.dot_dimension_numbers<[1], [0], [0], [1], [0, 0, 1, 1], [], []>} : vector<128x128xbf16>, vector<128x8xbf16>, vector<128x8xf32> -> vector<128x8xf32>
    %25 = vector.broadcast %23 : vector<128x1xf32> to vector<128x8xf32>
    %26 = arith.mulf %24, %25 : vector<128x8xf32>
    %27 = vector.extract_strided_slice %1 {offsets = [0, 8], sizes = [128, 8], strides = [1, 1]} : vector<128x32xbf16> to vector<128x8xbf16>
    %28 = vector.extract_strided_slice %3 {offsets = [0, 8], sizes = [128, 8], strides = [1, 1]} : vector<128x32xbf16> to vector<128x8xbf16>
    %29 = vector.extract_strided_slice %5 {offsets = [0, 8], sizes = [128, 8], strides = [1, 1]} : vector<128x32xbf16> to vector<128x8xbf16>
    %cst_17 = arith.constant dense<0.000000e+00> : vector<128x128xf32>
    %30 = tpu.matmul %27, %28, %cst_17 {dimension_numbers = #tpu.dot_dimension_numbers<[1], [1], [0], [0], [0, 0, 1, 0], [], []>} : vector<128x8xbf16>, vector<128x8xbf16>, vector<128x128xf32> -> vector<128x128xf32>
    %31 = vector.broadcast %7 : vector<1x128xf32> to vector<128x128xf32>
    %32 = arith.addf %30, %31 : vector<128x128xf32>
    %cst_18 = arith.constant dense<0xFF800000> : vector<128xf32>
    %33 = vector.multi_reduction <maximumf>, %32, %cst_18 [1] : vector<128x128xf32> to vector<128xf32>
    %34 = vector.shape_cast %33 : vector<128xf32> to vector<128x1xf32>
    %35 = vector.broadcast %34 : vector<128x1xf32> to vector<128x128xf32>
    %36 = arith.subf %32, %35 : vector<128x128xf32>
    %37 = arith.truncf %36 : vector<128x128xf32> to vector<128x128xbf16>
    %38 = math.exp %37 : vector<128x128xbf16>
    %39 = arith.extf %38 : vector<128x128xbf16> to vector<128x128xf32>
    %cst_19 = arith.constant dense<0.000000e+00> : vector<128xf32>
    %40 = vector.multi_reduction <add>, %39, %cst_19 [1] : vector<128x128xf32> to vector<128xf32>
    %41 = vector.shape_cast %40 : vector<128xf32> to vector<128x1xf32>
    %42 = tpu.reciprocal %41 {approx = true} : vector<128x1xf32> -> vector<128x1xf32>
    %cst_20 = arith.constant dense<0.000000e+00> : vector<128x8xf32>
    %43 = tpu.matmul %38, %29, %cst_20 {dimension_numbers = #tpu.dot_dimension_numbers<[1], [0], [0], [1], [0, 0, 1, 1], [], []>} : vector<128x128xbf16>, vector<128x8xbf16>, vector<128x8xf32> -> vector<128x8xf32>
    %44 = vector.broadcast %42 : vector<128x1xf32> to vector<128x8xf32>
    %45 = arith.mulf %43, %44 : vector<128x8xf32>
    %46 = vector.extract_strided_slice %1 {offsets = [0, 16], sizes = [128, 8], strides = [1, 1]} : vector<128x32xbf16> to vector<128x8xbf16>
    %47 = vector.extract_strided_slice %3 {offsets = [0, 16], sizes = [128, 8], strides = [1, 1]} : vector<128x32xbf16> to vector<128x8xbf16>
    %48 = vector.extract_strided_slice %5 {offsets = [0, 16], sizes = [128, 8], strides = [1, 1]} : vector<128x32xbf16> to vector<128x8xbf16>
    %cst_21 = arith.constant dense<0.000000e+00> : vector<128x128xf32>
    %49 = tpu.matmul %46, %47, %cst_21 {dimension_numbers = #tpu.dot_dimension_numbers<[1], [1], [0], [0], [0, 0, 1, 0], [], []>} : vector<128x8xbf16>, vector<128x8xbf16>, vector<128x128xf32> -> vector<128x128xf32>
    %50 = vector.broadcast %7 : vector<1x128xf32> to vector<128x128xf32>
    %51 = arith.addf %49, %50 : vector<128x128xf32>
    %cst_22 = arith.constant dense<0xFF800000> : vector<128xf32>
    %52 = vector.multi_reduction <maximumf>, %51, %cst_22 [1] : vector<128x128xf32> to vector<128xf32>
    %53 = vector.shape_cast %52 : vector<128xf32> to vector<128x1xf32>
    %54 = vector.broadcast %53 : vector<128x1xf32> to vector<128x128xf32>
    %55 = arith.subf %51, %54 : vector<128x128xf32>
    %56 = arith.truncf %55 : vector<128x128xf32> to vector<128x128xbf16>
    %57 = math.exp %56 : vector<128x128xbf16>
    %58 = arith.extf %57 : vector<128x128xbf16> to vector<128x128xf32>
    %cst_23 = arith.constant dense<0.000000e+00> : vector<128xf32>
    %59 = vector.multi_reduction <add>, %58, %cst_23 [1] : vector<128x128xf32> to vector<128xf32>
    %60 = vector.shape_cast %59 : vector<128xf32> to vector<128x1xf32>
    %61 = tpu.reciprocal %60 {approx = true} : vector<128x1xf32> -> vector<128x1xf32>
    %cst_24 = arith.constant dense<0.000000e+00> : vector<128x8xf32>
    %62 = tpu.matmul %57, %48, %cst_24 {dimension_numbers = #tpu.dot_dimension_numbers<[1], [0], [0], [1], [0, 0, 1, 1], [], []>} : vector<128x128xbf16>, vector<128x8xbf16>, vector<128x8xf32> -> vector<128x8xf32>
    %63 = vector.broadcast %61 : vector<128x1xf32> to vector<128x8xf32>
    %64 = arith.mulf %62, %63 : vector<128x8xf32>
    %65 = vector.extract_strided_slice %1 {offsets = [0, 24], sizes = [128, 8], strides = [1, 1]} : vector<128x32xbf16> to vector<128x8xbf16>
    %66 = vector.extract_strided_slice %3 {offsets = [0, 24], sizes = [128, 8], strides = [1, 1]} : vector<128x32xbf16> to vector<128x8xbf16>
    %67 = vector.extract_strided_slice %5 {offsets = [0, 24], sizes = [128, 8], strides = [1, 1]} : vector<128x32xbf16> to vector<128x8xbf16>
    %cst_25 = arith.constant dense<0.000000e+00> : vector<128x128xf32>
    %68 = tpu.matmul %65, %66, %cst_25 {dimension_numbers = #tpu.dot_dimension_numbers<[1], [1], [0], [0], [0, 0, 1, 0], [], []>} : vector<128x8xbf16>, vector<128x8xbf16>, vector<128x128xf32> -> vector<128x128xf32>
    %69 = vector.broadcast %7 : vector<1x128xf32> to vector<128x128xf32>
    %70 = arith.addf %68, %69 : vector<128x128xf32>
    %cst_26 = arith.constant dense<0xFF800000> : vector<128xf32>
    %71 = vector.multi_reduction <maximumf>, %70, %cst_26 [1] : vector<128x128xf32> to vector<128xf32>
    %72 = vector.shape_cast %71 : vector<128xf32> to vector<128x1xf32>
    %73 = vector.broadcast %72 : vector<128x1xf32> to vector<128x128xf32>
    %74 = arith.subf %70, %73 : vector<128x128xf32>
    %75 = arith.truncf %74 : vector<128x128xf32> to vector<128x128xbf16>
    %76 = math.exp %75 : vector<128x128xbf16>
    %77 = arith.extf %76 : vector<128x128xbf16> to vector<128x128xf32>
    %cst_27 = arith.constant dense<0.000000e+00> : vector<128xf32>
    %78 = vector.multi_reduction <add>, %77, %cst_27 [1] : vector<128x128xf32> to vector<128xf32>
    %79 = vector.shape_cast %78 : vector<128xf32> to vector<128x1xf32>
    %80 = tpu.reciprocal %79 {approx = true} : vector<128x1xf32> -> vector<128x1xf32>
    %cst_28 = arith.constant dense<0.000000e+00> : vector<128x8xf32>
    %81 = tpu.matmul %76, %67, %cst_28 {dimension_numbers = #tpu.dot_dimension_numbers<[1], [0], [0], [1], [0, 0, 1, 1], [], []>} : vector<128x128xbf16>, vector<128x8xbf16>, vector<128x8xf32> -> vector<128x8xf32>
    %82 = vector.broadcast %80 : vector<128x1xf32> to vector<128x8xf32>
    %83 = arith.mulf %81, %82 : vector<128x8xf32>
    %84 = tpu.concatenate %26, %45, %64, %83 in 1 : vector<128x8xf32>, vector<128x8xf32>, vector<128x8xf32>, vector<128x8xf32> -> vector<128x32xf32>
    %c0_29 = arith.constant 0 : index
    %c0_30 = arith.constant 0 : index
    %c0_31 = arith.constant 0 : index
    %85 = vector.load %arg7[%c0_29, %c0_30, %c0_31] : memref<1x128x32xf32, #tpu.memory_space<vmem>>, vector<1x128x32xf32>
    %86 = vector.shape_cast %85 : vector<1x128x32xf32> to vector<128x32xf32>
    %87 = vector.shape_cast %84 : vector<128x32xf32> to vector<1x128x32xf32>
    tpu.vector_store %arg7[%c0_29, %c0_30, %c0_31], %87 {strides = array<i32>} : memref<1x128x32xf32, #tpu.memory_space<vmem>>, vector<1x128x32xf32>,
    return
  }
  func.func @transform_0(%arg0: i32, %arg1: i32, %arg2: i32) -> (i32, i32, i32) {
    %c0_i32 = arith.constant 0 : i32
    %c0_i32_0 = arith.constant 0 : i32
    %c0_i32_1 = arith.constant 0 : i32
    return %arg0, %c0_i32, %c0_i32_0 : i32, i32, i32
  }
  func.func @transform_1(%arg0: i32, %arg1: i32, %arg2: i32) -> (i32, i32, i32, i32) {
    %c0_i32 = arith.constant 0 : i32
    %c0_i32_0 = arith.constant 0 : i32
    return %arg0, %arg1, %arg2, %c0_i32 : i32, i32, i32, i32
  }
  func.func @transform_2(%arg0: i32, %arg1: i32, %arg2: i32) -> (i32, i32, i32, i32) {
    %c0_i32 = arith.constant 0 : i32
    %c0_i32_0 = arith.constant 0 : i32
    %c0_i32_1 = arith.constant 0 : i32
    return %arg0, %arg1, %c0_i32, %c0_i32_0 : i32, i32, i32, i32
  }
  func.func @transform_3(%arg0: i32, %arg1: i32, %arg2: i32) -> (i32, i32, i32, i32) {
    %c0_i32 = arith.constant 0 : i32
    %c0_i32_0 = arith.constant 0 : i32
    %c0_i32_1 = arith.constant 0 : i32
    return %arg0, %arg1, %c0_i32, %c0_i32_0 : i32, i32, i32, i32
  }
  func.func @transform_4(%arg0: i32, %arg1: i32, %arg2: i32) -> (i32, i32, i32) {
    %c0_i32 = arith.constant 0 : i32
    return %arg0, %arg2, %arg1 : i32, i32, i32
  }
}

</mosaic_0001>

<bundles_post_ra>
// kernel: bert_self_attention.2
= control target key start
LH: loop header
LB: loop body
LE: loop exit
PB: predicated region body
PF: predicated region fallthrough
CT: control target
= control target key end

     0   :  { %s1105_s18 = smov 0   ;;  %s1107_s19 = smov 0   ;;  %s1319_s0 = inlined_call_operand.vmem [shape: bf16[2,128,32], index: 0, kind: input, shape index: {}]   ;;  %s1320_s1 = inlined_call_operand.vmem [shape: bf16[32,96], index: 1, kind: input, shape index: {}]   ;;  %s1321_s2 = inlined_call_operand.vmem [shape: f32[1,96], index: 2, kind: input, shape index: {}]   ;;  %s1322_s3 = inlined_call_operand.vmem [shape: bf16[2,1,128,32], index: 3, kind: output, shape index: {0}]   ;;  %s1323_s4 = inlined_call_operand.vmem [shape: bf16[2,1,128,32], index: 4, kind: output, shape index: {1}]   ;;  %s1324_s5 = inlined_call_operand.vmem [shape: bf16[2,1,128,32], index: 5, kind: output, shape index: {2}]  }
   0x1   :  { %s1109_s20 = smov 0  }
   0x2 LB: > { %s28_s21 = sadd.s32 1, %s1067_s19  ;;  %p913_p0 = scmp.ge.s32.totalorder %s1071_s20, 1  ;;  %s1071_s20 = sphi %s1109_s20, %s16_s20   ;;  %s1067_s19 = sphi %s1107_s19, %s1326_s19   ;;  %s1063_s18 = sphi %s1105_s18, %s1325_s18  }
   0x3   : > { %p30_p1 = scmp.ge.s32.totalorder %s28_s21, 2  ;;  %p217_p2 = scmp.lt.s32.totalorder %s1071_s20, 3 }
   0x5   : > { %s1328_s21 = smov (%p30_p1, %s28_s21), 0  ;;  %p218_p3 = pnand %p913_p0, %p217_p2 }
   0x6   : > { %v1039_v0 = vld [vmem:[%s1320_s1] sm:$0xff] (!%p218_p3)   ;;  %p272_p4 = scmp.lt.s32.totalorder (!%p218_p3), %s1063_s18, 1  ;;  %v1040_v1 = vld [vmem:[%s1320_s1 + $0x8] sm:$0xff] (!%p218_p3)   ;;  %vm391_vm0 = vcmask (!%p218_p3), 261120   ;;  %vm577_vm1 = vcmask (!%p218_p3), 257024   ;;  %s1073_s10 = smov (!%p218_p3), 96  }
   0x7   : > { %221 = sbr.rel (%p218_p3) target bundleno = 412 (0x19c), region = 32  ;;  %989 = vmatprep.subr.bf16.mxu0 (!%p218_p3), %v1039_v0  ;;  %1009 = vmatprep.subr.bf16.mxu1 (!%p218_p3), %v1039_v0  ;;  %v1146_v10 = vld [vmem:[%s1321_s2] ss:$0 sm:$0xff] (!%p218_p3)  ;;  %s1074_s11 = smov (!%p218_p3), 64  }
   0x8   : > { %990 = vmatpush3.bf16.msra.mxu0 (!%p218_p3), %v1039_v0  ;;  %1011 = vmatpush3.bf16.msra.mxu1 (!%p218_p3), %v1039_v0 }
   0x9   : > { %991 = vmatprep.subr.bf16.mxu0 (!%p218_p3), %v1040_v1  ;;  %1010 = vmatprep.subr.bf16.mxu1 (!%p218_p3), %v1040_v1 }
   0xc   : > { %992 = vmatpush3.bf16.msra.mxu0 (!%p218_p3), %v1040_v1  ;;  %1012 = vmatpush3.bf16.msra.mxu1 (!%p218_p3), %v1040_v1 }
   0xe   : > { %s1330_s18 = smov (!%p272_p4, %s1063_s18), 1 }
   0xf   : > { %s1129_s26 = sshll.u32 %s1330_s18, 6 }
  0x10   : > { %s279_s29 = scalar_lea.vmem %s1319_s0, %s1129_s26  ;;  %s1153_s9 = scalar_lea.vmem %s1322_s3, %s1129_s26 }
  0x11   : > { %v1041_v2 = vld [vmem:[%s279_s29] sm:$0xff]   ;;  %v1043_v4 = vld [vmem:[%s279_s29 + $0x8] sm:$0xff]   ;;  %v1045_v6 = vld [vmem:[%s279_s29 + $0x10] sm:$0xff]   ;;  %s1238_s14 = scalar_lea.vmem %s1323_s4, %s1129_s26  ;;  %s1248_s17 = scalar_lea.vmem %s1324_s5, %s1129_s26 }
  0x12   : > { %v1042_v3 = vld [vmem:[%s279_s29 + $0x20] sm:$0xff]   ;;  %993 = vmatprep.mubr.msk.bf16.mxu0 %vm391_vm0, %v1041_v2  ;;  %v1044_v5 = vld [vmem:[%s279_s29 + $0x28] sm:$0xff]   ;;  %v1047_v7 = vld [vmem:[%s279_s29 + $0x30] sm:$0xff]  }
  0x13   : > { %1001 = vmatprep.mubr.msk.bf16.mxu1 %vm391_vm0, %v1042_v3  ;;  %994 = vmatmul.mubr.msk.bf16.vlgmr.msra.gmra.mrb[0].mxu0 %vm391_vm0, %v1043_v4  ;;  %v1046_v8 = vld [vmem:[%s279_s29 + $0x18] sm:$0xff]  }
  0x14   : > { %1002 = vmatmul.mubr.msk.bf16.vlgmr.msra.gmra.mrb[0].mxu1 %vm391_vm0, %v1044_v5  ;;  %997 = vmatprep.mubr.msk.bf16.mxu0 %vm391_vm0, %v1045_v6  ;;  %v1048_v9 = vld [vmem:[%s279_s29 + $0x38] sm:$0xff]  }
  0x15   : > { %1005 = vmatprep.mubr.msk.bf16.mxu1 %vm391_vm0, %v1047_v7 }
  0x1b   : > { %998 = vmatmul.mubr.msk.bf16.gmra.mrb[4].mxu0 %vm391_vm0, %v1046_v8 }
  0x1c   : > { %1006 = vmatmul.mubr.msk.bf16.gmra.mrb[4].mxu1 %vm391_vm0, %v1048_v9 }
  0xe6   : > { %v995_v11 = vpop.f32.mrb[0].mxu0 }
  0xe7   : > { %v459_v12 = vadd.f32 %v995_v11, %v1146_v10  ;;  %v1003_v13 = vpop.f32.mrb[0].mxu1  ;;  %v450_v14 = vpop.f32.mrb[1].mxu0 }
  0xe8   : > { %v491_v15 = vadd.f32 %v1003_v13, %v1146_v10  ;;  %v451_v16 = vadd.f32 %v1146_v10, %v450_v14  ;;  %v482_v17 = vpop.f32.mrb[1].mxu1  ;;  %v996_v18 = vpop.f32.mrb[2].mxu0 }
  0xe9   : > { %v965_v19 = vpack.c.bf16 %v459_v12, %v459_v12  ;;  %v483_v20 = vadd.f32 %v1146_v10, %v482_v17  ;;  %v462_v21 = vadd.f32 %v996_v18, %v1146_v10  ;;  %v1004_v22 = vpop.f32.mrb[2].mxu1  ;;  %v453_v23 = vpop.f32.mrb[3].mxu0 }
  0xea   : > { %v973_v24 = vpack.c.bf16 %v491_v15, %v491_v15  ;;  %v963_v25 = vpack.c.bf16 %v451_v16, %v451_v16  ;;  %v494_v26 = vadd.f32 %v1004_v22, %v1146_v10  ;;  %v454_v27 = vadd.f32 %v1146_v10, %v453_v23  ;;  %v485_v28 = vpop.f32.mrb[3].mxu1 }
  0xeb   : > { %580 = vst.msk [vmem:[%s1153_s9 + $0x8] sm:$0xf] %vm577_vm1, %v965_v19  ;;  %v971_v29 = vpack.c.bf16 %v483_v20, %v483_v20  ;;  %v966_v30 = vpack.c.bf16 %v462_v21, %v462_v21  ;;  %v486_v31 = vadd.f32 %v1146_v10, %v485_v28  ;;  %598 = vrot.lane.b32.xlu1 %v965_v19, %s1073_s10 }
  0xec   : > { %588 = vst.msk [vmem:[%s1153_s9 + $0x28] sm:$0xf] %vm577_vm1, %v973_v24  ;;  %578 = vst.msk [vmem:[%s1153_s9] sm:$0xf] %vm577_vm1, %v963_v25  ;;  %v974_v32 = vpack.c.bf16 %v494_v26, %v494_v26  ;;  %v964_v33 = vpack.c.bf16 %v454_v27, %v454_v27  ;;  %614 = vrot.lane.b32.xlu0 %v973_v24, %s1073_s10 }
  0xed   : > { %586 = vst.msk [vmem:[%s1153_s9 + $0x20] sm:$0xf] %vm577_vm1, %v971_v29  ;;  %581 = vst.msk [vmem:[%s1153_s9 + $0xc] sm:$0xf] %vm577_vm1, %v966_v30  ;;  %v972_v34 = vpack.c.bf16 %v486_v31, %v486_v31 }
  0xee   : > { %589 = vst.msk [vmem:[%s1153_s9 + $0x2c] sm:$0xf] %vm577_vm1, %v974_v32  ;;  %579 = vst.msk [vmem:[%s1153_s9 + $0x4] sm:$0xf] %vm577_vm1, %v964_v33  ;;  %v999_v35 = vpop.f32.mrb[4].mxu0 }
  0xef   : > { %587 = vst.msk [vmem:[%s1153_s9 + $0x24] sm:$0xf] %vm577_vm1, %v972_v34  ;;  %600 = vrot.lane.b32.xlu1 %v966_v30, %s1073_s10  ;;  %v475_v36 = vadd.f32 %v999_v35, %v1146_v10  ;;  %v466_v37 = vpop.f32.mrb[5].mxu0  ;;  %v1007_v38 = vpop.f32.mrb[4].mxu1 }
  0xf0   : > { %662 = vrot.lane.b32.xlu0 %v965_v19, %s1074_s11  ;;  %v467_v39 = vadd.f32 %v1146_v10, %v466_v37  ;;  %v1000_v40 = vpop.f32.mrb[6].mxu0  ;;  %v507_v41 = vadd.f32 %v1007_v38, %v1146_v10  ;;  %v498_v42 = vpop.f32.mrb[5].mxu1 }
  0xf1   : > { %v969_v43 = vpack.c.bf16 %v475_v36, %v475_v36  ;;  %v478_v44 = vadd.f32 %v1000_v40, %v1146_v10  ;;  %v469_v45 = vpop.f32.mrb[7].mxu0  ;;  %v499_v46 = vadd.f32 %v1146_v10, %v498_v42  ;;  %v1008_v47 = vpop.f32.mrb[6].mxu1 }
  0xf2   : > { %v967_v48 = vpack.c.bf16 %v467_v39, %v467_v39  ;;  %v470_v49 = vadd.f32 %v1146_v10, %v469_v45  ;;  %v977_v50 = vpack.c.bf16 %v507_v41, %v507_v41  ;;  %v510_v51 = vadd.f32 %v1008_v47, %v1146_v10  ;;  %v501_v52 = vpop.f32.mrb[7].mxu1 }
  0xf3   : > { %616 = vrot.lane.b32.xlu1 %v974_v32, %s1073_s10  ;;  %584 = vst.msk [vmem:[%s1153_s9 + $0x18] sm:$0xf] %vm577_vm1, %v969_v43  ;;  %v970_v53 = vpack.c.bf16 %v478_v44, %v478_v44  ;;  %v975_v54 = vpack.c.bf16 %v499_v46, %v499_v46  ;;  %v502_v55 = vadd.f32 %v1146_v10, %v501_v52 }
  0xf4   : > { %678 = vrot.lane.b32.xlu0 %v973_v24, %s1074_s11  ;;  %582 = vst.msk [vmem:[%s1153_s9 + $0x10] sm:$0xf] %vm577_vm1, %v967_v48  ;;  %v968_v56 = vpack.c.bf16 %v470_v49, %v470_v49  ;;  %592 = vst.msk [vmem:[%s1153_s9 + $0x38] sm:$0xf] %vm577_vm1, %v977_v50  ;;  %v978_v57 = vpack.c.bf16 %v510_v51, %v510_v51 }
  0xf5   : > { %585 = vst.msk [vmem:[%s1153_s9 + $0x1c] sm:$0xf] %vm577_vm1, %v970_v53  ;;  %590 = vst.msk [vmem:[%s1153_s9 + $0x30] sm:$0xf] %vm577_vm1, %v975_v54  ;;  %v976_v58 = vpack.c.bf16 %v502_v55, %v502_v55 }
  0xf6   : > { %583 = vst.msk [vmem:[%s1153_s9 + $0x14] sm:$0xf] %vm577_vm1, %v968_v56  ;;  %593 = vst.msk [vmem:[%s1153_s9 + $0x3c] sm:$0xf] %vm577_vm1, %v978_v57 }
  0xf7   : > { %664 = vrot.lane.b32.xlu1 %v966_v30, %s1074_s11  ;;  %591 = vst.msk [vmem:[%s1153_s9 + $0x34] sm:$0xf] %vm577_vm1, %v976_v58 }
  0xf8   : > { %594 = vrot.lane.b32.xlu0 %v963_v25, %s1073_s10 }
  0xfb   : > { %680 = vrot.lane.b32.xlu1 %v974_v32, %s1074_s11 }
  0xfc   : > { %610 = vrot.lane.b32.xlu0 %v971_v29, %s1073_s10 }
  0xff   : > { %612 = vrot.lane.b32.xlu1 %v972_v34, %s1073_s10 }
 0x100   : > { %658 = vrot.lane.b32.xlu0 %v963_v25, %s1074_s11 }
 0x103   : > { %660 = vrot.lane.b32.xlu1 %v964_v33, %s1074_s11 }
 0x104   : > { %674 = vrot.lane.b32.xlu0 %v971_v29, %s1074_s11 }
 0x107   : > { %676 = vrot.lane.b32.xlu1 %v972_v34, %s1074_s11 }
 0x108   : > { %596 = vrot.lane.b32.xlu0 %v964_v33, %s1073_s10 }
 0x10b   : > { %608 = vrot.lane.b32.xlu1 %v970_v53, %s1073_s10 }
 0x10c   : > { %606 = vrot.lane.b32.xlu0 %v969_v43, %s1073_s10 }
 0x10f   : > { %624 = vrot.lane.b32.xlu1 %v978_v57, %s1073_s10 }
 0x110   : > { %622 = vrot.lane.b32.xlu0 %v977_v50, %s1073_s10 }
 0x113   : > { %672 = vrot.lane.b32.xlu1 %v970_v53, %s1074_s11 }
 0x114   : > { %670 = vrot.lane.b32.xlu0 %v969_v43, %s1074_s11 }
 0x117   : > { %604 = vrot.lane.b32.xlu1 %v968_v56, %s1073_s10 }
 0x118   : > { %602 = vrot.lane.b32.xlu0 %v967_v48, %s1073_s10 }
 0x11b   : > { %620 = vrot.lane.b32.xlu1 %v976_v58, %s1073_s10 }
 0x11c   : > { %618 = vrot.lane.b32.xlu0 %v975_v54, %s1073_s10 }
 0x11f   : > { %668 = vrot.lane.b32.xlu1 %v968_v56, %s1074_s11 }
 0x120   : > { %666 = vrot.lane.b32.xlu0 %v967_v48, %s1074_s11 }
 0x123   : > { %684 = vrot.lane.b32.xlu1 %v976_v58, %s1074_s11 }
 0x124   : > { %682 = vrot.lane.b32.xlu0 %v975_v54, %s1074_s11 }
 0x127   : > { %688 = vrot.lane.b32.xlu1 %v978_v57, %s1074_s11 }
 0x128   : > { %686 = vrot.lane.b32.xlu0 %v977_v50, %s1074_s11 }
 0x15d   : > { %v599_v59 = vpop.permute.xlu1 %598 }
 0x15e   : > { %v615_v60 = vpop.permute.xlu0 %614  ;;  %644 = vst.msk [vmem:[%s1238_s14 + $0x8] sm:$0xf] %vm577_vm1, %v599_v59 }
 0x15f   : > { %652 = vst.msk [vmem:[%s1238_s14 + $0x28] sm:$0xf] %vm577_vm1, %v615_v60 }
 0x161   : > { %v601_v61 = vpop.permute.xlu1 %600 }
 0x162   : > { %v663_v62 = vpop.permute.xlu0 %662  ;;  %645 = vst.msk [vmem:[%s1238_s14 + $0xc] sm:$0xf] %vm577_vm1, %v601_v61 }
 0x163   : > { %708 = vst.msk [vmem:[%s1248_s17 + $0x8] sm:$0xf] %vm577_vm1, %v663_v62 }
 0x165   : > { %v617_v63 = vpop.permute.xlu1 %616 }
 0x166   : > { %v679_v0 = vpop.permute.xlu0 %678  ;;  %653 = vst.msk [vmem:[%s1238_s14 + $0x2c] sm:$0xf] %vm577_vm1, %v617_v63 }
 0x167   : > { %716 = vst.msk [vmem:[%s1248_s17 + $0x28] sm:$0xf] %vm577_vm1, %v679_v0 }
 0x169   : > { %v665_v1 = vpop.permute.xlu1 %664 }
 0x16a   : > { %709 = vst.msk [vmem:[%s1248_s17 + $0xc] sm:$0xf] %vm577_vm1, %v665_v1  ;;  %v595_v2 = vpop.permute.xlu0 %594 }
 0x16b   : > { %642 = vst.msk [vmem:[%s1238_s14] sm:$0xf] %vm577_vm1, %v595_v2 }
 0x16d   : > { %v681_v3 = vpop.permute.xlu1 %680 }
 0x16e   : > { %717 = vst.msk [vmem:[%s1248_s17 + $0x2c] sm:$0xf] %vm577_vm1, %v681_v3  ;;  %v611_v4 = vpop.permute.xlu0 %610 }
 0x16f   : > { %650 = vst.msk [vmem:[%s1238_s14 + $0x20] sm:$0xf] %vm577_vm1, %v611_v4 }
 0x171   : > { %v613_v5 = vpop.permute.xlu1 %612 }
 0x172   : > { %651 = vst.msk [vmem:[%s1238_s14 + $0x24] sm:$0xf] %vm577_vm1, %v613_v5  ;;  %v659_v6 = vpop.permute.xlu0 %658 }
 0x173   : > { %706 = vst.msk [vmem:[%s1248_s17] sm:$0xf] %vm577_vm1, %v659_v6 }
 0x175   : > { %v661_v7 = vpop.permute.xlu1 %660 }
 0x176   : > { %707 = vst.msk [vmem:[%s1248_s17 + $0x4] sm:$0xf] %vm577_vm1, %v661_v7  ;;  %v675_v8 = vpop.permute.xlu0 %674 }
 0x177   : > { %714 = vst.msk [vmem:[%s1248_s17 + $0x20] sm:$0xf] %vm577_vm1, %v675_v8 }
 0x179   : > { %v677_v9 = vpop.permute.xlu1 %676 }
 0x17a   : > { %715 = vst.msk [vmem:[%s1248_s17 + $0x24] sm:$0xf] %vm577_vm1, %v677_v9  ;;  %v597_v10 = vpop.permute.xlu0 %596 }
 0x17b   : > { %643 = vst.msk [vmem:[%s1238_s14 + $0x4] sm:$0xf] %vm577_vm1, %v597_v10 }
 0x17d   : > { %v609_v11 = vpop.permute.xlu1 %608 }
 0x17e   : > { %649 = vst.msk [vmem:[%s1238_s14 + $0x1c] sm:$0xf] %vm577_vm1, %v609_v11  ;;  %v607_v12 = vpop.permute.xlu0 %606 }
 0x17f   : > { %648 = vst.msk [vmem:[%s1238_s14 + $0x18] sm:$0xf] %vm577_vm1, %v607_v12 }
 0x181   : > { %v625_v13 = vpop.permute.xlu1 %624 }
 0x182   : > { %657 = vst.msk [vmem:[%s1238_s14 + $0x3c] sm:$0xf] %vm577_vm1, %v625_v13  ;;  %v623_v14 = vpop.permute.xlu0 %622 }
 0x183   : > { %656 = vst.msk [vmem:[%s1238_s14 + $0x38] sm:$0xf] %vm577_vm1, %v623_v14 }
 0x185   : > { %v673_v15 = vpop.permute.xlu1 %672 }
 0x186   : > { %713 = vst.msk [vmem:[%s1248_s17 + $0x1c] sm:$0xf] %vm577_vm1, %v673_v15  ;;  %v671_v16 = vpop.permute.xlu0 %670 }
 0x187   : > { %712 = vst.msk [vmem:[%s1248_s17 + $0x18] sm:$0xf] %vm577_vm1, %v671_v16 }
 0x189   : > { %v605_v17 = vpop.permute.xlu1 %604 }
 0x18a   : > { %647 = vst.msk [vmem:[%s1238_s14 + $0x14] sm:$0xf] %vm577_vm1, %v605_v17  ;;  %v603_v18 = vpop.permute.xlu0 %602 }
 0x18b   : > { %646 = vst.msk [vmem:[%s1238_s14 + $0x10] sm:$0xf] %vm577_vm1, %v603_v18 }
 0x18d   : > { %v621_v19 = vpop.permute.xlu1 %620 }
 0x18e   : > { %655 = vst.msk [vmem:[%s1238_s14 + $0x34] sm:$0xf] %vm577_vm1, %v621_v19  ;;  %v619_v20 = vpop.permute.xlu0 %618 }
 0x18f   : > { %654 = vst.msk [vmem:[%s1238_s14 + $0x30] sm:$0xf] %vm577_vm1, %v619_v20 }
 0x191   : > { %v669_v21 = vpop.permute.xlu1 %668 }
 0x192   : > { %711 = vst.msk [vmem:[%s1248_s17 + $0x14] sm:$0xf] %vm577_vm1, %v669_v21  ;;  %v667_v22 = vpop.permute.xlu0 %666 }
 0x193   : > { %710 = vst.msk [vmem:[%s1248_s17 + $0x10] sm:$0xf] %vm577_vm1, %v667_v22 }
 0x195   : > { %v685_v23 = vpop.permute.xlu1 %684 }
 0x196   : > { %719 = vst.msk [vmem:[%s1248_s17 + $0x34] sm:$0xf] %vm577_vm1, %v685_v23  ;;  %v683_v24 = vpop.permute.xlu0 %682 }
 0x197   : > { %718 = vst.msk [vmem:[%s1248_s17 + $0x30] sm:$0xf] %vm577_vm1, %v683_v24 }
 0x199   : > { %v689_v25 = vpop.permute.xlu1 %688 }
 0x19a   : > { %721 = vst.msk [vmem:[%s1248_s17 + $0x3c] sm:$0xf] %vm577_vm1, %v689_v25  ;;  %v687_v26 = vpop.permute.xlu0 %686 }
 0x19b   : > { %720 = vst.msk [vmem:[%s1248_s17 + $0x38] sm:$0xf] %vm577_vm1, %v687_v26 }
 0x19c PF: > { %s16_s20 = sadd.s32 1, %s1071_s20   ;;  %s1325_s18 = smov %s1067_s19 }
 0x19d   : > { %p13_p5 = scmp.ge.s32.totalorder %s16_s20, 4   ;;  %s1326_s19 = smov %s1328_s21 }
 0x19f   :  { %15 = sbr.rel (!%p13_p5) target bundleno = 2 (0x2), region = 86 }

// kernel: bert_self_attention.3
= control target key start
LH: loop header
LB: loop body
LE: loop exit
PB: predicated region body
PF: predicated region fallthrough
CT: control target
= control target key end

     0   :  { %s3542_s15 = smov 0   ;;  %s3544_s16 = smov 0   ;;  %s4895_s0 = inlined_call_operand.vmem [shape: f32[2,1,128], index: 0, kind: input, shape index: {}]   ;;  %s4896_s1 = inlined_call_operand.vmem [shape: bf16[2,1,128,32], index: 1, kind: input, shape index: {}]   ;;  %s4897_s2 = inlined_call_operand.vmem [shape: bf16[2,1,128,32], index: 2, kind: input, shape index: {}]   ;;  %s4898_s3 = inlined_call_operand.vmem [shape: bf16[2,1,128,32], index: 3, kind: input, shape index: {}]   ;;  %s4899_s4 = inlined_call_operand.vmem [shape: f32[2,128,32], index: 4, kind: output, shape index: {}]  }
   0x1   :  { %s3546_s17 = smov 0  }
   0x2 LB: > { %s33_s18 = sadd.s32 1, %s3505_s16  ;;  %p2729_p0 = scmp.ge.s32.totalorder %s3509_s17, 1  ;;  %s3509_s17 = sphi %s3546_s17, %s14_s17   ;;  %s3505_s16 = sphi %s3544_s16, %s4965_s16   ;;  %s3501_s15 = sphi %s3542_s15, %s4964_s15  }
   0x3   : > { %p35_p1 = scmp.ge.s32.totalorder %s33_s18, 2  ;;  %p238_p2 = scmp.lt.s32.totalorder %s3509_s17, 3 }
   0x5   : > { %s4967_s18 = smov (%p35_p1, %s33_s18), 0  ;;  %p239_p3 = pnand %p2729_p0, %p238_p2 }
   0x7   : > { %242 = sbr.rel (%p239_p3) target bundleno = 2315 (0x90b), region = 36 }
   0xe   : > { %p300_p4 = scmp.lt.s32.totalorder %s3501_s15, 1  ;;  %vm484_vm0 = vcmask 64512   ;;  %s3511_s23 = smov 120   ;;  %vm2517_vm1 = vcmask 130048   ;;  %vm2534_vm2 = vcmask 195584   ;;  %vm2551_vm3 = vcmask 261120  }
   0xf   : > { %s3512_s7 = smov 112   ;;  %s3513_s8 = smov 104  }
  0x10   : > { %s4969_s15 = smov (!%p300_p4, %s3501_s15), 1  ;;  %s3514_s9 = smov 8  }
  0x11   : > { %s3563_s19 = sshll.u32 %s4969_s15, 6  ;;  %s3733_s6 = scalar_lea.vmem %s4895_s0, %s4969_s15 }
  0x12   : > { %s3569_s22 = scalar_lea.vmem %s4897_s2, %s3563_s19  ;;  %s3594_s26 = scalar_lea.vmem %s4896_s1, %s3563_s19  ;;  %v3736_v33 = vld [vmem:[%s3733_s6] ss:$0 sm:$0xff] }
  0x13   : > { %v3572_v0 = vld [vmem:[%s3569_s22] sm:$0xff]   ;;  %v3575_v1 = vld [vmem:[%s3569_s22 + $0x8] sm:$0xff]   ;;  %v3588_v3 = vld [vmem:[%s3569_s22 + $0x10] sm:$0xff]   ;;  %s3683_s29 = scalar_lea.vmem %s4898_s3, %s3563_s19  ;;  %s3515_s10 = smov 16  }
  0x14   : > { %3185 = vmatprep.subr.msk.bf16.mxu0 %vm484_vm0, %v3572_v0  ;;  %v510_v2 = vsel %vm484_vm0, %v3572_v0, 0  ;;  %951 = vrot.lane.b32.xlu0 %v3572_v0, %s3511_s23  ;;  %v513_v4 = vsel %vm484_vm0, %v3575_v1, 0  ;;  %v3601_v5 = vld [vmem:[%s3594_s26] sm:$0xff]   ;;  %v516_v6 = vsel %vm484_vm0, %v3588_v3, 0  ;;  %v3610_v7 = vld [vmem:[%s3569_s22 + $0x18] sm:$0xff]   ;;  %v3624_v11 = vld [vmem:[%s3569_s22 + $0x28] sm:$0xff]  }
  0x15   : > { %2930 = vmatpush3.bf16.xpose.msra.mxu0 %v510_v2  ;;  %953 = vrot.lane.b32.xlu1 %v3575_v1, %s3511_s23  ;;  %v519_v8 = vsel %vm484_vm0, %v3610_v7, 0  ;;  %v3617_v9 = vld [vmem:[%s3569_s22 + $0x20] sm:$0xff]   ;;  %v525_v12 = vsel %vm484_vm0, %v3624_v11, 0  ;;  %v3631_v13 = vld [vmem:[%s3569_s22 + $0x30] sm:$0xff]   ;;  %v3638_v15 = vld [vmem:[%s3569_s22 + $0x38] sm:$0xff]   ;;  %s3516_s11 = smov 24  }
  0x16   : > { %3186 = vmatprep.subr.msk.bf16.mxu0 %vm484_vm0, %v3575_v1  ;;  %2945 = vmatprep.mubr.msk.bf16.mxu0 %vm484_vm0, %v3601_v5  ;;  %v522_v10 = vsel %vm484_vm0, %v3617_v9, 0  ;;  %v528_v14 = vsel %vm484_vm0, %v3631_v13, 0  ;;  %v531_v16 = vsel %vm484_vm0, %v3638_v15, 0  ;;  %v3645_v17 = vld [vmem:[%s3594_s26 + $0x8] sm:$0xff]   ;;  %v3648_v18 = vld [vmem:[%s3594_s26 + $0x10] sm:$0xff]   ;;  %v3655_v19 = vld [vmem:[%s3594_s26 + $0x18] sm:$0xff]  }
  0x17   : > { %v3658_v20 = vld [vmem:[%s3594_s26 + $0x20] sm:$0xff]   ;;  %v3665_v21 = vld [vmem:[%s3594_s26 + $0x28] sm:$0xff]   ;;  %v3668_v22 = vld [vmem:[%s3594_s26 + $0x30] sm:$0xff]   ;;  %s2800_s12 = sshll.u32 %s4969_s15, 7 }
  0x18   : > { %955 = vrot.lane.b32.xlu0 %v3588_v3, %s3511_s23  ;;  %v3675_v23 = vld [vmem:[%s3594_s26 + $0x38] sm:$0xff]   ;;  %v3686_v24 = vld [vmem:[%s3683_s29] sm:$0xff]   ;;  %v3689_v25 = vld [vmem:[%s3683_s29 + $0x8] sm:$0xff]   ;;  %s4806_s19 = scalar_lea.vmem %s4899_s4, %s2800_s12 }
  0x19   : > { %2961 = vmatprep.subr.bf16.mxu1 %v3686_v24  ;;  %v3696_v26 = vld [vmem:[%s3683_s29 + $0x10] sm:$0xff]   ;;  %v3701_v27 = vld [vmem:[%s3683_s29 + $0x18] sm:$0xff]   ;;  %v3706_v28 = vld [vmem:[%s3683_s29 + $0x20] sm:$0xff]  }
  0x1a   : > { %2962 = vmatpush3.bf16.msra.mxu1 %v3686_v24  ;;  %v3709_v29 = vld [vmem:[%s3683_s29 + $0x28] sm:$0xff]   ;;  %v3715_v30 = vld [vmem:[%s3683_s29 + $0x30] sm:$0xff]   ;;  %v3720_v31 = vld [vmem:[%s3683_s29 + $0x38] sm:$0xff]  }
  0x1b   : > { %2963 = vmatprep.subr.bf16.mxu1 %v3689_v25 }
  0x1d   : > { %2932 = vmatpush3.bf16.xpose.msra.mxu0 %v513_v4 }
  0x1e   : > { %3187 = vmatprep.subr.msk.bf16.mxu0 %vm484_vm0, %v3588_v3  ;;  %2964 = vmatpush3.bf16.msra.mxu1 %v3689_v25 }
  0x1f   : > { %2965 = vmatprep.subr.bf16.mxu1 %v3696_v26 }
  0x22   : > { %2966 = vmatpush3.bf16.msra.mxu1 %v3696_v26 }
  0x23   : > { %2967 = vmatprep.subr.bf16.mxu1 %v3701_v27 }
  0x25   : > { %2934 = vmatpush3.bf16.xpose.msra.mxu0 %v516_v6 }
  0x26   : > { %3188 = vmatprep.subr.msk.bf16.mxu0 %vm484_vm0, %v3610_v7  ;;  %2968 = vmatpush3.bf16.msra.mxu1 %v3701_v27 }
  0x27   : > { %2969 = vmatprep.subr.bf16.mxu1 %v3706_v28 }
  0x2a   : > { %2970 = vmatpush3.bf16.msra.mxu1 %v3706_v28 }
  0x2b   : > { %2971 = vmatprep.subr.bf16.mxu1 %v3709_v29 }
  0x2d   : > { %2936 = vmatpush3.bf16.xpose.msra.mxu0 %v519_v8 }
  0x2e   : > { %3189 = vmatprep.subr.msk.bf16.mxu0 %vm484_vm0, %v3617_v9  ;;  %2972 = vmatpush3.bf16.msra.mxu1 %v3709_v29 }
  0x2f   : > { %2973 = vmatprep.subr.bf16.mxu1 %v3715_v30 }
  0x32   : > { %2974 = vmatpush3.bf16.msra.mxu1 %v3715_v30 }
  0x33   : > { %2975 = vmatprep.subr.bf16.mxu1 %v3720_v31 }
  0x35   : > { %2938 = vmatpush3.bf16.xpose.msra.mxu0 %v522_v10 }
  0x36   : > { %3190 = vmatprep.subr.msk.bf16.mxu0 %vm484_vm0, %v3624_v11  ;;  %2976 = vmatpush3.bf16.msra.mxu1 %v3720_v31 }
  0x3d   : > { %2940 = vmatpush3.bf16.xpose.msra.mxu0 %v525_v12 }
  0x3e   : > { %3191 = vmatprep.subr.msk.bf16.mxu0 %vm484_vm0, %v3631_v13 }
  0x45   : > { %2942 = vmatpush3.bf16.xpose.msra.mxu0 %v528_v14 }
  0x46   : > { %3192 = vmatprep.subr.msk.bf16.mxu0 %vm484_vm0, %v3638_v15 }
  0x4d   : > { %2944 = vmatpush3.bf16.xpose.msra.mxu0 %v531_v16 }
  0x54   : > { %2946 = vmatmul.mubr.msk.bf16.vlgmr.msra.gmra.mrb[0].mxu0 %vm484_vm0, %v3645_v17 }
  0x55   : > { %2949 = vmatprep.mubr.msk.bf16.mxu0 %vm484_vm0, %v3648_v18 }
  0x5c   : > { %2950 = vmatmul.mubr.msk.bf16.gmra.mrb[4].mxu0 %vm484_vm0, %v3655_v19 }
  0x5d   : > { %2953 = vmatprep.mubr.msk.bf16.mxu0 %vm484_vm0, %v3658_v20 }
  0x64   : > { %2954 = vmatmul.mubr.msk.bf16.gmra.mrb[8].mxu0 %vm484_vm0, %v3665_v21 }
  0x65   : > { %2957 = vmatprep.mubr.msk.bf16.mxu0 %vm484_vm0, %v3668_v22 }
  0x6c   : > { %2958 = vmatmul.mubr.msk.bf16.gmra.mrb[12].mxu0 %vm484_vm0, %v3675_v23 }
  0x86   : > { %v3724_v32 = vpop.permute.xlu0 %951 }
  0x87   : > { %3193 = vmatprep.subr.msk.bf16.mxu1 %vm484_vm0, %v3724_v32  ;;  %v954_v6 = vpop.permute.xlu1 %953 }
  0x8a   : > { %v956_v8 = vpop.permute.xlu0 %955 }
 0x127   : > { %v2947_v34 = vpop.f32.mrb[0].mxu0 }
 0x128   : > { %v3739_v35 = vadd.f32 %v2947_v34, %v3736_v33  ;;  %v567_v36 = vpop.f32.mrb[1].mxu0 }
 0x129   : > { %v3742_v37 = vadd.f32 %v3736_v33, %v567_v36  ;;  %v2948_v38 = vpop.f32.mrb[2].mxu0 }
 0x12a   : > { %v570_v39 = vpop.f32.mrb[3].mxu0  ;;  %634 = vmax.xlane.f32.xlu1 %v3739_v35  ;;  %v3747_v40 = vadd.f32 %v2948_v38, %v3736_v33 }
 0x12b   : > { %630 = vmax.xlane.f32.xlu0 %v3742_v37  ;;  %v3750_v41 = vadd.f32 %v3736_v33, %v570_v39 }
 0x12e   : > { %636 = vmax.xlane.f32.xlu1 %v3747_v40 }
 0x12f   : > { %v2951_v42 = vpop.f32.mrb[4].mxu0  ;;  %632 = vmax.xlane.f32.xlu0 %v3750_v41 }
 0x130   : > { %v3755_v43 = vadd.f32 %v2951_v42, %v3736_v33  ;;  %v583_v44 = vpop.f32.mrb[5].mxu0 }
 0x131   : > { %v2952_v45 = vpop.f32.mrb[6].mxu0  ;;  %v3759_v46 = vadd.f32 %v3736_v33, %v583_v44 }
 0x132   : > { %642 = vmax.xlane.f32.xlu1 %v3755_v43  ;;  %v586_v47 = vpop.f32.mrb[7].mxu0  ;;  %v3763_v48 = vadd.f32 %v2952_v45, %v3736_v33 }
 0x133   : > { %v3767_v52 = vadd.f32 %v3736_v33, %v586_v47 }
 0x136   : > { %638 = vmax.xlane.f32.xlu1 %v3759_v46 }
 0x137   : > { %v2955_v49 = vpop.f32.mrb[8].mxu0 }
 0x138   : > { %v599_v50 = vpop.f32.mrb[9].mxu0  ;;  %v3793_v63 = vadd.f32 %v2955_v49, %v3736_v33 }
 0x139   : > { %v2956_v51 = vpop.f32.mrb[10].mxu0  ;;  %v3799_v2 = vadd.f32 %v3736_v33, %v599_v50 }
 0x13a   : > { %644 = vmax.xlane.f32.xlu1 %v3763_v48  ;;  %v602_v53 = vpop.f32.mrb[11].mxu0  ;;  %v3805_v4 = vadd.f32 %v2956_v51, %v3736_v33 }
 0x13b   : > { %v3771_v54 = vadd.f32 %v3736_v33, %v602_v53 }
 0x13e   : > { %640 = vmax.xlane.f32.xlu1 %v3767_v52 }
 0x13f   : > { %v2959_v55 = vpop.f32.mrb[12].mxu0 }
 0x140   : > { %v615_v56 = vpop.f32.mrb[13].mxu0  ;;  %v3775_v58 = vadd.f32 %v2959_v55, %v3736_v33 }
 0x141   : > { %v2960_v57 = vpop.f32.mrb[14].mxu0  ;;  %v3781_v60 = vadd.f32 %v3736_v33, %v615_v56 }
 0x142   : > { %648 = vmax.xlane.f32.xlu1 %v3771_v54  ;;  %v618_v59 = vpop.f32.mrb[15].mxu0  ;;  %v3785_v61 = vadd.f32 %v2960_v57, %v3736_v33 }
 0x143   : > { %v3789_v62 = vadd.f32 %v3736_v33, %v618_v59 }
 0x145   : > { %957 = vrot.lane.b32.xlu0 %v3610_v7, %s3511_s23 }
 0x146   : > { %658 = vmax.xlane.f32.xlu1 %v3775_v58 }
 0x14a   : > { %654 = vmax.xlane.f32.xlu1 %v3781_v60 }
 0x14e   : > { %660 = vmax.xlane.f32.xlu1 %v3785_v61 }
 0x152   : > { %656 = vmax.xlane.f32.xlu1 %v3789_v62 }
 0x163   : > { %959 = vrot.lane.b32.xlu1 %v3617_v9, %s3511_s23 }
 0x164   : > { %650 = vmax.xlane.f32.xlu0 %v3793_v63 }
 0x167   : > { %937 = vrot.lane.b32.xlu1 %v3645_v17, %s3511_s23 }
 0x168   : > { %646 = vmax.xlane.f32.xlu0 %v3799_v2 }
 0x16b   : > { %941 = vrot.lane.b32.xlu1 %v3655_v19, %s3511_s23 }
 0x16c   : > { %652 = vmax.xlane.f32.xlu0 %v3805_v4 }
 0x16f   : > { %945 = vrot.lane.b32.xlu1 %v3665_v21, %s3511_s23 }
 0x173   : > { %949 = vrot.lane.b32.xlu1 %v3675_v23, %s3511_s23 }
 0x177   : > { %1258 = vrot.lane.b32.xlu1 %v3689_v25, %s3511_s23 }
 0x17b   : > { %1262 = vrot.lane.b32.xlu1 %v3701_v27, %s3511_s23 }
 0x17f   : > { %1264 = vrot.lane.b32.xlu1 %v3706_v28, %s3511_s23 }
 0x182   : > { %961 = vrot.lane.b32.xlu0 %v3624_v11, %s3511_s23 }
 0x183   : > { %1266 = vrot.lane.b32.xlu1 %v3709_v29, %s3511_s23 }
 0x186   : > { %963 = vrot.lane.b32.xlu0 %v3631_v13, %s3511_s23 }
 0x187   : > { %1270 = vrot.lane.b32.xlu1 %v3720_v31, %s3511_s23 }
 0x18a   : > { %965 = vrot.lane.b32.xlu0 %v3638_v15, %s3511_s23 }
 0x18b   : > { %1411 = vrot.lane.b32.xlu1 %v3575_v1, %s3512_s7 }
 0x18e   : > { %935 = vrot.lane.b32.xlu0 %v3601_v5, %s3511_s23 }
 0x192   : > { %939 = vrot.lane.b32.xlu0 %v3648_v18, %s3511_s23 }
 0x196   : > { %943 = vrot.lane.b32.xlu0 %v3658_v20, %s3511_s23 }
 0x19a   : > { %947 = vrot.lane.b32.xlu0 %v3668_v22, %s3511_s23 }
 0x19e   : > { %1256 = vrot.lane.b32.xlu0 %v3686_v24, %s3511_s23 }
 0x1a2   : > { %1260 = vrot.lane.b32.xlu0 %v3696_v26, %s3511_s23 }
 0x1a6   : > { %1268 = vrot.lane.b32.xlu0 %v3715_v30, %s3511_s23 }
 0x1aa   : > { %1409 = vrot.lane.b32.xlu0 %v3572_v0, %s3512_s7 }
 0x1b7   : > { %v635_v10 = vpop.xlane.xlu1 %634 }
 0x1b8   : > { %v631_v12 = vpop.xlane.xlu0 %630  ;;  %v664_v16 = vsub.f32 %v3739_v35, %v635_v10 }
 0x1b9   : > { %v662_v38 = vsub.f32 %v3742_v37, %v631_v12 }
 0x1bb   : > { %v637_v14 = vpop.xlane.xlu1 %636 }
 0x1bc   : > { %v665_v34 = vsub.f32 %v3747_v40, %v637_v14  ;;  %v633_v36 = vpop.xlane.xlu0 %632 }
 0x1bd   : > { %v663_v39 = vsub.f32 %v3750_v41, %v633_v36 }
 0x1be   : > { %v679_v42 = vpack.c.bf16 %v665_v34, %v664_v16 }
 0x1bf   : > { %v678_v44 = vpack.c.bf16 %v663_v39, %v662_v38  ;;  %v643_v45 = vpop.xlane.xlu1 %642 }
 0x1c0   : > { %v690_v47 = vmul.bf16 1069105081, %v679_v42  ;;  %v668_v35 = vsub.f32 %v3755_v43, %v643_v45  ;;  %v992_v43 = vsel %vm484_vm0, %v3724_v32, 0  ;;  %v998_v32 = vsel %vm484_vm0, %v956_v8, 0  ;;  %v958_v38 = vpop.permute.xlu0 %957 }
 0x1c1   : > { %v687_v49 = vmul.bf16 1069105081, %v678_v44  ;;  %v1001_v42 = vsel %vm484_vm0, %v958_v38, 0 }
 0x1c3   : > { %3271 = vpow.bf16 %v687_v49  ;;  %v639_v50 = vpop.xlane.xlu1 %638 }
 0x1c4   : > { %3273 = vpow.bf16 %v690_v47  ;;  %v666_v56 = vsub.f32 %v3759_v46, %v639_v50 }
 0x1c7   : > { %v645_v51 = vpop.xlane.xlu1 %644 }
 0x1c8   : > { %v669_v53 = vsub.f32 %v3763_v48, %v645_v51 }
 0x1ca   : > { %v681_v55 = vpack.c.bf16 %v669_v53, %v668_v35 }
 0x1cb   : > { %v641_v40 = vpop.xlane.xlu1 %640 }
 0x1cc   : > { %v667_v37 = vsub.f32 %v3767_v52, %v641_v40  ;;  %v696_v10 = vmul.bf16 1069105081, %v681_v55  ;;  %v995_v52 = vsel %vm484_vm0, %v954_v6, 0 }
 0x1ce   : > { %v3852_v41 = vpop.eup %3271  ;;  %v680_v57 = vpack.c.bf16 %v667_v37, %v666_v56 }
 0x1cf   : > { %v3854_v59 = vpop.eup %3273  ;;  %v649_v12 = vpop.xlane.xlu1 %648  ;;  %2977 = vmatprep.mubr.bf16.mxu1 %v3852_v41 }
 0x1d0   : > { %v693_v14 = vmul.bf16 1069105081, %v680_v57  ;;  %2978 = vmatmul.mubr.bf16.vlgmr.msra.gmra.mrb[0].mxu1 %v3854_v59 }
 0x1d1   : > { %2994 = vmatpush3.bf16.xpose.msra.mxu1 %v992_v43 }
 0x1d2   : > { %3275 = vpow.bf16 %v693_v14  ;;  %3194 = vmatprep.subr.msk.bf16.mxu1 %vm484_vm0, %v954_v6 }
 0x1d3   : > { %3277 = vpow.bf16 %v696_v10  ;;  %v659_v46 = vpop.xlane.xlu1 %658 }
 0x1d7   : > { %v655_v48 = vpop.xlane.xlu1 %654 }
 0x1d8   : > { %v674_v51 = vsub.f32 %v3781_v60, %v655_v48 }
 0x1d9   : > { %2996 = vmatpush3.bf16.xpose.msra.mxu1 %v995_v52 }
 0x1da   : > { %3195 = vmatprep.subr.msk.bf16.mxu1 %vm484_vm0, %v956_v8  ;;  %v671_v8 = vsub.f32 %v3771_v54, %v649_v12  ;;  %v676_v54 = vsub.f32 %v3775_v58, %v659_v46 }
 0x1db   : > { %v661_v34 = vpop.xlane.xlu1 %660 }
 0x1dc   : > { %v677_v57 = vsub.f32 %v3785_v61, %v661_v34 }
 0x1dd   : > { %v3863_v16 = vpop.eup %3275 }
 0x1de   : > { %v3865_v36 = vpop.eup %3277  ;;  %2981 = vmatprep.mubr.bf16.mxu1 %v3863_v16 }
 0x1df   : > { %2982 = vmatmul.mubr.bf16.gmra.mrb[4].mxu1 %v3865_v36  ;;  %v657_v39 = vpop.xlane.xlu1 %656 }
 0x1e0   : > { %v675_v47 = vsub.f32 %v3789_v62, %v657_v39 }
 0x1e1   : > { %2998 = vmatpush3.bf16.xpose.msra.mxu1 %v998_v32 }
 0x1e2   : > { %3196 = vmatprep.subr.msk.bf16.mxu1 %vm484_vm0, %v958_v38  ;;  %v684_v35 = vpack.c.bf16 %v675_v47, %v674_v51 }
 0x1e3   : > { %v960_v6 = vpop.permute.xlu1 %959 }
 0x1e4   : > { %v1004_v44 = vsel %vm484_vm0, %v960_v6, 0  ;;  %v705_v62 = vmul.bf16 1069105081, %v684_v35 }
 0x1e7   : > { %v938_v38 = vpop.permute.xlu1 %937 }
 0x1e9   : > { %3000 = vmatpush3.bf16.xpose.msra.mxu1 %v1001_v42 }
 0x1ea   : > { %3197 = vmatprep.subr.msk.bf16.mxu1 %vm484_vm0, %v960_v6 }
 0x1eb   : > { %v942_v6 = vpop.permute.xlu1 %941 }
 0x1f1   : > { %v651_v45 = vpop.xlane.xlu0 %650  ;;  %3002 = vmatpush3.bf16.xpose.msra.mxu1 %v1004_v44  ;;  %v946_v44 = vpop.permute.xlu1 %945 }
 0x1f2   : > { %v672_v40 = vsub.f32 %v3793_v63, %v651_v45 }
 0x1f5   : > { %v647_v49 = vpop.xlane.xlu0 %646  ;;  %v950_v47 = vpop.permute.xlu1 %949 }
 0x1f6   : > { %v670_v50 = vsub.f32 %v3799_v2, %v647_v49  ;;  %v685_v2 = vpack.c.bf16 %v677_v57, %v676_v54 }
 0x1f8   : > { %v682_v53 = vpack.c.bf16 %v671_v8, %v670_v50 }
 0x1f9   : > { %v653_v55 = vpop.xlane.xlu0 %652  ;;  %v1259_v35 = vpop.permute.xlu1 %1258 }
 0x1fa   : > { %v699_v56 = vmul.bf16 1069105081, %v682_v53  ;;  %v673_v37 = vsub.f32 %v3805_v4, %v653_v55  ;;  %v708_v4 = vmul.bf16 1069105081, %v685_v2 }
 0x1fc   : > { %3279 = vpow.bf16 %v699_v56  ;;  %v683_v10 = vpack.c.bf16 %v673_v37, %v672_v40 }
 0x1fd   : > { %v962_v14 = vpop.permute.xlu0 %961  ;;  %v1263_v40 = vpop.permute.xlu1 %1262 }
 0x1fe   : > { %v702_v12 = vmul.bf16 1069105081, %v683_v10  ;;  %3198 = vmatprep.subr.msk.bf16.mxu1 %vm484_vm0, %v962_v14  ;;  %v1007_v60 = vsel %vm484_vm0, %v962_v14, 0 }
 0x1ff   : > { %3004 = vmatpush3.bf16.xpose.msra.mxu1 %v1007_v60 }
 0x200   : > { %3281 = vpow.bf16 %v702_v12 }
 0x201   : > { %3283 = vpow.bf16 %v705_v62  ;;  %v964_v63 = vpop.permute.xlu0 %963  ;;  %v1265_v56 = vpop.permute.xlu1 %1264 }
 0x202   : > { %3199 = vmatprep.subr.msk.bf16.mxu1 %vm484_vm0, %v964_v63  ;;  %v1010_v61 = vsel %vm484_vm0, %v964_v63, 0  ;;  %3285 = vpow.bf16 %v708_v4 }
 0x205   : > { %v966_v43 = vpop.permute.xlu0 %965  ;;  %v1267_v10 = vpop.permute.xlu1 %1266 }
 0x206   : > { %v1013_v52 = vsel %vm484_vm0, %v966_v43, 0 }
 0x207   : > { %v3886_v48 = vpop.eup %3279  ;;  %3006 = vmatpush3.bf16.xpose.msra.mxu1 %v1010_v61 }
 0x208   : > { %2985 = vmatprep.mubr.bf16.mxu1 %v3886_v48  ;;  %3200 = vmatprep.subr.msk.bf16.mxu1 %vm484_vm0, %v966_v43 }
 0x209   : > { %v936_v34 = vpop.permute.xlu0 %935  ;;  %v1271_v14 = vpop.permute.xlu1 %1270 }
 0x20b   : > { %v3890_v58 = vpop.eup %3281 }
 0x20c   : > { %v3892_v46 = vpop.eup %3283  ;;  %2986 = vmatmul.mubr.bf16.gmra.mrb[8].mxu1 %v3890_v58 }
 0x20d   : > { %2989 = vmatprep.mubr.bf16.mxu1 %v3892_v46  ;;  %v3897_v32 = vpop.eup %3285  ;;  %v940_v39 = vpop.permute.xlu0 %939 }
 0x20f   : > { %3008 = vmatpush3.bf16.xpose.msra.mxu1 %v1013_v52 }
 0x211   : > { %v944_v42 = vpop.permute.xlu0 %943 }
 0x214   : > { %2990 = vmatmul.mubr.bf16.gmra.mrb[12].mxu1 %v3897_v32 }
 0x215   : > { %3009 = vmatprep.mubr.msk.bf16.mxu1 %vm484_vm0, %v936_v34  ;;  %v948_v45 = vpop.permute.xlu0 %947 }
 0x219   : > { %v1257_v49 = vpop.permute.xlu0 %1256 }
 0x21a   : > { %3025 = vmatprep.subr.bf16.mxu0 %v1257_v49 }
 0x21b   : > { %3026 = vmatpush3.bf16.msra.mxu0 %v1257_v49 }
 0x21c   : > { %3010 = vmatmul.mubr.msk.bf16.vlgmr.msra.gmra.mrb[16].mxu1 %vm484_vm0, %v938_v38  ;;  %3027 = vmatprep.subr.bf16.mxu0 %v1259_v35 }
 0x21d   : > { %3013 = vmatprep.mubr.msk.bf16.mxu1 %vm484_vm0, %v940_v39  ;;  %v1261_v55 = vpop.permute.xlu0 %1260 }
 0x21f   : > { %3028 = vmatpush3.bf16.msra.mxu0 %v1259_v35 }
 0x220   : > { %3029 = vmatprep.subr.bf16.mxu0 %v1261_v55 }
 0x221   : > { %v1269_v62 = vpop.permute.xlu0 %1268 }
 0x223   : > { %3030 = vmatpush3.bf16.msra.mxu0 %v1261_v55 }
 0x224   : > { %3014 = vmatmul.mubr.msk.bf16.gmra.mrb[20].mxu1 %vm484_vm0, %v942_v6  ;;  %3031 = vmatprep.subr.bf16.mxu0 %v1263_v40 }
 0x225   : > { %3017 = vmatprep.mubr.msk.bf16.mxu1 %vm484_vm0, %v944_v42  ;;  %v3928_v54 = vpop.permute.xlu0 %1409 }
 0x227   : > { %3032 = vmatpush3.bf16.msra.mxu0 %v1263_v40 }
 0x228   : > { %3033 = vmatprep.subr.bf16.mxu0 %v1265_v56 }
 0x22b   : > { %3034 = vmatpush3.bf16.msra.mxu0 %v1265_v56 }
 0x22c   : > { %3018 = vmatmul.mubr.msk.bf16.gmra.mrb[24].mxu1 %vm484_vm0, %v946_v44  ;;  %3035 = vmatprep.subr.bf16.mxu0 %v1267_v10 }
 0x22d   : > { %3021 = vmatprep.mubr.msk.bf16.mxu1 %vm484_vm0, %v948_v45 }
 0x22f   : > { %3036 = vmatpush3.bf16.msra.mxu0 %v1267_v10 }
 0x230   : > { %3037 = vmatprep.subr.bf16.mxu0 %v1269_v62 }
 0x233   : > { %3038 = vmatpush3.bf16.msra.mxu0 %v1269_v62 }
 0x234   : > { %3022 = vmatmul.mubr.msk.bf16.gmra.mrb[28].mxu1 %vm484_vm0, %v950_v47  ;;  %3039 = vmatprep.subr.bf16.mxu0 %v1271_v14 }
 0x237   : > { %3040 = vmatpush3.bf16.msra.mxu0 %v1271_v14 }
 0x238   : > { %3201 = vmatprep.subr.msk.bf16.mxu0 %vm484_vm0, %v3928_v54 }
 0x2a3   : > { %v3912_v8 = vpop.f32.mrb[0].mxu1 }
 0x2a4   : > { %4900 = vst [vmem:[#allocation2_spill] sm:$0xff] %v3912_v8  ;;  %v3914_v50 = vpop.f32.mrb[1].mxu1 }
 0x2a5   : > { %4901 = vst [vmem:[#allocation3_spill] sm:$0xff] %v3914_v50  ;;  %v3916_v51 = vpop.f32.mrb[2].mxu1 }
 0x2a6   : > { %4902 = vst [vmem:[#allocation4_spill] sm:$0xff] %v3916_v51  ;;  %v3918_v53 = vpop.f32.mrb[3].mxu1 }
 0x2a7   : > { %4903 = vst [vmem:[#allocation5_spill] sm:$0xff] %v3918_v53 }
 0x2b2   : > { %v3920_v0 = vpop.f32.mrb[4].mxu1 }
 0x2b3   : > { %4904 = vst [vmem:[#allocation6_spill] sm:$0xff] %v3920_v0  ;;  %v3922_v1 = vpop.f32.mrb[5].mxu1 }
 0x2b4   : > { %4905 = vst [vmem:[#allocation7_spill] sm:$0xff] %v3922_v1  ;;  %v3924_v37 = vpop.f32.mrb[6].mxu1 }
 0x2b5   : > { %4906 = vst [vmem:[#allocation8_spill] sm:$0xff] %v3924_v37  ;;  %v3926_v57 = vpop.f32.mrb[7].mxu1  ;;  %v3474_v37 = vld [vmem:[%s3594_s26 + $0x18] sm:$0xff]  }
 0x2b6   : > { %4907 = vst [vmem:[#allocation9_spill] sm:$0xff] %v3926_v57  ;;  %v3483_v57 = vld [vmem:[%s3683_s29 + $0x20] sm:$0xff]  }
 0x2df   : > { %v3932_v12 = vpop.f32.mrb[8].mxu1 }
 0x2e0   : > { %4908 = vst [vmem:[#allocation10_spill] sm:$0xff] %v3932_v12  ;;  %v3934_v60 = vpop.f32.mrb[9].mxu1  ;;  %v4221_v12 = vld [vmem:[%s3733_s6] ss:$0 sm:$0xff] }
 0x2e1   : > { %4909 = vst [vmem:[#allocation11_spill] sm:$0xff] %v3934_v60  ;;  %v3936_v2 = vpop.f32.mrb[10].mxu1  ;;  %v3479_v60 = vld [vmem:[%s3683_s29] sm:$0xff]  }
 0x2e2   : > { %4910 = vst [vmem:[#allocation12_spill] sm:$0xff] %v3936_v2  ;;  %v3938_v63 = vpop.f32.mrb[11].mxu1 }
 0x2e3   : > { %4911 = vst [vmem:[#allocation13_spill] sm:$0xff] %v3938_v63  ;;  %v3467_v63 = vld [vmem:[%s3569_s22 + $0x20] sm:$0xff]  }
 0x2e7   : > { %v3940_v4 = vpop.f32.mrb[12].mxu1 }
 0x2e8   : > { %4912 = vst [vmem:[#allocation14_spill] sm:$0xff] %v3940_v4  ;;  %v3942_v61 = vpop.f32.mrb[13].mxu1 }
 0x2e9   : > { %4913 = vst [vmem:[#allocation15_spill] sm:$0xff] %v3942_v61  ;;  %v3944_v43 = vpop.f32.mrb[14].mxu1 }
 0x2ea   : > { %4914 = vst [vmem:[#allocation16_spill] sm:$0xff] %v3944_v43  ;;  %v3946_v52 = vpop.f32.mrb[15].mxu1 }
 0x2eb   : > { %4915 = vst [vmem:[#allocation17_spill] sm:$0xff] %v3946_v52 }
 0x2ef   : > { %v3011_v34 = vpop.f32.mrb[16].mxu1 }
 0x2f0   : > { %v3949_v38 = vadd.f32 %v3011_v34, %v3736_v33  ;;  %v1049_v39 = vpop.f32.mrb[17].mxu1 }
 0x2f1   : > { %v3012_v6 = vpop.f32.mrb[18].mxu1  ;;  %v3956_v45 = vadd.f32 %v3736_v33, %v1049_v39 }
 0x2f2   : > { %1116 = vmax.xlane.f32.xlu0 %v3949_v38  ;;  %v1052_v42 = vpop.f32.mrb[19].mxu1  ;;  %v3961_v49 = vadd.f32 %v3012_v6, %v3736_v33 }
 0x2f3   : > { %v3953_v44 = vadd.f32 %v3736_v33, %v1052_v42 }
 0x2f5   : > { %1114 = vmax.xlane.f32.xlu1 %v3953_v44 }
 0x2f6   : > { %1112 = vmax.xlane.f32.xlu0 %v3956_v45 }
 0x2f7   : > { %v3015_v47 = vpop.f32.mrb[20].mxu1 }
 0x2f8   : > { %v1065_v35 = vpop.f32.mrb[21].mxu1 }
 0x2f9   : > { %v3016_v55 = vpop.f32.mrb[22].mxu1  ;;  %v3971_v6 = vadd.f32 %v3736_v33, %v1065_v35 }
 0x2fa   : > { %1118 = vmax.xlane.f32.xlu0 %v3961_v49  ;;  %v1068_v40 = vpop.f32.mrb[23].mxu1  ;;  %v3983_v4 = vadd.f32 %v3016_v55, %v3736_v33 }
 0x2ff   : > { %v3019_v56 = vpop.f32.mrb[24].mxu1 }
 0x300   : > { %v1081_v10 = vpop.f32.mrb[25].mxu1  ;;  %v3990_v35 = vadd.f32 %v3019_v56, %v3736_v33 }
 0x301   : > { %v3020_v62 = vpop.f32.mrb[26].mxu1 }
 0x302   : > { %v1084_v14 = vpop.f32.mrb[27].mxu1 }
 0x303   : > { %v4009_v55 = vadd.f32 %v3736_v33, %v1084_v14 }
 0x306   : > { %1413 = vrot.lane.b32.xlu1 %v3588_v3, %s3512_s7  ;;  %v3979_v3 = vadd.f32 %v3015_v47, %v3736_v33  ;;  %v4003_v47 = vadd.f32 %v3020_v62, %v3736_v33 }
 0x307   : > { %v3023_v34 = vpop.f32.mrb[28].mxu1 }
 0x308   : > { %v1097_v39 = vpop.f32.mrb[29].mxu1 }
 0x309   : > { %v3024_v42 = vpop.f32.mrb[30].mxu1 }
 0x30a   : > { %v1100_v43 = vpop.f32.mrb[31].mxu1 }
 0x30b   : > { %v3975_v52 = vadd.f32 %v3736_v33, %v1100_v43  ;;  %v3997_v43 = vadd.f32 %v3736_v33, %v1081_v10 }
 0x310   : > { %1415 = vrot.lane.b32.xlu0 %v3610_v7, %s3512_s7 }
 0x314   : > { %1417 = vrot.lane.b32.xlu0 %v3617_v9, %s3512_s7  ;;  %v3987_v9 = vadd.f32 %v3736_v33, %v1068_v40 }
 0x32a   : > { %1120 = vmax.xlane.f32.xlu1 %v3971_v6 }
 0x32e   : > { %1138 = vmax.xlane.f32.xlu1 %v3975_v52 }
 0x333   : > { %1124 = vmax.xlane.f32.xlu0 %v3979_v3 }
 0x337   : > { %1126 = vmax.xlane.f32.xlu0 %v3983_v4 }
 0x33b   : > { %1122 = vmax.xlane.f32.xlu0 %v3987_v9 }
 0x33f   : > { %1132 = vmax.xlane.f32.xlu0 %v3990_v35  ;;  %1419 = vrot.lane.b32.xlu1 %v3624_v11, %s3512_s7  ;;  %v4012_v11 = vadd.f32 %v3023_v34, %v3736_v33 }
 0x343   : > { %1128 = vmax.xlane.f32.xlu0 %v3997_v43  ;;  %1399 = vrot.lane.b32.xlu1 %v3655_v19, %s3512_s7  ;;  %v4021_v19 = vadd.f32 %v3736_v33, %v1097_v39 }
 0x347   : > { %1134 = vmax.xlane.f32.xlu0 %v4003_v47  ;;  %1403 = vrot.lane.b32.xlu1 %v3665_v21, %s3512_s7  ;;  %v4027_v21 = vadd.f32 %v3024_v42, %v3736_v33 }
 0x34b   : > { %1130 = vmax.xlane.f32.xlu0 %v4009_v55  ;;  %1407 = vrot.lane.b32.xlu1 %v3675_v23, %s3512_s7  ;;  %v1412_v23 = vpop.permute.xlu1 %1411 }
 0x34f   : > { %1140 = vmax.xlane.f32.xlu0 %v4012_v11  ;;  %1716 = vrot.lane.b32.xlu1 %v3689_v25, %s3512_s7 }
 0x353   : > { %1136 = vmax.xlane.f32.xlu0 %v4021_v19  ;;  %1718 = vrot.lane.b32.xlu1 %v3696_v26, %s3512_s7 }
 0x357   : > { %1142 = vmax.xlane.f32.xlu0 %v4027_v21  ;;  %1722 = vrot.lane.b32.xlu1 %v3706_v28, %s3512_s7 }
 0x35b   : > { %1724 = vrot.lane.b32.xlu1 %v3709_v29, %s3512_s7 }
 0x35f   : > { %1728 = vrot.lane.b32.xlu1 %v3720_v31, %s3512_s7 }
 0x36d   : > { %1421 = vrot.lane.b32.xlu0 %v3631_v13, %s3512_s7 }
 0x371   : > { %1423 = vrot.lane.b32.xlu0 %v3638_v15, %s3512_s7 }
 0x375   : > { %1393 = vrot.lane.b32.xlu0 %v3601_v5, %s3512_s7 }
 0x379   : > { %1395 = vrot.lane.b32.xlu0 %v3645_v17, %s3512_s7 }
 0x37d   : > { %1397 = vrot.lane.b32.xlu0 %v3648_v18, %s3512_s7 }
 0x37f   : > { %v1117_v25 = vpop.xlane.xlu0 %1116 }
 0x380   : > { %v1146_v17 = vsub.f32 %v3949_v38, %v1117_v25 }
 0x381   : > { %1401 = vrot.lane.b32.xlu0 %v3658_v20, %s3512_s7 }
 0x382   : > { %v1115_v26 = vpop.xlane.xlu1 %1114 }
 0x383   : > { %v1145_v13 = vsub.f32 %v3953_v44, %v1115_v26  ;;  %v1113_v28 = vpop.xlane.xlu0 %1112 }
 0x384   : > { %v1144_v15 = vsub.f32 %v3956_v45, %v1113_v28 }
 0x385   : > { %1405 = vrot.lane.b32.xlu0 %v3668_v22, %s3512_s7 }
 0x386   : > { %v1160_v5 = vpack.c.bf16 %v1145_v13, %v1144_v15  ;;  %v1414_v44 = vpop.permute.xlu1 %1413 }
 0x387   : > { %v1119_v29 = vpop.xlane.xlu0 %1118 }
 0x388   : > { %v1169_v31 = vmul.bf16 1069105081, %v1160_v5  ;;  %v1147_v18 = vsub.f32 %v3961_v49, %v1119_v29 }
 0x389   : > { %1714 = vrot.lane.b32.xlu0 %v3686_v24, %s3512_s7  ;;  %v1450_v24 = vsel %vm484_vm0, %v3928_v54, 0 }
 0x38a   : > { %3287 = vpow.bf16 %v1169_v31  ;;  %v1161_v20 = vpack.c.bf16 %v1147_v18, %v1146_v17 }
 0x38b   : > { %v1416_v45 = vpop.permute.xlu0 %1415 }
 0x38c   : > { %v1172_v40 = vmul.bf16 1069105081, %v1161_v20  ;;  %v1459_v49 = vsel %vm484_vm0, %v1416_v45, 0 }
 0x38d   : > { %1720 = vrot.lane.b32.xlu0 %v3701_v27, %s3512_s7  ;;  %v1453_v27 = vsel %vm484_vm0, %v1412_v23, 0 }
 0x38e   : > { %3289 = vpow.bf16 %v1172_v40 }
 0x38f   : > { %v1418_v56 = vpop.permute.xlu0 %1417 }
 0x390   : > { %v1462_v10 = vsel %vm484_vm0, %v1418_v56, 0 }
 0x391   : > { %1726 = vrot.lane.b32.xlu0 %v3715_v30, %s3512_s7  ;;  %v1456_v30 = vsel %vm484_vm0, %v1414_v44, 0 }
 0x395   : > { %v4060_v22 = vpop.eup %3287 }
 0x396   : > { %3041 = vmatprep.mubr.bf16.mxu0 %v4060_v22 }
 0x399   : > { %v4063_v38 = vpop.eup %3289 }
 0x39a   : > { %3042 = vmatmul.mubr.bf16.vlgmr.msra.gmra.mrb[16].mxu0 %v4063_v38 }
 0x39b   : > { %3058 = vmatpush3.bf16.xpose.msra.mxu0 %v1450_v24 }
 0x39c   : > { %3202 = vmatprep.subr.msk.bf16.mxu0 %vm484_vm0, %v1412_v23 }
 0x3a3   : > { %3060 = vmatpush3.bf16.xpose.msra.mxu0 %v1453_v27 }
 0x3a4   : > { %3203 = vmatprep.subr.msk.bf16.mxu0 %vm484_vm0, %v1414_v44 }
 0x3ab   : > { %3062 = vmatpush3.bf16.xpose.msra.mxu0 %v1456_v30 }
 0x3ac   : > { %3204 = vmatprep.subr.msk.bf16.mxu0 %vm484_vm0, %v1416_v45 }
 0x3b3   : > { %3064 = vmatpush3.bf16.xpose.msra.mxu0 %v1459_v49 }
 0x3b4   : > { %3205 = vmatprep.subr.msk.bf16.mxu0 %vm484_vm0, %v1418_v56 }
 0x3b7   : > { %v1121_v54 = vpop.xlane.xlu1 %1120 }
 0x3b8   : > { %v1148_v28 = vsub.f32 %v3971_v6, %v1121_v54 }
 0x3bb   : > { %3066 = vmatpush3.bf16.xpose.msra.mxu0 %v1462_v10  ;;  %v1139_v62 = vpop.xlane.xlu1 %1138 }
 0x3bc   : > { %v1157_v56 = vsub.f32 %v3975_v52, %v1139_v62  ;;  %v3463_v62 = vld [vmem:[%s3569_s22] sm:$0xff]  }
 0x3bd   : > { %1867 = vrot.lane.b32.xlu0 %v3463_v62, %s3513_s8 }
 0x3bf   : > { %v1420_v14 = vpop.permute.xlu1 %1419 }
 0x3c0   : > { %v1125_v34 = vpop.xlane.xlu0 %1124  ;;  %3206 = vmatprep.subr.msk.bf16.mxu0 %vm484_vm0, %v1420_v14  ;;  %v1465_v39 = vsel %vm484_vm0, %v1420_v14, 0 }
 0x3c1   : > { %v1150_v25 = vsub.f32 %v3979_v3, %v1125_v34 }
 0x3c3   : > { %3068 = vmatpush3.bf16.xpose.msra.mxu0 %v1465_v39 }
 0x3c4   : > { %v1127_v42 = vpop.xlane.xlu0 %1126 }
 0x3c5   : > { %v1151_v23 = vsub.f32 %v3983_v4, %v1127_v42 }
 0x3c7   : > { %v1163_v26 = vpack.c.bf16 %v1151_v23, %v1150_v25 }
 0x3c8   : > { %v1123_v13 = vpop.xlane.xlu0 %1122 }
 0x3c9   : > { %v1149_v15 = vsub.f32 %v3987_v9, %v1123_v13  ;;  %v1178_v29 = vmul.bf16 1069105081, %v1163_v26  ;;  %v3464_v26 = vld [vmem:[%s3569_s22 + $0x10] sm:$0xff]  }
 0x3ca   : > { %1871 = vrot.lane.b32.xlu1 %v3464_v26, %s3513_s8 }
 0x3cb   : > { %v1162_v5 = vpack.c.bf16 %v1149_v15, %v1148_v28  ;;  %v3465_v15 = vld [vmem:[%s3569_s22 + $0x8] sm:$0xff]  }
 0x3cc   : > { %v1133_v17 = vpop.xlane.xlu0 %1132  ;;  %1869 = vrot.lane.b32.xlu0 %v3465_v15, %s3513_s8 }
 0x3cd   : > { %v1175_v31 = vmul.bf16 1069105081, %v1162_v5  ;;  %v1154_v4 = vsub.f32 %v3990_v35, %v1133_v17 }
 0x3cf   : > { %3291 = vpow.bf16 %v1175_v31  ;;  %v1400_v31 = vpop.permute.xlu1 %1399 }
 0x3d0   : > { %3293 = vpow.bf16 %v1178_v29  ;;  %v1129_v18 = vpop.xlane.xlu0 %1128  ;;  %1873 = vrot.lane.b32.xlu0 %v3610_v7, %s3513_s8 }
 0x3d1   : > { %v1152_v27 = vsub.f32 %v3997_v43, %v1129_v18 }
 0x3d4   : > { %v1135_v20 = vpop.xlane.xlu0 %1134 }
 0x3d5   : > { %v1155_v40 = vsub.f32 %v4003_v47, %v1135_v20  ;;  %v1404_v20 = vpop.permute.xlu1 %1403 }
 0x3d7   : > { %v1165_v24 = vpack.c.bf16 %v1155_v40, %v1154_v4 }
 0x3d8   : > { %v1131_v3 = vpop.xlane.xlu0 %1130 }
 0x3d9   : > { %v1153_v6 = vsub.f32 %v4009_v55, %v1131_v3  ;;  %v1184_v45 = vmul.bf16 1069105081, %v1165_v24  ;;  %v1408_v4 = vpop.permute.xlu1 %1407 }
 0x3da   : > { %v4086_v44 = vpop.eup %3291 }
 0x3db   : > { %v4088_v9 = vpop.eup %3293  ;;  %v1164_v30 = vpack.c.bf16 %v1153_v6, %v1152_v27  ;;  %3045 = vmatprep.mubr.bf16.mxu0 %v4086_v44 }
 0x3dc   : > { %3046 = vmatmul.mubr.bf16.gmra.mrb[20].mxu0 %v4088_v9  ;;  %v1141_v49 = vpop.xlane.xlu0 %1140 }
 0x3dd   : > { %v1181_v47 = vmul.bf16 1069105081, %v1164_v30  ;;  %v1158_v10 = vsub.f32 %v4012_v11, %v1141_v49  ;;  %v1717_v30 = vpop.permute.xlu1 %1716 }
 0x3df   : > { %3295 = vpow.bf16 %v1181_v47 }
 0x3e0   : > { %3297 = vpow.bf16 %v1184_v45  ;;  %v1137_v35 = vpop.xlane.xlu0 %1136 }
 0x3e1   : > { %v1156_v43 = vsub.f32 %v4021_v19, %v1137_v35  ;;  %v1719_v45 = vpop.permute.xlu1 %1718 }
 0x3e3   : > { %v1166_v55 = vpack.c.bf16 %v1157_v56, %v1156_v43 }
 0x3e4   : > { %v1143_v54 = vpop.xlane.xlu0 %1142 }
 0x3e5   : > { %v1187_v14 = vmul.bf16 1069105081, %v1166_v55  ;;  %v1159_v34 = vsub.f32 %v4027_v21, %v1143_v54  ;;  %v1723_v47 = vpop.permute.xlu1 %1722 }
 0x3e7   : > { %3299 = vpow.bf16 %v1187_v14  ;;  %v1167_v39 = vpack.c.bf16 %v1159_v34, %v1158_v10 }
 0x3e8   : > { %v1422_v42 = vpop.permute.xlu0 %1421 }
 0x3e9   : > { %v1190_v23 = vmul.bf16 1069105081, %v1167_v39  ;;  %3207 = vmatprep.subr.msk.bf16.mxu0 %vm484_vm0, %v1422_v42  ;;  %v1468_v25 = vsel %vm484_vm0, %v1422_v42, 0  ;;  %v1725_v35 = vpop.permute.xlu1 %1724 }
 0x3ea   : > { %v4098_v52 = vpop.eup %3295  ;;  %3070 = vmatpush3.bf16.xpose.msra.mxu0 %v1468_v25 }
 0x3eb   : > { %v4100_v19 = vpop.eup %3297  ;;  %3301 = vpow.bf16 %v1190_v23  ;;  %3049 = vmatprep.mubr.bf16.mxu0 %v4098_v52 }
 0x3ec   : > { %3050 = vmatmul.mubr.bf16.gmra.mrb[24].mxu0 %v4100_v19  ;;  %v1424_v11 = vpop.permute.xlu0 %1423 }
 0x3ed   : > { %3208 = vmatprep.subr.msk.bf16.mxu0 %vm484_vm0, %v1424_v11  ;;  %v1471_v21 = vsel %vm484_vm0, %v1424_v11, 0  ;;  %v1729_v43 = vpop.permute.xlu1 %1728 }
 0x3f0   : > { %v1394_v28 = vpop.permute.xlu0 %1393 }
 0x3f2   : > { %v4110_v13 = vpop.eup %3299  ;;  %3072 = vmatpush3.bf16.xpose.msra.mxu0 %v1471_v21 }
 0x3f3   : > { %3053 = vmatprep.mubr.bf16.mxu0 %v4110_v13 }
 0x3f4   : > { %v1396_v29 = vpop.permute.xlu0 %1395 }
 0x3f6   : > { %v4115_v5 = vpop.eup %3301 }
 0x3f7   : > { %3054 = vmatmul.mubr.bf16.gmra.mrb[28].mxu0 %v4115_v5 }
 0x3f8   : > { %3073 = vmatprep.mubr.msk.bf16.mxu0 %vm484_vm0, %v1394_v28  ;;  %v1398_v17 = vpop.permute.xlu0 %1397 }
 0x3fc   : > { %v1402_v18 = vpop.permute.xlu0 %1401 }
 0x3ff   : > { %3074 = vmatmul.mubr.msk.bf16.vlgmr.msra.gmra.mrb[32].mxu0 %vm484_vm0, %v1396_v29 }
 0x400   : > { %3077 = vmatprep.mubr.msk.bf16.mxu0 %vm484_vm0, %v1398_v17  ;;  %v1406_v40 = vpop.permute.xlu0 %1405 }
 0x404   : > { %v1715_v6 = vpop.permute.xlu0 %1714 }
 0x405   : > { %3089 = vmatprep.subr.bf16.mxu1 %v1715_v6 }
 0x406   : > { %3090 = vmatpush3.bf16.msra.mxu1 %v1715_v6 }
 0x407   : > { %3078 = vmatmul.mubr.msk.bf16.gmra.mrb[36].mxu0 %vm484_vm0, %v1400_v31  ;;  %3091 = vmatprep.subr.bf16.mxu1 %v1717_v30 }
 0x408   : > { %3081 = vmatprep.mubr.msk.bf16.mxu0 %vm484_vm0, %v1402_v18  ;;  %v1721_v49 = vpop.permute.xlu0 %1720 }
 0x40a   : > { %3092 = vmatpush3.bf16.msra.mxu1 %v1717_v30 }
 0x40b   : > { %3093 = vmatprep.subr.bf16.mxu1 %v1719_v45 }
 0x40c   : > { %v1727_v56 = vpop.permute.xlu0 %1726 }
 0x40e   : > { %3094 = vmatpush3.bf16.msra.mxu1 %v1719_v45 }
 0x40f   : > { %3082 = vmatmul.mubr.msk.bf16.gmra.mrb[40].mxu0 %vm484_vm0, %v1404_v20  ;;  %3095 = vmatprep.subr.bf16.mxu1 %v1721_v49 }
 0x410   : > { %3085 = vmatprep.mubr.msk.bf16.mxu0 %vm484_vm0, %v1406_v40 }
 0x412   : > { %3096 = vmatpush3.bf16.msra.mxu1 %v1721_v49 }
 0x413   : > { %3097 = vmatprep.subr.bf16.mxu1 %v1723_v47 }
 0x416   : > { %3098 = vmatpush3.bf16.msra.mxu1 %v1723_v47 }
 0x417   : > { %3086 = vmatmul.mubr.msk.bf16.gmra.mrb[44].mxu0 %vm484_vm0, %v1408_v4  ;;  %3099 = vmatprep.subr.bf16.mxu1 %v1725_v35 }
 0x41a   : > { %3100 = vmatpush3.bf16.msra.mxu1 %v1725_v35 }
 0x41b   : > { %3101 = vmatprep.subr.bf16.mxu1 %v1727_v56 }
 0x41e   : > { %3102 = vmatpush3.bf16.msra.mxu1 %v1727_v56 }
 0x41f   : > { %3103 = vmatprep.subr.bf16.mxu1 %v1729_v43 }
 0x422   : > { %3104 = vmatpush3.bf16.msra.mxu1 %v1729_v43 }
 0x42f   : > { %v4136_v55 = vpop.permute.xlu0 %1867 }
 0x430   : > { %3209 = vmatprep.subr.msk.bf16.mxu1 %vm484_vm0, %v4136_v55 }
 0x43c   : > { %v1872_v0 = vpop.permute.xlu1 %1871 }
 0x46d   : > { %v4128_v7 = vpop.f32.mrb[16].mxu0 }
 0x46e   : > { %v4130_v24 = vpop.f32.mrb[17].mxu0 }
 0x46f   : > { %v4132_v3 = vpop.f32.mrb[18].mxu0 }
 0x470   : > { %v4134_v27 = vpop.f32.mrb[19].mxu0 }
 0x4af   : > { %v4140_v54 = vpop.f32.mrb[20].mxu0 }
 0x4b0   : > { %v4142_v10 = vpop.f32.mrb[21].mxu0 }
 0x4b1   : > { %v4144_v14 = vpop.f32.mrb[22].mxu0 }
 0x4b2   : > { %v4146_v34 = vpop.f32.mrb[23].mxu0 }
 0x4bf   : > { %v4148_v39 = vpop.f32.mrb[24].mxu0 }
 0x4c0   : > { %v4150_v42 = vpop.f32.mrb[25].mxu0 }
 0x4c1   : > { %v4152_v23 = vpop.f32.mrb[26].mxu0 }
 0x4c2   : > { %4916 = vst [vmem:[#allocation18_spill] sm:$0xff] %v4152_v23  ;;  %v4154_v25 = vpop.f32.mrb[27].mxu0 }
 0x4ca   : > { %v4156_v11 = vpop.f32.mrb[28].mxu0 }
 0x4cb   : > { %4917 = vst [vmem:[#allocation19_spill] sm:$0xff] %v4156_v11  ;;  %v4158_v21 = vpop.f32.mrb[29].mxu0 }
 0x4cc   : > { %4918 = vst [vmem:[#allocation20_spill] sm:$0xff] %v4158_v21  ;;  %v4160_v62 = vpop.f32.mrb[30].mxu0 }
 0x4cd   : > { %4919 = vst [vmem:[#allocation21_spill] sm:$0xff] %v4160_v62  ;;  %v4162_v26 = vpop.f32.mrb[31].mxu0 }
 0x4ce   : > { %4920 = vst [vmem:[#allocation22_spill] sm:$0xff] %v4162_v26 }
 0x4d2   : > { %v3075_v28 = vpop.f32.mrb[32].mxu0 }
 0x4d3   : > { %v4165_v15 = vadd.f32 %v3075_v28, %v3736_v33  ;;  %v1507_v29 = vpop.f32.mrb[33].mxu0 }
 0x4d4   : > { %v3076_v17 = vpop.f32.mrb[34].mxu0  ;;  %v4172_v20 = vadd.f32 %v3736_v33, %v1507_v29 }
 0x4d5   : > { %1574 = vmax.xlane.f32.xlu0 %v4165_v15  ;;  %v1510_v31 = vpop.f32.mrb[35].mxu0  ;;  %v4177_v4 = vadd.f32 %v3076_v17, %v3736_v33 }
 0x4d6   : > { %v4169_v18 = vadd.f32 %v3736_v33, %v1510_v31 }
 0x4d8   : > { %1572 = vmax.xlane.f32.xlu1 %v4169_v18 }
 0x4d9   : > { %1570 = vmax.xlane.f32.xlu0 %v4172_v20 }
 0x4da   : > { %v3079_v40 = vpop.f32.mrb[36].mxu0 }
 0x4db   : > { %v1523_v6 = vpop.f32.mrb[37].mxu0  ;;  %v4185_v47 = vadd.f32 %v3079_v40, %v3736_v33 }
 0x4dc   : > { %v4180_v30 = vadd.f32 %v3736_v33, %v1523_v6  ;;  %v3080_v45 = vpop.f32.mrb[38].mxu0 }
 0x4dd   : > { %1576 = vmax.xlane.f32.xlu0 %v4177_v4  ;;  %v1526_v49 = vpop.f32.mrb[39].mxu0  ;;  %v4188_v35 = vadd.f32 %v3080_v45, %v3736_v33 }
 0x4de   : > { %1578 = vmax.xlane.f32.xlu1 %v4180_v30  ;;  %v4193_v43 = vadd.f32 %v3736_v33, %v1526_v49 }
 0x4e1   : > { %1582 = vmax.xlane.f32.xlu0 %v4185_v47 }
 0x4e2   : > { %1584 = vmax.xlane.f32.xlu1 %v4188_v35  ;;  %v3083_v56 = vpop.f32.mrb[40].mxu0 }
 0x4e3   : > { %v4196_v28 = vadd.f32 %v3083_v56, %v3736_v33  ;;  %v1539_v29 = vpop.f32.mrb[41].mxu0 }
 0x4e4   : > { %v3084_v17 = vpop.f32.mrb[42].mxu0  ;;  %v4201_v40 = vadd.f32 %v3736_v33, %v1539_v29  ;;  %v3466_v29 = vld [vmem:[%s3569_s22 + $0x28] sm:$0xff]  }
 0x4e5   : > { %1580 = vmax.xlane.f32.xlu0 %v4193_v43  ;;  %v1542_v31 = vpop.f32.mrb[43].mxu0  ;;  %v4205_v49 = vadd.f32 %v3084_v17, %v3736_v33 }
 0x4e6   : > { %1590 = vmax.xlane.f32.xlu1 %v4196_v28  ;;  %v4209_v61 = vadd.f32 %v3736_v33, %v1542_v31 }
 0x4ea   : > { %1586 = vmax.xlane.f32.xlu1 %v4201_v40  ;;  %v3087_v6 = vpop.f32.mrb[44].mxu0 }
 0x4eb   : > { %v1555_v45 = vpop.f32.mrb[45].mxu0  ;;  %v4217_v17 = vadd.f32 %v3087_v6, %v3736_v33  ;;  %v3470_v6 = vld [vmem:[%s3569_s22 + $0x38] sm:$0xff]  }
 0x4ec   : > { %v3088_v56 = vpop.f32.mrb[46].mxu0  ;;  %v4224_v31 = vadd.f32 %v4221_v12, %v1555_v45  ;;  %v3471_v45 = vld [vmem:[%s3594_s26] sm:$0xff]  }
 0x4ed   : > { %v1558_v2 = vpop.f32.mrb[47].mxu0 }
 0x4ee   : > { %1592 = vmax.xlane.f32.xlu1 %v4205_v49  ;;  %v4232_v33 = vadd.f32 %v4221_v12, %v1558_v2  ;;  %v3473_v2 = vld [vmem:[%s3594_s26 + $0x10] sm:$0xff]  }
 0x4f2   : > { %1588 = vmax.xlane.f32.xlu1 %v4209_v61 }
 0x4fb   : > { %1877 = vrot.lane.b32.xlu0 %v3466_v29, %s3513_s8  ;;  %v4228_v29 = vadd.f32 %v4221_v12, %v3088_v56  ;;  %v3472_v56 = vld [vmem:[%s3594_s26 + $0x8] sm:$0xff]  }
 0x503   : > { %1875 = vrot.lane.b32.xlu1 %v3467_v63, %s3513_s8  ;;  %v3469_v63 = vld [vmem:[%s3569_s22 + $0x30] sm:$0xff]  }
 0x51a   : > { %1598 = vmax.xlane.f32.xlu0 %v4217_v17 }
 0x51e   : > { %1594 = vmax.xlane.f32.xlu0 %v4224_v31 }
 0x522   : > { %1600 = vmax.xlane.f32.xlu0 %v4228_v29 }
 0x527   : > { %1596 = vmax.xlane.f32.xlu1 %v4232_v33 }
 0x538   : > { %1879 = vrot.lane.b32.xlu0 %v3469_v63, %s3513_s8  ;;  %1881 = vrot.lane.b32.xlu1 %v3470_v6, %s3513_s8  ;;  %v3475_v63 = vld [vmem:[%s3594_s26 + $0x20] sm:$0xff]   ;;  %v3476_v6 = vld [vmem:[%s3594_s26 + $0x28] sm:$0xff]  }
 0x53c   : > { %1851 = vrot.lane.b32.xlu0 %v3471_v45, %s3513_s8  ;;  %1853 = vrot.lane.b32.xlu1 %v3472_v56, %s3513_s8  ;;  %v3477_v45 = vld [vmem:[%s3594_s26 + $0x30] sm:$0xff]   ;;  %v3478_v56 = vld [vmem:[%s3594_s26 + $0x38] sm:$0xff]  }
 0x540   : > { %1855 = vrot.lane.b32.xlu0 %v3473_v2, %s3513_s8  ;;  %1857 = vrot.lane.b32.xlu1 %v3474_v37, %s3513_s8  ;;  %v3480_v2 = vld [vmem:[%s3683_s29 + $0x8] sm:$0xff]   ;;  %v3481_v37 = vld [vmem:[%s3683_s29 + $0x10] sm:$0xff]  }
 0x544   : > { %1859 = vrot.lane.b32.xlu0 %v3475_v63, %s3513_s8  ;;  %1861 = vrot.lane.b32.xlu1 %v3476_v6, %s3513_s8  ;;  %v3482_v63 = vld [vmem:[%s3683_s29 + $0x18] sm:$0xff]   ;;  %v3484_v6 = vld [vmem:[%s3683_s29 + $0x28] sm:$0xff]  }
 0x548   : > { %1863 = vrot.lane.b32.xlu0 %v3477_v45, %s3513_s8  ;;  %1865 = vrot.lane.b32.xlu1 %v3478_v56, %s3513_s8  ;;  %v1870_v45 = vpop.permute.xlu0 %1869 }
 0x54c   : > { %2172 = vrot.lane.b32.xlu1 %v3479_v60, %s3513_s8  ;;  %2174 = vrot.lane.b32.xlu0 %v3480_v2, %s3513_s8  ;;  %v4267_v56 = vpop.permute.xlu0 %1873 }
 0x550   : > { %2176 = vrot.lane.b32.xlu1 %v3481_v37, %s3513_s8  ;;  %2178 = vrot.lane.b32.xlu0 %v3482_v63, %s3513_s8 }
 0x554   : > { %2180 = vrot.lane.b32.xlu1 %v3483_v57, %s3513_s8  ;;  %2182 = vrot.lane.b32.xlu0 %v3484_v6, %s3513_s8 }
 0x562   : > { %v1575_v60 = vpop.xlane.xlu0 %1574 }
 0x563   : > { %v1604_v63 = vsub.f32 %v4165_v15, %v1575_v60 }
 0x565   : > { %v1573_v51 = vpop.xlane.xlu1 %1572 }
 0x566   : > { %v1603_v2 = vsub.f32 %v4169_v18, %v1573_v51  ;;  %v1571_v1 = vpop.xlane.xlu0 %1570 }
 0x567   : > { %v1602_v37 = vsub.f32 %v4172_v20, %v1571_v1 }
 0x569   : > { %v1618_v53 = vpack.c.bf16 %v1603_v2, %v1602_v37 }
 0x56a   : > { %v1577_v8 = vpop.xlane.xlu0 %1576 }
 0x56b   : > { %v1627_v50 = vmul.bf16 1069105081, %v1618_v53  ;;  %v1605_v57 = vsub.f32 %v4177_v4, %v1577_v8  ;;  %v1579_v62 = vpop.xlane.xlu1 %1578 }
 0x56c   : > { %v1606_v1 = vsub.f32 %v4180_v30, %v1579_v62  ;;  %v1908_v62 = vsel %vm484_vm0, %v4136_v55, 0 }
 0x56d   : > { %3303 = vpow.bf16 %v1627_v50  ;;  %v1619_v6 = vpack.c.bf16 %v1605_v57, %v1604_v63 }
 0x56e   : > { %v1583_v26 = vpop.xlane.xlu0 %1582 }
 0x56f   : > { %v1630_v11 = vmul.bf16 1069105081, %v1619_v6  ;;  %v1608_v23 = vsub.f32 %v4185_v47, %v1583_v26  ;;  %v1585_v21 = vpop.xlane.xlu1 %1584 }
 0x570   : > { %v1609_v51 = vsub.f32 %v4188_v35, %v1585_v21 }
 0x571   : > { %3305 = vpow.bf16 %v1630_v11 }
 0x572   : > { %v1581_v18 = vpop.xlane.xlu0 %1580  ;;  %v1621_v20 = vpack.c.bf16 %v1609_v51, %v1608_v23 }
 0x573   : > { %v1607_v15 = vsub.f32 %v4193_v43, %v1581_v18  ;;  %v1591_v53 = vpop.xlane.xlu1 %1590 }
 0x574   : > { %v1636_v8 = vmul.bf16 1069105081, %v1621_v20  ;;  %v1612_v23 = vsub.f32 %v4196_v28, %v1591_v53  ;;  %v1911_v28 = vsel %vm484_vm0, %v1870_v45, 0 }
 0x575   : > { %v1620_v60 = vpack.c.bf16 %v1607_v15, %v1606_v1 }
 0x576   : > { %v1878_v18 = vpop.permute.xlu0 %1877 }
 0x577   : > { %v1633_v4 = vmul.bf16 1069105081, %v1620_v60  ;;  %v1587_v50 = vpop.xlane.xlu1 %1586  ;;  %v1923_v1 = vsel %vm484_vm0, %v1878_v18, 0 }
 0x578   : > { %v4277_v2 = vpop.eup %3303  ;;  %v1610_v35 = vsub.f32 %v4201_v40, %v1587_v50 }
 0x579   : > { %3307 = vpow.bf16 %v1633_v4  ;;  %3105 = vmatprep.mubr.bf16.mxu1 %v4277_v2 }
 0x57a   : > { %3309 = vpow.bf16 %v1636_v8 }
 0x57b   : > { %v1593_v26 = vpop.xlane.xlu1 %1592 }
 0x57c   : > { %v4280_v21 = vpop.eup %3305  ;;  %v1613_v11 = vsub.f32 %v4205_v49, %v1593_v26 }
 0x57d   : > { %3106 = vmatmul.mubr.bf16.vlgmr.msra.gmra.mrb[32].mxu1 %v4280_v21 }
 0x57e   : > { %3122 = vmatpush3.bf16.xpose.msra.mxu1 %v1908_v62  ;;  %v1623_v30 = vpack.c.bf16 %v1613_v11, %v1612_v23 }
 0x57f   : > { %3210 = vmatprep.subr.msk.bf16.mxu1 %vm484_vm0, %v1870_v45  ;;  %v1589_v47 = vpop.xlane.xlu1 %1588  ;;  %v1917_v45 = vsel %vm484_vm0, %v4267_v56, 0 }
 0x580   : > { %v1611_v43 = vsub.f32 %v4209_v61, %v1589_v47  ;;  %v1642_v63 = vmul.bf16 1069105081, %v1623_v30  ;;  %v1914_v61 = vsel %vm484_vm0, %v1872_v0, 0 }
 0x582   : > { %v1622_v37 = vpack.c.bf16 %v1611_v43, %v1610_v35 }
 0x583   : > { %v1876_v51 = vpop.permute.xlu1 %1875 }
 0x584   : > { %v4290_v57 = vpop.eup %3307  ;;  %v1639_v49 = vmul.bf16 1069105081, %v1622_v37 }
 0x585   : > { %3109 = vmatprep.mubr.bf16.mxu1 %v4290_v57  ;;  %v4294_v6 = vpop.eup %3309 }
 0x586   : > { %3311 = vpow.bf16 %v1639_v49  ;;  %3124 = vmatpush3.bf16.xpose.msra.mxu1 %v1911_v28 }
 0x587   : > { %3313 = vpow.bf16 %v1642_v63  ;;  %3110 = vmatmul.mubr.bf16.gmra.mrb[36].mxu1 %v4294_v6  ;;  %3211 = vmatprep.subr.msk.bf16.mxu1 %vm484_vm0, %v1872_v0  ;;  %v1920_v0 = vsel %vm484_vm0, %v1876_v51, 0 }
 0x58e   : > { %3126 = vmatpush3.bf16.xpose.msra.mxu1 %v1914_v61 }
 0x58f   : > { %3212 = vmatprep.subr.msk.bf16.mxu1 %vm484_vm0, %v4267_v56 }
 0x591   : > { %v4301_v55 = vpop.eup %3311 }
 0x592   : > { %v4303_v40 = vpop.eup %3313  ;;  %3113 = vmatprep.mubr.bf16.mxu1 %v4301_v55 }
 0x593   : > { %3114 = vmatmul.mubr.bf16.gmra.mrb[40].mxu1 %v4303_v40 }
 0x596   : > { %3128 = vmatpush3.bf16.xpose.msra.mxu1 %v1917_v45 }
 0x597   : > { %3213 = vmatprep.subr.msk.bf16.mxu1 %vm484_vm0, %v1876_v51 }
 0x59e   : > { %3130 = vmatpush3.bf16.xpose.msra.mxu1 %v1920_v0 }
 0x59f   : > { %3214 = vmatprep.subr.msk.bf16.mxu1 %vm484_vm0, %v1878_v18 }
 0x5a6   : > { %3132 = vmatpush3.bf16.xpose.msra.mxu1 %v1923_v1 }
 0x5a7   : > { %v1599_v20 = vpop.xlane.xlu0 %1598 }
 0x5a8   : > { %v1616_v56 = vsub.f32 %v4217_v17, %v1599_v20 }
 0x5ab   : > { %v1595_v15 = vpop.xlane.xlu0 %1594 }
 0x5ac   : > { %v1614_v11 = vsub.f32 %v4224_v31, %v1595_v15 }
 0x5af   : > { %v1601_v53 = vpop.xlane.xlu0 %1600 }
 0x5b0   : > { %v1617_v60 = vsub.f32 %v4228_v29, %v1601_v53 }
 0x5b2   : > { %v1625_v4 = vpack.c.bf16 %v1617_v60, %v1616_v56 }
 0x5b3   : > { %v1880_v8 = vpop.permute.xlu0 %1879 }
 0x5b4   : > { %v1597_v50 = vpop.xlane.xlu1 %1596  ;;  %3215 = vmatprep.subr.msk.bf16.mxu1 %vm484_vm0, %v1880_v8  ;;  %v1926_v26 = vsel %vm484_vm0, %v1880_v8, 0  ;;  %v1648_v30 = vmul.bf16 1069105081, %v1625_v4 }
 0x5b5   : > { %v1615_v23 = vsub.f32 %v4232_v33, %v1597_v50  ;;  %3134 = vmatpush3.bf16.xpose.msra.mxu1 %v1926_v26 }
 0x5b7   : > { %v1624_v62 = vpack.c.bf16 %v1615_v23, %v1614_v11  ;;  %v1852_v43 = vpop.permute.xlu0 %1851 }
 0x5b8   : > { %v1882_v47 = vpop.permute.xlu1 %1881 }
 0x5b9   : > { %v1645_v35 = vmul.bf16 1069105081, %v1624_v62  ;;  %3216 = vmatprep.subr.msk.bf16.mxu1 %vm484_vm0, %v1882_v47  ;;  %v1929_v17 = vsel %vm484_vm0, %v1882_v47, 0 }
 0x5bb   : > { %3315 = vpow.bf16 %v1645_v35  ;;  %v1856_v33 = vpop.permute.xlu0 %1855 }
 0x5bc   : > { %3317 = vpow.bf16 %v1648_v30  ;;  %v1854_v31 = vpop.permute.xlu1 %1853 }
 0x5bd   : > { %3136 = vmatpush3.bf16.xpose.msra.mxu1 %v1929_v17 }
 0x5bf   : > { %v1860_v49 = vpop.permute.xlu0 %1859 }
 0x5c0   : > { %v1858_v63 = vpop.permute.xlu1 %1857 }
 0x5c3   : > { %v1864_v61 = vpop.permute.xlu0 %1863 }
 0x5c4   : > { %v1862_v28 = vpop.permute.xlu1 %1861 }
 0x5c6   : > { %v4321_v29 = vpop.eup %3315 }
 0x5c7   : > { %v4323_v37 = vpop.eup %3317  ;;  %3117 = vmatprep.mubr.bf16.mxu1 %v4321_v29  ;;  %v2175_v8 = vpop.permute.xlu0 %2174 }
 0x5c8   : > { %3118 = vmatmul.mubr.bf16.gmra.mrb[44].mxu1 %v4323_v37  ;;  %v1866_v45 = vpop.permute.xlu1 %1865 }
 0x5c9   : > { %3137 = vmatprep.mubr.msk.bf16.mxu1 %vm484_vm0, %v1852_v43 }
 0x5cb   : > { %v2179_v50 = vpop.permute.xlu0 %2178 }
 0x5cc   : > { %v2173_v60 = vpop.permute.xlu1 %2172 }
 0x5cd   : > { %3153 = vmatprep.subr.bf16.mxu0 %v2173_v60 }
 0x5ce   : > { %3154 = vmatpush3.bf16.msra.mxu0 %v2173_v60 }
 0x5cf   : > { %3155 = vmatprep.subr.bf16.mxu0 %v2175_v8  ;;  %v2183_v47 = vpop.permute.xlu0 %2182 }
 0x5d0   : > { %3138 = vmatmul.mubr.msk.bf16.vlgmr.msra.gmra.mrb[48].mxu1 %vm484_vm0, %v1854_v31  ;;  %v2177_v4 = vpop.permute.xlu1 %2176 }
 0x5d1   : > { %3141 = vmatprep.mubr.msk.bf16.mxu1 %vm484_vm0, %v1856_v33 }
 0x5d2   : > { %3156 = vmatpush3.bf16.msra.mxu0 %v2175_v8 }
 0x5d3   : > { %3157 = vmatprep.subr.bf16.mxu0 %v2177_v4 }
 0x5d4   : > { %v2181_v62 = vpop.permute.xlu1 %2180 }
 0x5d6   : > { %3158 = vmatpush3.bf16.msra.mxu0 %v2177_v4 }
 0x5d7   : > { %3159 = vmatprep.subr.bf16.mxu0 %v2179_v50 }
 0x5d8   : > { %3142 = vmatmul.mubr.msk.bf16.gmra.mrb[52].mxu1 %vm484_vm0, %v1858_v63 }
 0x5d9   : > { %3145 = vmatprep.mubr.msk.bf16.mxu1 %vm484_vm0, %v1860_v49 }
 0x5da   : > { %3160 = vmatpush3.bf16.msra.mxu0 %v2179_v50 }
 0x5db   : > { %3161 = vmatprep.subr.bf16.mxu0 %v2181_v62 }
 0x5de   : > { %3162 = vmatpush3.bf16.msra.mxu0 %v2181_v62 }
 0x5df   : > { %3163 = vmatprep.subr.bf16.mxu0 %v2183_v47 }
 0x5e0   : > { %3146 = vmatmul.mubr.msk.bf16.gmra.mrb[56].mxu1 %vm484_vm0, %v1862_v28 }
 0x5e1   : > { %3149 = vmatprep.mubr.msk.bf16.mxu1 %vm484_vm0, %v1864_v61 }
 0x5e2   : > { %3164 = vmatpush3.bf16.msra.mxu0 %v2183_v47 }
 0x5e8   : > { %3150 = vmatmul.mubr.msk.bf16.gmra.mrb[60].mxu1 %vm484_vm0, %v1866_v45 }
 0x650   : > { %v4335_v51 = vpop.f32.mrb[32].mxu1 }
 0x651   : > { %v4337_v0 = vpop.f32.mrb[33].mxu1 }
 0x652   : > { %v4339_v18 = vpop.f32.mrb[34].mxu1 }
 0x653   : > { %v4341_v1 = vpop.f32.mrb[35].mxu1 }
 0x65a   : > { %v4343_v20 = vpop.f32.mrb[36].mxu1 }
 0x65b   : > { %4921 = vst [vmem:[#allocation23_spill] sm:$0xff] %v4343_v20  ;;  %v4345_v15 = vpop.f32.mrb[37].mxu1  ;;  %v1198_v20 = vunpack.c.l.bf16 %v4088_v9 }
 0x65c   : > { %v4347_v53 = vpop.f32.mrb[38].mxu1 }
 0x65d   : > { %4922 = vst [vmem:[#allocation24_spill] sm:$0xff] %v4347_v53  ;;  %v4349_v56 = vpop.f32.mrb[39].mxu1 }
 0x65e   : > { %4923 = vst [vmem:[#allocation25_spill] sm:$0xff] %v4349_v56  ;;  %v1194_v56 = vunpack.c.l.bf16 %v4063_v38 }
 0x666   : > { %v4351_v26 = vpop.f32.mrb[40].mxu1 }
 0x667   : > { %4924 = vst [vmem:[#allocation26_spill] sm:$0xff] %v4351_v26  ;;  %v4353_v11 = vpop.f32.mrb[41].mxu1 }
 0x668   : > { %4925 = vst [vmem:[#allocation27_spill] sm:$0xff] %v4353_v11  ;;  %v4355_v23 = vpop.f32.mrb[42].mxu1  ;;  %v3486_v11 = vld [vmem:[%s3683_s29 + $0x38] sm:$0xff]  }
 0x669   : > { %4926 = vst [vmem:[#allocation28_spill] sm:$0xff] %v4355_v23  ;;  %v4357_v30 = vpop.f32.mrb[43].mxu1 }
 0x66a   : > { %4927 = vst [vmem:[#allocation29_spill] sm:$0xff] %v4357_v30 }
 0x69b   : > { %v4359_v35 = vpop.f32.mrb[44].mxu1 }
 0x69c   : > { %4928 = vst [vmem:[#allocation30_spill] sm:$0xff] %v4359_v35  ;;  %v4361_v17 = vpop.f32.mrb[45].mxu1 }
 0x69d   : > { %4929 = vst [vmem:[#allocation31_spill] sm:$0xff] %v4361_v17  ;;  %v4363_v43 = vpop.f32.mrb[46].mxu1 }
 0x69e   : > { %4930 = vst [vmem:[#allocation32_spill] sm:$0xff] %v4363_v43  ;;  %v4365_v31 = vpop.f32.mrb[47].mxu1 }
 0x69f   : > { %4931 = vst [vmem:[#allocation33_spill] sm:$0xff] %v4365_v31 }
 0x6a3   : > { %v3139_v33 = vpop.f32.mrb[48].mxu1 }
 0x6a4   : > { %v4368_v63 = vadd.f32 %v4221_v12, %v3139_v33  ;;  %v1965_v49 = vpop.f32.mrb[49].mxu1 }
 0x6a5   : > { %v3140_v28 = vpop.f32.mrb[50].mxu1  ;;  %v4375_v60 = vadd.f32 %v4221_v12, %v1965_v49 }
 0x6a6   : > { %2032 = vmax.xlane.f32.xlu0 %v4368_v63  ;;  %v1968_v61 = vpop.f32.mrb[51].mxu1  ;;  %v4380_v4 = vadd.f32 %v4221_v12, %v3140_v28 }
 0x6a7   : > { %v4372_v45 = vadd.f32 %v4221_v12, %v1968_v61 }
 0x6a9   : > { %2030 = vmax.xlane.f32.xlu1 %v4372_v45 }
 0x6aa   : > { %2028 = vmax.xlane.f32.xlu0 %v4375_v60 }
 0x6ab   : > { %v3143_v8 = vpop.f32.mrb[52].mxu1 }
 0x6ac   : > { %v4383_v50 = vadd.f32 %v4221_v12, %v3143_v8  ;;  %v1981_v62 = vpop.f32.mrb[53].mxu1 }
 0x6ad   : > { %v3144_v47 = vpop.f32.mrb[54].mxu1  ;;  %v4388_v49 = vadd.f32 %v4221_v12, %v1981_v62 }
 0x6ae   : > { %2034 = vmax.xlane.f32.xlu0 %v4380_v4  ;;  %2040 = vmax.xlane.f32.xlu1 %v4383_v50  ;;  %v1984_v33 = vpop.f32.mrb[55].mxu1  ;;  %v4391_v61 = vadd.f32 %v4221_v12, %v3144_v47 }
 0x6af   : > { %v4396_v8 = vadd.f32 %v4221_v12, %v1984_v33 }
 0x6b2   : > { %2042 = vmax.xlane.f32.xlu0 %v4391_v61  ;;  %2036 = vmax.xlane.f32.xlu1 %v4388_v49 }
 0x6b3   : > { %v3147_v28 = vpop.f32.mrb[56].mxu1 }
 0x6b4   : > { %v4399_v43 = vadd.f32 %v4221_v12, %v3147_v28  ;;  %v1997_v31 = vpop.f32.mrb[57].mxu1 }
 0x6b5   : > { %v3148_v35 = vpop.f32.mrb[58].mxu1  ;;  %v4404_v47 = vadd.f32 %v4221_v12, %v1997_v31 }
 0x6b6   : > { %2038 = vmax.xlane.f32.xlu0 %v4396_v8  ;;  %2048 = vmax.xlane.f32.xlu1 %v4399_v43  ;;  %v2000_v62 = vpop.f32.mrb[59].mxu1  ;;  %v4407_v23 = vadd.f32 %v4221_v12, %v3148_v35 }
 0x6b7   : > { %v4412_v28 = vadd.f32 %v4221_v12, %v2000_v62 }
 0x6ba   : > { %2050 = vmax.xlane.f32.xlu0 %v4407_v23  ;;  %2044 = vmax.xlane.f32.xlu1 %v4404_v47 }
 0x6bb   : > { %v3151_v33 = vpop.f32.mrb[60].mxu1 }
 0x6bc   : > { %v4415_v17 = vadd.f32 %v4221_v12, %v3151_v33  ;;  %v2013_v30 = vpop.f32.mrb[61].mxu1  ;;  %v3485_v33 = vld [vmem:[%s3683_s29 + $0x30] sm:$0xff]  }
 0x6bd   : > { %v3152_v26 = vpop.f32.mrb[62].mxu1  ;;  %v4420_v31 = vadd.f32 %v4221_v12, %v2013_v30  ;;  %v1192_v30 = vunpack.c.l.bf16 %v4060_v22 }
 0x6be   : > { %2046 = vmax.xlane.f32.xlu0 %v4412_v28  ;;  %2056 = vmax.xlane.f32.xlu1 %v4415_v17  ;;  %v2016_v35 = vpop.f32.mrb[63].mxu1  ;;  %v4423_v53 = vadd.f32 %v4221_v12, %v3152_v26  ;;  %v1193_v26 = vunpack.c.h.bf16 %v4060_v22  ;;  %v1200_v22 = vunpack.c.l.bf16 %v4098_v52 }
 0x6bf   : > { %v4428_v62 = vadd.f32 %v4221_v12, %v2016_v35  ;;  %v1195_v12 = vunpack.c.h.bf16 %v4063_v38  ;;  %v1196_v35 = vunpack.c.l.bf16 %v4086_v44  ;;  %v1202_v38 = vunpack.c.l.bf16 %v4100_v19 }
 0x6c2   : > { %2058 = vmax.xlane.f32.xlu0 %v4423_v53  ;;  %2052 = vmax.xlane.f32.xlu1 %v4420_v31 }
 0x6c6   : > { %2054 = vmax.xlane.f32.xlu0 %v4428_v62 }
 0x6d3   : > { %2184 = vrot.lane.b32.xlu1 %v3485_v33, %s3513_s8  ;;  %v1197_v33 = vunpack.c.h.bf16 %v4086_v44  ;;  %v1204_v44 = vunpack.c.l.bf16 %v4110_v13 }
 0x6dc   : > { %2186 = vrot.lane.b32.xlu0 %v3486_v11, %s3513_s8  ;;  %v1199_v11 = vunpack.c.h.bf16 %v4088_v9  ;;  %v1206_v9 = vunpack.c.l.bf16 %v4115_v5 }
 0x6f7   : > { %1208 = vadd.xlane.f32.xlu1 %v1192_v30  ;;  %v1203_v30 = vunpack.c.h.bf16 %v4100_v19  ;;  %v1652_v19 = vunpack.c.l.bf16 %v4280_v21 }
 0x6fb   : > { %1210 = vadd.xlane.f32.xlu0 %v1193_v26  ;;  %1212 = vadd.xlane.f32.xlu1 %v1194_v56  ;;  %v1201_v56 = vunpack.c.h.bf16 %v4098_v52  ;;  %v1207_v26 = vunpack.c.h.bf16 %v4115_v5  ;;  %v1650_v52 = vunpack.c.l.bf16 %v4277_v2  ;;  %v1656_v5 = vunpack.c.l.bf16 %v4294_v6 }
 0x6ff   : > { %1214 = vadd.xlane.f32.xlu0 %v1195_v12  ;;  %1216 = vadd.xlane.f32.xlu1 %v1196_v35  ;;  %v1651_v12 = vunpack.c.h.bf16 %v4277_v2  ;;  %v1653_v35 = vunpack.c.h.bf16 %v4280_v21  ;;  %v1658_v2 = vunpack.c.l.bf16 %v4301_v55  ;;  %v1660_v21 = vunpack.c.l.bf16 %v4303_v40 }
 0x703   : > { %1218 = vadd.xlane.f32.xlu0 %v1197_v33  ;;  %1220 = vadd.xlane.f32.xlu1 %v1198_v20  ;;  %v1205_v20 = vunpack.c.h.bf16 %v4110_v13  ;;  %v1654_v13 = vunpack.c.l.bf16 %v4290_v57  ;;  %v1655_v33 = vunpack.c.h.bf16 %v4290_v57  ;;  %v1662_v57 = vunpack.c.l.bf16 %v4321_v29 }
 0x707   : > { %1222 = vadd.xlane.f32.xlu0 %v1199_v11  ;;  %1224 = vadd.xlane.f32.xlu1 %v1200_v22  ;;  %v1657_v11 = vunpack.c.h.bf16 %v4294_v6  ;;  %v1659_v22 = vunpack.c.h.bf16 %v4301_v55  ;;  %v1664_v6 = vunpack.c.l.bf16 %v4323_v37  ;;  %v710_v55 = vunpack.c.l.bf16 %v3852_v41 }
 0x70b   : > { %1226 = vadd.xlane.f32.xlu0 %v1201_v56  ;;  %1228 = vadd.xlane.f32.xlu1 %v1202_v38  ;;  %v1661_v56 = vunpack.c.h.bf16 %v4303_v40  ;;  %v1663_v38 = vunpack.c.h.bf16 %v4321_v29  ;;  %v712_v29 = vunpack.c.l.bf16 %v3854_v59 }
 0x70f   : > { %1230 = vadd.xlane.f32.xlu0 %v1203_v30  ;;  %1232 = vadd.xlane.f32.xlu1 %v1204_v44  ;;  %v1665_v44 = vunpack.c.h.bf16 %v4323_v37 }
 0x713   : > { %1234 = vadd.xlane.f32.xlu0 %v1205_v20  ;;  %1236 = vadd.xlane.f32.xlu1 %v1206_v9 }
 0x717   : > { %1238 = vadd.xlane.f32.xlu0 %v1207_v26  ;;  %1666 = vadd.xlane.f32.xlu1 %v1650_v52  ;;  %v711_v52 = vunpack.c.h.bf16 %v3852_v41  ;;  %v716_v41 = vunpack.c.l.bf16 %v3865_v36 }
 0x71b   : > { %1668 = vadd.xlane.f32.xlu0 %v1651_v12  ;;  %1670 = vadd.xlane.f32.xlu1 %v1652_v19 }
 0x71f   : > { %1672 = vadd.xlane.f32.xlu0 %v1653_v35  ;;  %1674 = vadd.xlane.f32.xlu1 %v1654_v13  ;;  %v713_v13 = vunpack.c.h.bf16 %v3854_v59  ;;  %v717_v59 = vunpack.c.h.bf16 %v3865_v36 }
 0x723   : > { %1676 = vadd.xlane.f32.xlu0 %v1655_v33  ;;  %1678 = vadd.xlane.f32.xlu1 %v1656_v5  ;;  %v714_v33 = vunpack.c.l.bf16 %v3863_v16 }
 0x727   : > { %1680 = vadd.xlane.f32.xlu0 %v1657_v11  ;;  %1682 = vadd.xlane.f32.xlu1 %v1658_v2 }
 0x72b   : > { %1684 = vadd.xlane.f32.xlu0 %v1659_v22  ;;  %1686 = vadd.xlane.f32.xlu1 %v1660_v21 }
 0x72f   : > { %1688 = vadd.xlane.f32.xlu0 %v1661_v56  ;;  %1690 = vadd.xlane.f32.xlu1 %v1662_v57  ;;  %v718_v56 = vunpack.c.l.bf16 %v3886_v48 }
 0x733   : > { %1692 = vadd.xlane.f32.xlu0 %v1663_v38  ;;  %1694 = vadd.xlane.f32.xlu1 %v1664_v6  ;;  %v2033_v30 = vpop.xlane.xlu0 %2032 }
 0x734   : > { %v2062_v57 = vsub.f32 %v4368_v63, %v2033_v30 }
 0x736   : > { %v2031_v20 = vpop.xlane.xlu1 %2030 }
 0x737   : > { %v2061_v9 = vsub.f32 %v4372_v45, %v2031_v20  ;;  %1696 = vadd.xlane.f32.xlu0 %v1665_v44  ;;  %726 = vadd.xlane.f32.xlu1 %v710_v55  ;;  %v2029_v40 = vpop.xlane.xlu0 %2028 }
 0x738   : > { %v2060_v26 = vsub.f32 %v4375_v60, %v2029_v40  ;;  %v715_v60 = vunpack.c.h.bf16 %v3863_v16 }
 0x73a   : > { %v2076_v12 = vpack.c.bf16 %v2061_v9, %v2060_v26  ;;  %v721_v26 = vunpack.c.h.bf16 %v3890_v58 }
 0x73b   : > { %v2041_v19 = vpop.xlane.xlu1 %2040  ;;  %728 = vadd.xlane.f32.xlu0 %v711_v52  ;;  %730 = vadd.xlane.f32.xlu1 %v712_v29  ;;  %v2035_v35 = vpop.xlane.xlu0 %2034  ;;  %v722_v52 = vunpack.c.l.bf16 %v3892_v46 }
 0x73c   : > { %v2085_v37 = vmul.bf16 1069105081, %v2076_v12  ;;  %v2063_v22 = vsub.f32 %v4380_v4, %v2035_v35  ;;  %v719_v4 = vunpack.c.h.bf16 %v3886_v48  ;;  %v2066_v48 = vsub.f32 %v4383_v50, %v2041_v19 }
 0x73e   : > { %3319 = vpow.bf16 %v2085_v37  ;;  %v2077_v44 = vpack.c.bf16 %v2063_v22, %v2062_v57 }
 0x73f   : > { %v2037_v45 = vpop.xlane.xlu1 %2036  ;;  %732 = vadd.xlane.f32.xlu0 %v713_v13  ;;  %734 = vadd.xlane.f32.xlu1 %v714_v33  ;;  %v2043_v5 = vpop.xlane.xlu0 %2042 }
 0x740   : > { %v2064_v38 = vsub.f32 %v4388_v49, %v2037_v45  ;;  %v2088_v30 = vmul.bf16 1069105081, %v2077_v44  ;;  %v2067_v49 = vsub.f32 %v4391_v61, %v2043_v5  ;;  %v723_v61 = vunpack.c.h.bf16 %v3892_v46 }
 0x741   : > { %v725_v5 = vunpack.c.h.bf16 %v3897_v32 }
 0x742   : > { %3321 = vpow.bf16 %v2088_v30  ;;  %v2079_v37 = vpack.c.bf16 %v2067_v49, %v2066_v48 }
 0x743   : > { %v2049_v11 = vpop.xlane.xlu1 %2048  ;;  %736 = vadd.xlane.f32.xlu0 %v715_v60  ;;  %738 = vadd.xlane.f32.xlu1 %v716_v41  ;;  %v2039_v2 = vpop.xlane.xlu0 %2038 }
 0x744   : > { %v2065_v21 = vsub.f32 %v4396_v8, %v2039_v2  ;;  %v720_v8 = vunpack.c.l.bf16 %v3890_v58  ;;  %v2094_v45 = vmul.bf16 1069105081, %v2079_v37  ;;  %v2070_v60 = vsub.f32 %v4399_v43, %v2049_v11 }
 0x746   : > { %v2078_v20 = vpack.c.bf16 %v2065_v21, %v2064_v38 }
 0x747   : > { %v2045_v6 = vpop.xlane.xlu1 %2044  ;;  %740 = vadd.xlane.f32.xlu0 %v717_v59  ;;  %742 = vadd.xlane.f32.xlu1 %v718_v56  ;;  %v2051_v16 = vpop.xlane.xlu0 %2050 }
 0x748   : > { %v2091_v9 = vmul.bf16 1069105081, %v2078_v20  ;;  %v2068_v29 = vsub.f32 %v4404_v47, %v2045_v6  ;;  %v2071_v50 = vsub.f32 %v4407_v23, %v2051_v16 }
 0x749   : > { %v4482_v55 = vpop.eup %3319 }
 0x74a   : > { %3169 = vmatprep.mubr.bf16.mxu0 %v4482_v55  ;;  %3323 = vpow.bf16 %v2091_v9  ;;  %v2081_v2 = vpack.c.bf16 %v2071_v50, %v2070_v60 }
 0x74b   : > { %v2057_v36 = vpop.xlane.xlu1 %2056  ;;  %744 = vadd.xlane.f32.xlu0 %v719_v4  ;;  %746 = vadd.xlane.f32.xlu1 %v720_v8  ;;  %v2047_v63 = vpop.xlane.xlu0 %2046  ;;  %3325 = vpow.bf16 %v2094_v45 }
 0x74c   : > { %v2069_v40 = vsub.f32 %v4412_v28, %v2047_v63  ;;  %v724_v28 = vunpack.c.l.bf16 %v3897_v32  ;;  %v2074_v43 = vsub.f32 %v4415_v17, %v2057_v36 }
 0x74d   : > { %v4500_v23 = vpop.eup %3321 }
 0x74e   : > { %v2080_v13 = vpack.c.bf16 %v2069_v40, %v2068_v29 }
 0x74f   : > { %748 = vadd.xlane.f32.xlu0 %v721_v26  ;;  %750 = vadd.xlane.f32.xlu1 %v722_v52  ;;  %v2053_v12 = vpop.xlane.xlu1 %2052  ;;  %v2059_v35 = vpop.xlane.xlu0 %2058 }
 0x750   : > { %v2097_v47 = vmul.bf16 1069105081, %v2080_v13  ;;  %v2072_v46 = vsub.f32 %v4420_v31, %v2053_v12  ;;  %v2075_v59 = vsub.f32 %v4423_v53, %v2059_v35 }
 0x752   : > { %3327 = vpow.bf16 %v2097_v47  ;;  %v2083_v31 = vpack.c.bf16 %v2075_v59, %v2074_v43 }
 0x753   : > { %752 = vadd.xlane.f32.xlu0 %v723_v61  ;;  %754 = vadd.xlane.f32.xlu1 %v724_v28  ;;  %v2185_v58 = vpop.permute.xlu1 %2184  ;;  %v2055_v33 = vpop.xlane.xlu0 %2054 }
 0x754   : > { %3165 = vmatprep.subr.bf16.mxu0 %v2185_v58  ;;  %v2073_v19 = vsub.f32 %v4428_v62, %v2055_v33  ;;  %v2100_v62 = vmul.bf16 1069105081, %v2081_v2  ;;  %v2106_v57 = vmul.bf16 1069105081, %v2083_v31 }
 0x755   : > { %3166 = vmatpush3.bf16.msra.mxu0 %v2185_v58  ;;  %v4502_v21 = vpop.eup %3323 }
 0x756   : > { %v2082_v22 = vpack.c.bf16 %v2073_v19, %v2072_v46  ;;  %3329 = vpow.bf16 %v2100_v62  ;;  %v4508_v11 = vpop.eup %3325  ;;  %v4932_v62 = vld [vmem:[#allocation20_spill] sm:$0xff] }
 0x757   : > { %756 = vadd.xlane.f32.xlu0 %v725_v5  ;;  %v2187_v41 = vpop.permute.xlu0 %2186 }
 0x758   : > { %3167 = vmatprep.subr.bf16.mxu0 %v2187_v41  ;;  %v2103_v32 = vmul.bf16 1069105081, %v2082_v22 }
 0x759   : > { %3168 = vmatpush3.bf16.msra.mxu0 %v2187_v41 }
 0x75a   : > { %3331 = vpow.bf16 %v2103_v32  ;;  %v4933_v32 = vld [vmem:[#allocation18_spill] sm:$0xff] }
 0x75b   : > { %3333 = vpow.bf16 %v2106_v57 }
 0x75c   : > { %3170 = vmatmul.mubr.bf16.vlgmr.msra.gmra.mrb[48].mxu0 %v4500_v23 }
 0x75d   : > { %3173 = vmatprep.mubr.bf16.mxu0 %v4502_v21  ;;  %v4510_v56 = vpop.eup %3327 }
 0x761   : > { %v4514_v53 = vpop.eup %3329 }
 0x764   : > { %3174 = vmatmul.mubr.bf16.gmra.mrb[52].mxu0 %v4508_v11 }
 0x765   : > { %3177 = vmatprep.mubr.bf16.mxu0 %v4510_v56  ;;  %v4516_v38 = vpop.eup %3331 }
 0x766   : > { %v4520_v17 = vpop.eup %3333 }
 0x76c   : > { %3178 = vmatmul.mubr.bf16.gmra.mrb[56].mxu0 %v4514_v53 }
 0x76d   : > { %3181 = vmatprep.mubr.bf16.mxu0 %v4516_v38 }
 0x774   : > { %3182 = vmatmul.mubr.bf16.gmra.mrb[60].mxu0 %v4520_v17 }
 0x784   : > { %v1209_v6 = vpop.xlane.xlu1 %1208 }
 0x785   : > { %3335 = vrcp.f32 %v1209_v6  ;;  %v4934_v6 = vld [vmem:[#allocation19_spill] sm:$0xff] }
 0x788   : > { %v1213_v16 = vpop.xlane.xlu1 %1212  ;;  %v1211_v44 = vpop.xlane.xlu0 %1210 }
 0x789   : > { %3337 = vrcp.f32 %v1213_v16 }
 0x78a   : > { %3339 = vrcp.f32 %v1211_v44  ;;  %v4935_v44 = vld [vmem:[#allocation22_spill] sm:$0xff] }
 0x78c   : > { %v1217_v20 = vpop.xlane.xlu1 %1216  ;;  %v1215_v4 = vpop.xlane.xlu0 %1214 }
 0x78d   : > { %3341 = vrcp.f32 %v1217_v20 }
 0x78e   : > { %3343 = vrcp.f32 %v1215_v4 }
 0x78f   : > { %v3336_v8 = vpop.eup %3335 }
 0x790   : > { %v1221_v36 = vpop.xlane.xlu1 %1220  ;;  %v1219_v63 = vpop.xlane.xlu0 %1218  ;;  %v1377_v30 = vmul.f32 %v3336_v8, %v4130_v24 }
 0x791   : > { %3345 = vrcp.f32 %v1221_v36 }
 0x792   : > { %3347 = vrcp.f32 %v1219_v63  ;;  %2325 = vrot.lane.b32.xlu1 %v1377_v30, %s3514_s9 }
 0x793   : > { %v3338_v49 = vpop.eup %3337 }
 0x794   : > { %v3340_v9 = vpop.eup %3339  ;;  %v1225_v40 = vpop.xlane.xlu1 %1224  ;;  %v1379_v52 = vmul.f32 %v3338_v49, %v4128_v7  ;;  %v4936_v49 = vld [vmem:[#allocation21_spill] sm:$0xff] }
 0x795   : > { %v1223_v26 = vpop.xlane.xlu0 %1222  ;;  %3349 = vrcp.f32 %v1225_v40  ;;  %v1378_v48 = vmul.f32 %v3340_v9, %v4134_v27 }
 0x796   : > { %3351 = vrcp.f32 %v1223_v26  ;;  %2329 = vrot.lane.b32.xlu1 %v1379_v52, %s3514_s9 }
 0x797   : > { %v3342_v29 = vpop.eup %3341  ;;  %2327 = vrot.lane.b32.xlu0 %v1378_v48, %s3514_s9 }
 0x798   : > { %v3344_v24 = vpop.eup %3343  ;;  %v1229_v12 = vpop.xlane.xlu1 %1228  ;;  %v1381_v37 = vmul.f32 %v3342_v29, %v4142_v10 }
 0x799   : > { %v1227_v35 = vpop.xlane.xlu0 %1226  ;;  %3353 = vrcp.f32 %v1229_v12  ;;  %v1380_v13 = vmul.f32 %v3344_v24, %v4132_v3 }
 0x79a   : > { %3355 = vrcp.f32 %v1227_v35 }
 0x79b   : > { %v3346_v61 = vpop.eup %3345  ;;  %2333 = vrot.lane.b32.xlu0 %v1381_v37, %s3514_s9  ;;  %2331 = vrot.lane.b32.xlu1 %v1380_v13, %s3514_s9 }
 0x79c   : > { %v3348_v7 = vpop.eup %3347  ;;  %v1233_v27 = vpop.xlane.xlu1 %1232  ;;  %v1383_v58 = vmul.f32 %v3346_v61, %v4140_v54 }
 0x79d   : > { %v1231_v28 = vpop.xlane.xlu0 %1230  ;;  %3357 = vrcp.f32 %v1233_v27  ;;  %v1382_v33 = vmul.f32 %v3348_v7, %v4146_v34 }
 0x79e   : > { %3359 = vrcp.f32 %v1231_v28 }
 0x79f   : > { %v3350_v45 = vpop.eup %3349  ;;  %2337 = vrot.lane.b32.xlu0 %v1383_v58, %s3514_s9  ;;  %2335 = vrot.lane.b32.xlu1 %v1382_v33, %s3514_s9 }
 0x7a0   : > { %v3352_v3 = vpop.eup %3351  ;;  %v1237_v10 = vpop.xlane.xlu1 %1236  ;;  %v1385_v47 = vmul.f32 %v3350_v45, %v4150_v42 }
 0x7a1   : > { %v1235_v50 = vpop.xlane.xlu0 %1234  ;;  %3361 = vrcp.f32 %v1237_v10  ;;  %v1384_v19 = vmul.f32 %v3352_v3, %v4144_v14  ;;  %v2111_v3 = vunpack.c.h.bf16 %v4500_v23  ;;  %v4937_v10 = vld [vmem:[#allocation3_spill] sm:$0xff] }
 0x7a2   : > { %3363 = vrcp.f32 %v1235_v50 }
 0x7a3   : > { %v3354_v5 = vpop.eup %3353  ;;  %2341 = vrot.lane.b32.xlu0 %v1385_v47, %s3514_s9  ;;  %2339 = vrot.lane.b32.xlu1 %v1384_v19, %s3514_s9 }
 0x7a4   : > { %v3356_v54 = vpop.eup %3355  ;;  %v1667_v34 = vpop.xlane.xlu1 %1666  ;;  %v1387_v46 = vmul.f32 %v3354_v5, %v4148_v39 }
 0x7a5   : > { %v1239_v60 = vpop.xlane.xlu0 %1238  ;;  %3365 = vrcp.f32 %v1667_v34  ;;  %v1386_v41 = vmul.f32 %v3356_v54, %v4154_v25  ;;  %v2109_v34 = vunpack.c.h.bf16 %v4482_v55 }
 0x7a6   : > { %3367 = vrcp.f32 %v1239_v60  ;;  %v4938_v60 = vld [vmem:[#allocation2_spill] sm:$0xff] }
 0x7a7   : > { %v3358_v2 = vpop.eup %3357  ;;  %2345 = vrot.lane.b32.xlu0 %v1387_v46, %s3514_s9  ;;  %2343 = vrot.lane.b32.xlu1 %v1386_v41, %s3514_s9  ;;  %v4939_v41 = vld [vmem:[#allocation5_spill] sm:$0xff] }
 0x7a8   : > { %v3360_v14 = vpop.eup %3359  ;;  %v4545_v42 = vpop.xlane.xlu1 %1670  ;;  %v1389_v59 = vmul.f32 %v3358_v2, %v4932_v62 }
 0x7a9   : > { %v1669_v22 = vpop.xlane.xlu0 %1668  ;;  %v1388_v43 = vmul.f32 %v3360_v14, %v4933_v32  ;;  %v2115_v32 = vunpack.c.h.bf16 %v4508_v11 }
 0x7aa   : > { %3369 = vrcp.f32 %v1669_v22 }
 0x7ab   : > { %v3362_v31 = vpop.eup %3361  ;;  %2349 = vrot.lane.b32.xlu0 %v1389_v59, %s3514_s9  ;;  %2347 = vrot.lane.b32.xlu1 %v1388_v43, %s3514_s9  ;;  %v4940_v43 = vld [vmem:[#allocation7_spill] sm:$0xff] }
 0x7ac   : > { %v3364_v39 = vpop.eup %3363  ;;  %v4551_v25 = vpop.xlane.xlu1 %1674  ;;  %v1391_v16 = vmul.f32 %v3362_v31, %v4934_v6  ;;  %v4941_v6 = vld [vmem:[#allocation4_spill] sm:$0xff] }
 0x7ad   : > { %v4553_v57 = vpop.xlane.xlu0 %1672  ;;  %v1390_v20 = vmul.f32 %v3364_v39, %v4935_v44  ;;  %v2110_v39 = vunpack.c.l.bf16 %v4500_v23 }
 0x7af   : > { %v3366_v4 = vpop.eup %3365  ;;  %2353 = vrot.lane.b32.xlu0 %v1391_v16, %s3514_s9  ;;  %2351 = vrot.lane.b32.xlu1 %v1390_v20, %s3514_s9 }
 0x7b0   : > { %v3368_v8 = vpop.eup %3367  ;;  %v4559_v36 = vpop.xlane.xlu1 %1678  ;;  %v1835_v30 = vmul.f32 %v3366_v4, %v4337_v0 }
 0x7b1   : > { %v4561_v63 = vpop.xlane.xlu0 %1676  ;;  %v1392_v9 = vmul.f32 %v3368_v8, %v4936_v49  ;;  %v4942_v49 = vld [vmem:[#allocation6_spill] sm:$0xff] }
 0x7b3   : > { %2389 = vrot.lane.b32.xlu0 %v1835_v30, %s3515_s10  ;;  %2355 = vrot.lane.b32.xlu1 %v1392_v9, %s3514_s9  ;;  %v2113_v30 = vunpack.c.h.bf16 %v4502_v21 }
 0x7b4   : > { %v3370_v40 = vpop.eup %3369  ;;  %v4567_v26 = vpop.xlane.xlu1 %1682 }
 0x7b5   : > { %v4569_v52 = vpop.xlane.xlu0 %1680  ;;  %v1836_v48 = vmul.f32 %v3370_v40, %v4341_v1  ;;  %v2108_v40 = vunpack.c.l.bf16 %v4482_v55 }
 0x7b7   : > { %2391 = vrot.lane.b32.xlu1 %v1836_v48, %s3515_s10  ;;  %v4943_v48 = vld [vmem:[#allocation9_spill] sm:$0xff] }
 0x7b8   : > { %v4573_v29 = vpop.xlane.xlu1 %1686 }
 0x7b9   : > { %v4575_v24 = vpop.xlane.xlu0 %1684 }
 0x7bc   : > { %v4577_v0 = vpop.xlane.xlu1 %1690 }
 0x7bd   : > { %v4579_v12 = vpop.xlane.xlu0 %1688 }
 0x7c0   : > { %v4581_v35 = vpop.xlane.xlu1 %1694 }
 0x7c1   : > { %v4583_v37 = vpop.xlane.xlu0 %1692 }
 0x7c4   : > { %v727_v13 = vpop.xlane.xlu1 %726 }
 0x7c5   : > { %v4585_v61 = vpop.xlane.xlu0 %1696  ;;  %3371 = vrcp.f32 %v727_v13 }
 0x7c8   : > { %v731_v7 = vpop.xlane.xlu1 %730 }
 0x7c9   : > { %v729_v1 = vpop.xlane.xlu0 %728  ;;  %3373 = vrcp.f32 %v731_v7 }
 0x7ca   : > { %3375 = vrcp.f32 %v729_v1 }
 0x7cc   : > { %v735_v27 = vpop.xlane.xlu1 %734 }
 0x7cd   : > { %v733_v28 = vpop.xlane.xlu0 %732  ;;  %3377 = vrcp.f32 %v735_v27 }
 0x7ce   : > { %3379 = vrcp.f32 %v733_v28  ;;  %v2119_v28 = vunpack.c.h.bf16 %v4514_v53 }
 0x7cf   : > { %v3372_v58 = vpop.eup %3371 }
 0x7d0   : > { %v739_v33 = vpop.xlane.xlu1 %738  ;;  %v4589_v50 = vmul.f32 %v3372_v58, %v4937_v10  ;;  %v4944_v58 = vld [vmem:[#allocation11_spill] sm:$0xff] }
 0x7d1   : > { %v737_v45 = vpop.xlane.xlu0 %736  ;;  %3381 = vrcp.f32 %v739_v33 }
 0x7d2   : > { %3383 = vrcp.f32 %v737_v45  ;;  %2130 = vadd.xlane.f32.xlu0 %v2111_v3  ;;  %v2114_v45 = vunpack.c.l.bf16 %v4508_v11  ;;  %v4945_v3 = vld [vmem:[#allocation8_spill] sm:$0xff] }
 0x7d3   : > { %v3374_v47 = vpop.eup %3373 }
 0x7d4   : > { %v3376_v19 = vpop.eup %3375  ;;  %v743_v5 = vpop.xlane.xlu1 %742  ;;  %v4593_v46 = vmul.f32 %v3374_v47, %v4938_v60  ;;  %v2112_v60 = vunpack.c.l.bf16 %v4502_v21 }
 0x7d5   : > { %v741_v54 = vpop.xlane.xlu0 %740  ;;  %3385 = vrcp.f32 %v743_v5  ;;  %v4596_v2 = vmul.f32 %v3376_v19, %v4939_v41  ;;  %v2117_v5 = vunpack.c.h.bf16 %v4510_v56  ;;  %v4947_v41 = vld [vmem:[#allocation13_spill] sm:$0xff] }
 0x7d6   : > { %3387 = vrcp.f32 %v741_v54  ;;  %2126 = vadd.xlane.f32.xlu0 %v2109_v34  ;;  %v4946_v54 = vld [vmem:[#allocation10_spill] sm:$0xff] }
 0x7d7   : > { %v3378_v14 = vpop.eup %3377 }
 0x7d8   : > { %v3380_v22 = vpop.eup %3379  ;;  %v747_v62 = vpop.xlane.xlu1 %746  ;;  %v4600_v31 = vmul.f32 %v3378_v14, %v4940_v43  ;;  %v2118_v43 = vunpack.c.l.bf16 %v4514_v53  ;;  %v4952_v53 = vld [vmem:[#allocation16_spill] sm:$0xff] }
 0x7d9   : > { %v745_v59 = vpop.xlane.xlu0 %744  ;;  %3389 = vrcp.f32 %v747_v62  ;;  %v4604_v16 = vmul.f32 %v3380_v22, %v4941_v6  ;;  %v2123_v62 = vunpack.c.h.bf16 %v4520_v17 }
 0x7da   : > { %3391 = vrcp.f32 %v745_v59  ;;  %2138 = vadd.xlane.f32.xlu0 %v2115_v32  ;;  %v4948_v59 = vld [vmem:[#allocation15_spill] sm:$0xff] }
 0x7db   : > { %v3382_v44 = vpop.eup %3381  ;;  %2128 = vadd.xlane.f32.xlu1 %v2110_v39  ;;  %v4949_v39 = vld [vmem:[#allocation12_spill] sm:$0xff] }
 0x7dc   : > { %v3384_v20 = vpop.eup %3383  ;;  %v751_v4 = vpop.xlane.xlu1 %750  ;;  %v4608_v9 = vmul.f32 %v3382_v44, %v4942_v49  ;;  %v4951_v49 = vld [vmem:[#allocation17_spill] sm:$0xff] }
 0x7dd   : > { %v749_v8 = vpop.xlane.xlu0 %748  ;;  %3393 = vrcp.f32 %v751_v4  ;;  %v4612_v23 = vmul.f32 %v3384_v20, %v4943_v48  ;;  %v2121_v20 = vunpack.c.h.bf16 %v4516_v38  ;;  %v4950_v4 = vld [vmem:[#allocation14_spill] sm:$0xff] }
 0x7de   : > { %3395 = vrcp.f32 %v749_v8  ;;  %2134 = vadd.xlane.f32.xlu0 %v2113_v30  ;;  %v2116_v30 = vunpack.c.l.bf16 %v4510_v56 }
 0x7df   : > { %v3386_v13 = vpop.eup %3385  ;;  %2124 = vadd.xlane.f32.xlu1 %v2108_v40 }
 0x7e0   : > { %v3388_v7 = vpop.eup %3387  ;;  %v755_v1 = vpop.xlane.xlu1 %754  ;;  %v4616_v33 = vmul.f32 %v3386_v13, %v4944_v58 }
 0x7e1   : > { %v753_v27 = vpop.xlane.xlu0 %752  ;;  %3397 = vrcp.f32 %v755_v1  ;;  %v4620_v55 = vmul.f32 %v3388_v7, %v4945_v3  ;;  %v2122_v7 = vunpack.c.l.bf16 %v4520_v17  ;;  %v2120_v1 = vunpack.c.l.bf16 %v4516_v38 }
 0x7e2   : > { %3399 = vrcp.f32 %v753_v27  ;;  %2146 = vadd.xlane.f32.xlu0 %v2119_v28 }
 0x7e3   : > { %v3390_v10 = vpop.eup %3389  ;;  %2136 = vadd.xlane.f32.xlu1 %v2114_v45 }
 0x7e4   : > { %v3392_v47 = vpop.eup %3391  ;;  %v4624_v34 = vmul.f32 %v3390_v10, %v4946_v54  ;;  %v4955_v10 = vld [vmem:[#allocation27_spill] sm:$0xff] }
 0x7e5   : > { %v757_v19 = vpop.xlane.xlu0 %756  ;;  %v4628_v14 = vmul.f32 %v3392_v47, %v4947_v41  ;;  %v4957_v41 = vld [vmem:[#allocation26_spill] sm:$0xff] }
 0x7e6   : > { %3401 = vrcp.f32 %v757_v19  ;;  %2142 = vadd.xlane.f32.xlu0 %v2117_v5 }
 0x7e7   : > { %v3394_v11 = vpop.eup %3393  ;;  %2132 = vadd.xlane.f32.xlu1 %v2112_v60  ;;  %3403 = vrcp.f32 %v4545_v42 }
 0x7e8   : > { %v3396_v22 = vpop.eup %3395  ;;  %v4632_v32 = vmul.f32 %v3394_v11, %v4948_v59  ;;  %3405 = vrcp.f32 %v4551_v25 }
 0x7e9   : > { %v4636_v6 = vmul.f32 %v3396_v22, %v4949_v39  ;;  %3407 = vrcp.f32 %v4553_v57  ;;  %v4958_v22 = vld [vmem:[#allocation29_spill] sm:$0xff] }
 0x7ea   : > { %2154 = vadd.xlane.f32.xlu0 %v2123_v62  ;;  %3409 = vrcp.f32 %v4559_v36 }
 0x7eb   : > { %v3398_v44 = vpop.eup %3397  ;;  %2144 = vadd.xlane.f32.xlu1 %v2118_v43  ;;  %3411 = vrcp.f32 %v4561_v63 }
 0x7ec   : > { %v3400_v21 = vpop.eup %3399  ;;  %v4640_v8 = vmul.f32 %v3398_v44, %v4950_v4  ;;  %3413 = vrcp.f32 %v4567_v26  ;;  %v4959_v44 = vld [vmem:[#allocation31_spill] sm:$0xff] }
 0x7ed   : > { %v4644_v40 = vmul.f32 %v3400_v21, %v4951_v49  ;;  %3415 = vrcp.f32 %v4569_v52 }
 0x7ee   : > { %2150 = vadd.xlane.f32.xlu0 %v2121_v20  ;;  %3417 = vrcp.f32 %v4573_v29  ;;  %v4960_v20 = vld [vmem:[#allocation28_spill] sm:$0xff] }
 0x7ef   : > { %2140 = vadd.xlane.f32.xlu1 %v2116_v30  ;;  %3419 = vrcp.f32 %v4575_v24 }
 0x7f0   : > { %v3402_v48 = vpop.eup %3401  ;;  %3421 = vrcp.f32 %v4577_v0  ;;  %v4954_v0 = vld [vmem:[#allocation25_spill] sm:$0xff] }
 0x7f1   : > { %v4647_v13 = vmul.f32 %v3402_v48, %v4952_v53  ;;  %v3404_v56 = vpop.eup %3403  ;;  %3423 = vrcp.f32 %v4579_v12 }
 0x7f2   : > { %v3406_v17 = vpop.eup %3405  ;;  %v1837_v27 = vmul.f32 %v3404_v56, %v4335_v51  ;;  %3425 = vrcp.f32 %v4581_v35  ;;  %v4956_v35 = vld [vmem:[#allocation24_spill] sm:$0xff] }
 0x7f3   : > { %2152 = vadd.xlane.f32.xlu1 %v2122_v7  ;;  %v3408_v42 = vpop.eup %3407  ;;  %v1839_v36 = vmul.f32 %v3406_v17, %v4345_v15  ;;  %3427 = vrcp.f32 %v4583_v37 }
 0x7f4   : > { %v3410_v57 = vpop.eup %3409  ;;  %v1838_v63 = vmul.f32 %v3408_v42, %v4339_v18  ;;  %v4953_v18 = vld [vmem:[#allocation23_spill] sm:$0xff]  ;;  %3429 = vrcp.f32 %v4585_v61 }
 0x7f5   : > { %v3412_v26 = vpop.eup %3411 }
 0x7f6   : > { %v3414_v24 = vpop.eup %3413  ;;  %v1840_v28 = vmul.f32 %v3412_v26, %v4954_v0 }
 0x7f7   : > { %2148 = vadd.xlane.f32.xlu1 %v2120_v1  ;;  %v3416_v58 = vpop.eup %3415  ;;  %v1843_v47 = vmul.f32 %v3414_v24, %v4955_v10  ;;  %v4962_v1 = vld [vmem:[#allocation33_spill] sm:$0xff] }
 0x7f8   : > { %v3418_v45 = vpop.eup %3417  ;;  %v1842_v19 = vmul.f32 %v3416_v58, %v4956_v35 }
 0x7f9   : > { %v3420_v5 = vpop.eup %3419  ;;  %v1845_v11 = vmul.f32 %v3418_v45, %v4957_v41 }
 0x7fa   : > { %v3422_v60 = vpop.eup %3421  ;;  %v1844_v62 = vmul.f32 %v3420_v5, %v4958_v22 }
 0x7fb   : > { %v3424_v59 = vpop.eup %3423  ;;  %v1847_v21 = vmul.f32 %v3422_v60, %v4959_v44 }
 0x7fc   : > { %v3426_v39 = vpop.eup %3425  ;;  %v1846_v4 = vmul.f32 %v3424_v59, %v4960_v20 }
 0x7fd   : > { %v3428_v30 = vpop.eup %3427 }
 0x7fe   : > { %v1848_v56 = vmul.f32 %v3428_v30, %v4962_v1  ;;  %v3430_v17 = vpop.eup %3429 }
 0x804   : > { %2393 = vrot.lane.b32.xlu0 %v1837_v27, %s3515_s10  ;;  %v2326_v38 = vpop.permute.xlu1 %2325 }
 0x805   : > { %v4664_v25 = vsel %vm484_vm0, %v4589_v50, %v2326_v38  ;;  %v1841_v50 = vmul.f32 %v3410_v57, %v4953_v18 }
 0x808   : > { %2397 = vrot.lane.b32.xlu0 %v1839_v36, %s3515_s10  ;;  %2395 = vrot.lane.b32.xlu1 %v1838_v63, %s3515_s10  ;;  %v2330_v51 = vpop.permute.xlu1 %2329 }
 0x809   : > { %v4674_v52 = vsel %vm484_vm0, %v4593_v46, %v2330_v51  ;;  %v2328_v29 = vpop.permute.xlu0 %2327 }
 0x80a   : > { %v4678_v15 = vsel %vm484_vm0, %v4596_v2, %v2328_v29 }
 0x80c   : > { %2401 = vrot.lane.b32.xlu0 %v1841_v50, %s3515_s10  ;;  %2399 = vrot.lane.b32.xlu1 %v1840_v28, %s3515_s10 }
 0x80d   : > { %v2332_v12 = vpop.permute.xlu1 %2331  ;;  %v2334_v46 = vpop.permute.xlu0 %2333 }
 0x80e   : > { %v4688_v2 = vsel %vm484_vm0, %v4604_v16, %v2332_v12  ;;  %v4692_v3 = vsel %vm484_vm0, %v4600_v31, %v2334_v46 }
 0x810   : > { %2405 = vrot.lane.b32.xlu0 %v1843_v47, %s3515_s10  ;;  %2403 = vrot.lane.b32.xlu1 %v1842_v19, %s3515_s10 }
 0x811   : > { %v2336_v37 = vpop.permute.xlu1 %2335  ;;  %v2338_v54 = vpop.permute.xlu0 %2337 }
 0x812   : > { %v4701_v16 = vsel %vm484_vm0, %v4612_v23, %v2336_v37  ;;  %v4705_v31 = vsel %vm484_vm0, %v4608_v9, %v2338_v54 }
 0x814   : > { %2409 = vrot.lane.b32.xlu0 %v1845_v11, %s3515_s10  ;;  %2407 = vrot.lane.b32.xlu1 %v1844_v62, %s3515_s10 }
 0x815   : > { %v2340_v61 = vpop.permute.xlu1 %2339  ;;  %v2342_v43 = vpop.permute.xlu0 %2341 }
 0x816   : > { %v4713_v23 = vsel %vm484_vm0, %v4620_v55, %v2340_v61  ;;  %v4717_v9 = vsel %vm484_vm0, %v4616_v33, %v2342_v43  ;;  %v4961_v33 = vld [vmem:[#allocation30_spill] sm:$0xff] }
 0x817   : > { %v1849_v7 = vmul.f32 %v3426_v39, %v4961_v33 }
 0x818   : > { %2413 = vrot.lane.b32.xlu0 %v1847_v21, %s3515_s10  ;;  %2411 = vrot.lane.b32.xlu1 %v1846_v4, %s3515_s10 }
 0x819   : > { %v2344_v49 = vpop.permute.xlu1 %2343  ;;  %v2346_v48 = vpop.permute.xlu0 %2345 }
 0x81a   : > { %v4725_v53 = vsel %vm484_vm0, %v4628_v14, %v2344_v49  ;;  %v4729_v55 = vsel %vm484_vm0, %v4624_v34, %v2346_v48  ;;  %v4963_v34 = vld [vmem:[#allocation32_spill] sm:$0xff] }
 0x81b   : > { %v1850_v57 = vmul.f32 %v3430_v17, %v4963_v34 }
 0x81c   : > { %2417 = vrot.lane.b32.xlu0 %v1849_v7, %s3515_s10  ;;  %2415 = vrot.lane.b32.xlu1 %v1848_v56, %s3515_s10 }
 0x81d   : > { %v2348_v27 = vpop.permute.xlu1 %2347  ;;  %v2350_v42 = vpop.permute.xlu0 %2349 }
 0x81e   : > { %v4737_v38 = vsel %vm484_vm0, %v4636_v6, %v2348_v27  ;;  %v4741_v14 = vsel %vm484_vm0, %v4632_v32, %v2350_v42 }
 0x820   : > { %2419 = vrot.lane.b32.xlu1 %v1850_v57, %s3515_s10 }
 0x821   : > { %v2352_v36 = vpop.permute.xlu1 %2351  ;;  %v2354_v63 = vpop.permute.xlu0 %2353 }
 0x822   : > { %v4747_v26 = vsel %vm484_vm0, %v4644_v40, %v2352_v36  ;;  %v4751_v51 = vsel %vm484_vm0, %v4640_v8, %v2354_v63 }
 0x825   : > { %v2356_v6 = vpop.permute.xlu1 %2355  ;;  %v2390_v29 = vpop.permute.xlu0 %2389 }
 0x826   : > { %v4755_v32 = vsel %vm484_vm0, %v4647_v13, %v2356_v6  ;;  %v4759_v24 = vsel %vm2517_vm1, %v4664_v25, %v2390_v29 }
 0x829   : > { %v2392_v18 = vpop.permute.xlu1 %2391 }
 0x82a   : > { %v4763_v40 = vsel %vm2517_vm1, %v4678_v15, %v2392_v18 }
 0x82f   : > { %v3171_v50 = vpop.f32.mrb[48].mxu0 }
 0x830   : > { %v2230_v0 = vpop.f32.mrb[49].mxu0 }
 0x831   : > { %v3172_v8 = vpop.f32.mrb[50].mxu0 }
 0x832   : > { %v2233_v28 = vpop.f32.mrb[51].mxu0 }
 0x837   : > { %v3175_v58 = vpop.f32.mrb[52].mxu0 }
 0x838   : > { %v4765_v12 = vpop.f32.mrb[53].mxu0 }
 0x839   : > { %v3176_v46 = vpop.f32.mrb[54].mxu0 }
 0x83a   : > { %v2249_v45 = vpop.f32.mrb[55].mxu0 }
 0x83f   : > { %v4767_v13 = vpop.f32.mrb[56].mxu0 }
 0x840   : > { %v4769_v10 = vpop.f32.mrb[57].mxu0 }
 0x841   : > { %v3180_v25 = vpop.f32.mrb[58].mxu0 }
 0x842   : > { %v2265_v47 = vpop.f32.mrb[59].mxu0 }
 0x847   : > { %v4771_v35 = vpop.f32.mrb[60].mxu0 }
 0x848   : > { %v4773_v19 = vpop.f32.mrb[61].mxu0 }
 0x849   : > { %v4775_v15 = vpop.f32.mrb[62].mxu0 }
 0x84a   : > { %v4777_v5 = vpop.f32.mrb[63].mxu0 }
 0x85f   : > { %v2131_v37 = vpop.xlane.xlu0 %2130 }
 0x860   : > { %3431 = vrcp.f32 %v2131_v37 }
 0x863   : > { %v2127_v54 = vpop.xlane.xlu0 %2126 }
 0x864   : > { %3433 = vrcp.f32 %v2127_v54 }
 0x867   : > { %v2139_v60 = vpop.xlane.xlu0 %2138 }
 0x868   : > { %3435 = vrcp.f32 %v2139_v60  ;;  %v2129_v41 = vpop.xlane.xlu1 %2128 }
 0x869   : > { %3437 = vrcp.f32 %v2129_v41 }
 0x86a   : > { %v3432_v11 = vpop.eup %3431 }
 0x86b   : > { %v2135_v22 = vpop.xlane.xlu0 %2134  ;;  %v2296_v62 = vmul.f32 %v3432_v11, %v3172_v8 }
 0x86c   : > { %3439 = vrcp.f32 %v2135_v22  ;;  %v2125_v59 = vpop.xlane.xlu1 %2124 }
 0x86d   : > { %3441 = vrcp.f32 %v2125_v59  ;;  %2459 = vrot.lane.b32.xlu1 %v2296_v62, %s3516_s11 }
 0x86e   : > { %v3434_v61 = vpop.eup %3433 }
 0x86f   : > { %v2147_v43 = vpop.xlane.xlu0 %2146  ;;  %v2294_v39 = vmul.f32 %v3434_v61, %v2233_v28 }
 0x870   : > { %3443 = vrcp.f32 %v2147_v43  ;;  %v2137_v44 = vpop.xlane.xlu1 %2136 }
 0x871   : > { %3445 = vrcp.f32 %v2137_v44  ;;  %2455 = vrot.lane.b32.xlu1 %v2294_v39, %s3516_s11 }
 0x872   : > { %v3436_v21 = vpop.eup %3435 }
 0x873   : > { %v3438_v20 = vpop.eup %3437  ;;  %v2143_v4 = vpop.xlane.xlu0 %2142  ;;  %v2300_v30 = vmul.f32 %v3436_v21, %v3176_v46 }
 0x874   : > { %3447 = vrcp.f32 %v2143_v4  ;;  %v2133_v49 = vpop.xlane.xlu1 %2132  ;;  %v2295_v48 = vmul.f32 %v3438_v20, %v3171_v50 }
 0x875   : > { %3449 = vrcp.f32 %v2133_v49  ;;  %2467 = vrot.lane.b32.xlu1 %v2300_v30, %s3516_s11 }
 0x876   : > { %v3440_v33 = vpop.eup %3439  ;;  %2457 = vrot.lane.b32.xlu0 %v2295_v48, %s3516_s11 }
 0x877   : > { %v3442_v7 = vpop.eup %3441  ;;  %v2155_v1 = vpop.xlane.xlu0 %2154  ;;  %v2298_v56 = vmul.f32 %v3440_v33, %v2249_v45 }
 0x878   : > { %v2145_v17 = vpop.xlane.xlu1 %2144  ;;  %v2293_v27 = vmul.f32 %v3442_v7, %v2230_v0 }
 0x879   : > { %3451 = vrcp.f32 %v2145_v17  ;;  %2463 = vrot.lane.b32.xlu1 %v2298_v56, %s3516_s11 }
 0x87a   : > { %v3444_v42 = vpop.eup %3443  ;;  %2453 = vrot.lane.b32.xlu0 %v2293_v27, %s3516_s11 }
 0x87b   : > { %v3446_v34 = vpop.eup %3445  ;;  %v2151_v57 = vpop.xlane.xlu0 %2150  ;;  %v2304_v36 = vmul.f32 %v3444_v42, %v3180_v25 }
 0x87c   : > { %3453 = vrcp.f32 %v2151_v57  ;;  %v2141_v63 = vpop.xlane.xlu1 %2140  ;;  %v2299_v6 = vmul.f32 %v3446_v34, %v3175_v58 }
 0x87d   : > { %3455 = vrcp.f32 %v2141_v63  ;;  %2475 = vrot.lane.b32.xlu1 %v2304_v36, %s3516_s11 }
 0x87e   : > { %v3448_v29 = vpop.eup %3447  ;;  %3457 = vrcp.f32 %v2155_v1  ;;  %2465 = vrot.lane.b32.xlu0 %v2299_v6, %s3516_s11 }
 0x87f   : > { %v3450_v18 = vpop.eup %3449  ;;  %v2302_v50 = vmul.f32 %v3448_v29, %v2265_v47  ;;  %v2394_v22 = vpop.permute.xlu0 %2393 }
 0x880   : > { %v2153_v0 = vpop.xlane.xlu1 %2152  ;;  %v2297_v8 = vmul.f32 %v3450_v18, %v4765_v12 }
 0x881   : > { %2471 = vrot.lane.b32.xlu1 %v2302_v50, %s3516_s11 }
 0x882   : > { %2461 = vrot.lane.b32.xlu0 %v2297_v8, %s3516_s11 }
 0x883   : > { %v3452_v28 = vpop.eup %3451  ;;  %v2398_v59 = vpop.permute.xlu0 %2397 }
 0x884   : > { %v2149_v46 = vpop.xlane.xlu1 %2148  ;;  %v2303_v58 = vmul.f32 %v3452_v28, %v4767_v13 }
 0x885   : > { %3459 = vrcp.f32 %v2149_v46 }
 0x886   : > { %v3454_v45 = vpop.eup %3453  ;;  %2473 = vrot.lane.b32.xlu0 %v2303_v58, %s3516_s11  ;;  %3461 = vrcp.f32 %v2153_v0 }
 0x887   : > { %v3456_v25 = vpop.eup %3455  ;;  %v2306_v37 = vmul.f32 %v3454_v45, %v4777_v5 }
 0x888   : > { %v3458_v47 = vpop.eup %3457  ;;  %v2301_v54 = vmul.f32 %v3456_v25, %v4769_v10  ;;  %v2396_v10 = vpop.permute.xlu1 %2395 }
 0x889   : > { %2479 = vrot.lane.b32.xlu1 %v2306_v37, %s3516_s11  ;;  %v2308_v12 = vmul.f32 %v3458_v47, %v4775_v15  ;;  %v2402_v15 = vpop.permute.xlu0 %2401 }
 0x88a   : > { %2469 = vrot.lane.b32.xlu0 %v2301_v54, %s3516_s11 }
 0x88c   : > { %v2400_v11 = vpop.permute.xlu1 %2399 }
 0x88d   : > { %2483 = vrot.lane.b32.xlu1 %v2308_v12, %s3516_s11  ;;  %v2406_v39 = vpop.permute.xlu0 %2405 }
 0x88e   : > { %v2526_v58 = vsel %vm2517_vm1, %v4717_v9, %v2406_v39 }
 0x88f   : > { %v3460_v13 = vpop.eup %3459 }
 0x890   : > { %v2305_v60 = vmul.f32 %v3460_v13, %v4773_v19  ;;  %v3462_v41 = vpop.eup %3461  ;;  %v2404_v62 = vpop.permute.xlu1 %2403 }
 0x891   : > { %v2307_v5 = vmul.f32 %v3462_v41, %v4771_v35  ;;  %v2410_v21 = vpop.permute.xlu0 %2409  ;;  %v2521_v35 = vsel %vm2517_vm1, %v4688_v2, %v2396_v10  ;;  %v2525_v7 = vsel %vm2517_vm1, %v4713_v23, %v2404_v62  ;;  %v2520_v2 = vsel %vm2517_vm1, %v4674_v52, %v2394_v22 }
 0x892   : > { %2477 = vrot.lane.b32.xlu0 %v2305_v60, %s3516_s11  ;;  %v2528_v8 = vsel %vm2517_vm1, %v4729_v55, %v2410_v21 }
 0x894   : > { %v2408_v61 = vpop.permute.xlu1 %2407 }
 0x895   : > { %v2414_v20 = vpop.permute.xlu0 %2413 }
 0x896   : > { %2481 = vrot.lane.b32.xlu0 %v2307_v5, %s3516_s11  ;;  %v2530_v9 = vsel %vm2517_vm1, %v4741_v14, %v2414_v20 }
 0x898   : > { %v2412_v43 = vpop.permute.xlu1 %2411 }
 0x899   : > { %v2418_v48 = vpop.permute.xlu0 %2417  ;;  %v2529_v57 = vsel %vm2517_vm1, %v4737_v38, %v2412_v43  ;;  %v2522_v38 = vsel %vm2517_vm1, %v4692_v3, %v2398_v59 }
 0x89a   : > { %v2532_v13 = vsel %vm2517_vm1, %v4751_v51, %v2418_v48 }
 0x89c   : > { %v2416_v44 = vpop.permute.xlu1 %2415 }
 0x89d   : > { %v2531_v3 = vsel %vm2517_vm1, %v4747_v26, %v2416_v44 }
 0x8a0   : > { %v2420_v19 = vpop.permute.xlu1 %2419 }
 0x8a1   : > { %v2533_v37 = vsel %vm2517_vm1, %v4755_v32, %v2420_v19 }
 0x8df   : > { %v2460_v4 = vpop.permute.xlu1 %2459 }
 0x8e0   : > { %v2538_v30 = vsel %vm2534_vm2, %v2521_v35, %v2460_v4 }
 0x8e1   : > { %2555 = vst.msk [vmem:[%s4806_s19 + $0x18] sm:$0xff] %vm2551_vm3, %v2538_v30 }
 0x8e3   : > { %v2456_v49 = vpop.permute.xlu1 %2455 }
 0x8e4   : > { %v2536_v33 = vsel %vm2534_vm2, %v4763_v40, %v2456_v49  ;;  %v2523_v40 = vsel %vm2517_vm1, %v4701_v16, %v2400_v11  ;;  %v2524_v16 = vsel %vm2517_vm1, %v4705_v31, %v2402_v15 }
 0x8e5   : > { %2553 = vst.msk [vmem:[%s4806_s19 + $0x8] sm:$0xff] %vm2551_vm3, %v2536_v33 }
 0x8e7   : > { %v2468_v1 = vpop.permute.xlu1 %2467 }
 0x8e8   : > { %v2542_v56 = vsel %vm2534_vm2, %v2525_v7, %v2468_v1  ;;  %v2458_v17 = vpop.permute.xlu0 %2457 }
 0x8e9   : > { %2559 = vst.msk [vmem:[%s4806_s19 + $0x38] sm:$0xff] %vm2551_vm3, %v2542_v56  ;;  %v2537_v27 = vsel %vm2534_vm2, %v2520_v2, %v2458_v17 }
 0x8ea   : > { %2554 = vst.msk [vmem:[%s4806_s19 + $0x10] sm:$0xff] %vm2551_vm3, %v2537_v27 }
 0x8eb   : > { %v2464_v42 = vpop.permute.xlu1 %2463 }
 0x8ec   : > { %v2540_v23 = vsel %vm2534_vm2, %v2523_v40, %v2464_v42  ;;  %v2454_v34 = vpop.permute.xlu0 %2453 }
 0x8ed   : > { %2557 = vst.msk [vmem:[%s4806_s19 + $0x28] sm:$0xff] %vm2551_vm3, %v2540_v23  ;;  %v2535_v52 = vsel %vm2534_vm2, %v4759_v24, %v2454_v34  ;;  %v2527_v24 = vsel %vm2517_vm1, %v4725_v53, %v2408_v61 }
 0x8ee   : > { %2552 = vst.msk [vmem:[%s4806_s19] sm:$0xff] %vm2551_vm3, %v2535_v52 }
 0x8ef   : > { %v2476_v36 = vpop.permute.xlu1 %2475 }
 0x8f0   : > { %v2546_v63 = vsel %vm2534_vm2, %v2529_v57, %v2476_v36  ;;  %v2466_v6 = vpop.permute.xlu0 %2465 }
 0x8f1   : > { %2563 = vst.msk [vmem:[%s4806_s19 + $0x58] sm:$0xff] %vm2551_vm3, %v2546_v63  ;;  %v2541_v29 = vsel %vm2534_vm2, %v2524_v16, %v2466_v6 }
 0x8f2   : > { %2558 = vst.msk [vmem:[%s4806_s19 + $0x30] sm:$0xff] %vm2551_vm3, %v2541_v29 }
 0x8f3   : > { %v2472_v18 = vpop.permute.xlu1 %2471 }
 0x8f4   : > { %v2544_v31 = vsel %vm2534_vm2, %v2527_v24, %v2472_v18  ;;  %v2462_v50 = vpop.permute.xlu0 %2461 }
 0x8f5   : > { %2561 = vst.msk [vmem:[%s4806_s19 + $0x48] sm:$0xff] %vm2551_vm3, %v2544_v31  ;;  %v2539_v0 = vsel %vm2534_vm2, %v2522_v38, %v2462_v50 }
 0x8f6   : > { %2556 = vst.msk [vmem:[%s4806_s19 + $0x20] sm:$0xff] %vm2551_vm3, %v2539_v0 }
 0x8f8   : > { %v2474_v53 = vpop.permute.xlu0 %2473 }
 0x8f9   : > { %v2545_v28 = vsel %vm2534_vm2, %v2528_v8, %v2474_v53 }
 0x8fa   : > { %2562 = vst.msk [vmem:[%s4806_s19 + $0x50] sm:$0xff] %vm2551_vm3, %v2545_v28 }
 0x8fb   : > { %v2480_v46 = vpop.permute.xlu1 %2479 }
 0x8fc   : > { %v2548_v45 = vsel %vm2534_vm2, %v2531_v3, %v2480_v46  ;;  %v2470_v25 = vpop.permute.xlu0 %2469 }
 0x8fd   : > { %2565 = vst.msk [vmem:[%s4806_s19 + $0x68] sm:$0xff] %vm2551_vm3, %v2548_v45  ;;  %v2543_v55 = vsel %vm2534_vm2, %v2526_v58, %v2470_v25 }
 0x8fe   : > { %2560 = vst.msk [vmem:[%s4806_s19 + $0x40] sm:$0xff] %vm2551_vm3, %v2543_v55 }
 0x8ff   : > { %v2484_v47 = vpop.permute.xlu1 %2483 }
 0x900   : > { %v2550_v26 = vsel %vm2534_vm2, %v2533_v37, %v2484_v47 }
 0x901   : > { %2567 = vst.msk [vmem:[%s4806_s19 + $0x78] sm:$0xff] %vm2551_vm3, %v2550_v26 }
 0x904   : > { %v2478_v54 = vpop.permute.xlu0 %2477 }
 0x905   : > { %v2547_v12 = vsel %vm2534_vm2, %v2530_v9, %v2478_v54 }
 0x906   : > { %2564 = vst.msk [vmem:[%s4806_s19 + $0x60] sm:$0xff] %vm2551_vm3, %v2547_v12 }
 0x908   : > { %v2482_v60 = vpop.permute.xlu0 %2481 }
 0x909   : > { %v2549_v41 = vsel %vm2534_vm2, %v2532_v13, %v2482_v60 }
 0x90a   : > { %2566 = vst.msk [vmem:[%s4806_s19 + $0x70] sm:$0xff] %vm2551_vm3, %v2549_v41 }
 0x90b PF: > { %s14_s17 = sadd.s32 1, %s3509_s17   ;;  %s4964_s15 = smov %s3505_s16 }
 0x90c   : > { %p11_p5 = scmp.ge.s32.totalorder %s14_s17, 4   ;;  %s4965_s16 = smov %s4967_s18 }
 0x90e   :  { %13 = sbr.rel (!%p11_p5) target bundleno = 2 (0x2), region = 75 }

</bundles_post_ra>
